<compile_context>
chip_gen: v7x
topology: tpu7x:2x2x1
jax: 0.10.0
libtpu: 0.0.40
codegen_flags: <defaults>
</compile_context>

<pallas_src>
import functools

import jax
import jax.numpy as jnp
from jax.experimental import pallas as pl
from jax.experimental.pallas import tpu as pltpu

_EPS = 1e-5          # InstanceNorm2d default eps
_NEG_SLOPE = 0.2     # LeakyReLU slope

# Sub-pixel decomposition of ConvTranspose2d(kernel=4, stride=2, padding=1):
# output row 2*q+ph pulls from zero-padded input rows (q + off) with kernel
# row kh via the taps below (identical table along width / pw).
#   ph=0: (off=1, kh=1), (off=0, kh=3)
#   ph=1: (off=2, kh=0), (off=1, kh=2)
_TAPS = {0: ((1, 1), (0, 3)), 1: ((2, 0), (1, 2))}


def _conv_kernel(x_ref, w_ref, yraw_ref, stats_ref, *, fused, resident):
    """Pass 1: conv-transpose (4 sub-pixel phases) + partial InstanceNorm stats.

    x_ref:     resident: (1, H+2, W+2, Cin)      bf16  full padded image (batch b)
               halo:     (1, 1, th+2, W+2, Cin)  bf16  pre-windowed H-tile
    w_ref:     (2, 2, 4*Cin, Cout)               bf16  tap-folded weights
    yraw_ref:  (1, th, 2, W, 2*Cout)             bf16  raw conv out, phase-interleaved
                                                       (lanes = [pw=0 ch | pw=1 ch])
    stats_ref: (1, 1, 2, Cout)                   f32   per-tile [sum ; sum-of-squares]
    """
    th, W = yraw_ref.shape[1], yraw_ref.shape[3]
    cout = stats_ref.shape[3]
    cin = x_ref.shape[-1]

    # Hoist the 3 sublane-misaligned W-window slabs (w-offsets 0/1/2); every
    # phase below reuses them via cheap leading-dim row slices.
    if resident:
        row0 = pl.multiple_of(pl.program_id(1) * th, th)
        xw = tuple(x_ref[0, pl.ds(row0, th + 2), w:w + W, :] for w in (0, 1, 2))
    else:
        xw = tuple(x_ref[0, 0, :, w:w + W, :] for w in (0, 1, 2))

    s = jnp.zeros((1, cout), jnp.float32)
    sq = jnp.zeros((1, cout), jnp.float32)

    for ph in (0, 1):
        (ha, _), (hb, _) = _TAPS[ph]
        ys = []
        for pw in (0, 1):
            (wa, _), (wb, _) = _TAPS[pw]
            wins = (xw[wa][ha:ha + th], xw[wb][ha:ha + th],
                    xw[wa][hb:hb + th], xw[wb][hb:hb + th])
            wph = w_ref[ph, pw]                                 # (4*cin, cout)
            if fused:
                # one MXU push per phase, K = 4*cin (lane-aligned concat)
                slab = jnp.concatenate(wins, axis=-1).reshape(th * W, 4 * cin)
                y = jnp.dot(slab, wph, preferred_element_type=jnp.float32)
            else:
                # cin not lane-aligned: lane packing would relayout, so use
                # 4 small dots with f32 accumulation instead.
                y = jnp.zeros((th * W, cout), jnp.float32)
                for i, win in enumerate(wins):
                    y = y + jnp.dot(win.reshape(th * W, cin),
                                    wph[i * cin:(i + 1) * cin, :],
                                    preferred_element_type=jnp.float32)
            # f32 single-pass stats (bias-free conv output; mean cancels bias)
            s = s + jnp.sum(y, axis=0, keepdims=True)
            sq = sq + jnp.sum(y * y, axis=0, keepdims=True)
            ys.append(y)
        # one lane-dense (th, W, 2*Cout) bf16 store per H-phase
        yb = jnp.concatenate(ys, axis=-1).reshape(th, W, 2 * cout)
        yraw_ref[0, :, ph, :, :] = yb.astype(yraw_ref.dtype)

    stats_ref[0, 0, 0:1, :] = s
    stats_ref[0, 0, 1:2, :] = sq


def _norm_kernel(yraw_ref, st_ref, out_ref):
    """Pass 2: pure elementwise InstanceNorm apply + LeakyReLU(0.2).

    yraw_ref: (1, th, 2, W, 2*Cout) bf16
    st_ref:   (1, 2, 2*Cout)        f32   [mean ; inv_std], pw-tiled on lanes
    out_ref:  (1, th, 2, W, 2*Cout) f32
    """
    c2 = out_ref.shape[-1]
    mean = st_ref[0, 0:1, :].reshape(1, 1, c2)
    inv = st_ref[0, 1:2, :].reshape(1, 1, c2)
    for ph in (0, 1):
        yn = (yraw_ref[0, :, ph, :, :].astype(jnp.float32) - mean) * inv
        out_ref[0, :, ph, :, :] = jnp.where(
            yn > 0, yn, _NEG_SLOPE * yn).astype(out_ref.dtype)


def _vmem_capacity_bytes():
    try:
        info = pltpu.get_tpu_info()
        for name in ("vmem_capacity_bytes", "vmem_size_bytes", "vmem_bytes"):
            v = getattr(info, name, None)
            if v:
                return int(v)
    except Exception:
        pass
    return 128 * 1024 * 1024


def _vmem_limit_bytes(capacity):
    # v7x (64 MiB physical) -> ~48 MiB; v5e/v6e (128 MiB) -> ~102 MiB.
    return max(32 * 1024 * 1024,
               min(capacity - 16 * 1024 * 1024, int(0.8 * capacity)))


def _footprint(th, H, W, cin, cout, resident):
    """Per-grid-step VMEM use: double-buffered blocks + in-kernel temporaries."""
    bf, f32 = 2, 4
    x_blk = ((H + 2) if resident else (th + 2)) * (W + 2) * cin * bf
    w_blk = 16 * cin * cout * bf
    y1_blk = 4 * th * W * cout * bf
    st_blk = 2 * cout * f32
    tmp1 = (3 * (th + 2) * W * cin * bf            # hoisted W-slabs
            + 4 * th * W * cin * bf                # fused concat slab
            + 4 * th * W * cout * f32)             # live f32 phase tiles
    p1 = 2 * (x_blk + w_blk + y1_blk + st_blk) + tmp1
    p2 = (2 * (4 * th * W * cout * bf + 4 * th * W * cout * f32)
          + 4 * th * W * cout * f32)
    return max(p1, p2)


def _choose_tile(N, H, W, cin, cout, budget):
    """Largest H-tile whose VMEM footprint fits `budget`, preferring a
    resident (un-retiled) input and an even, >=2 parallel step count."""
    divs = [d for d in range(1, H + 1) if H % d == 0]
    for resident in (True, False):
        fit = [d for d in divs
               if _footprint(d, H, W, cin, cout, resident) <= budget]
        if not fit:
            continue
        best = max(fit)
        cands = [d for d in fit if 2 * d >= best]   # shrink at most 2x
        th = max(cands, key=lambda d: (N * (H // d) >= 2,
                                       (N * (H // d)) % 2 == 0, d))
        return th, resident
    return 1, False


def unet_up_1x2(x_nchw, x_sk_nchw, weight, bias=None):
    """Forward of UnetUp1x2 with default config (stride=2, normalize=True,
    prop=False, dropout=0).  `bias` accepted for API parity but unused: under
    InstanceNorm2d(affine=False) the ConvTranspose2d bias cancels exactly
    (NOT valid for a normalize=False configuration).  Matmuls run in bf16
    with f32 accumulation; the raw conv output is stored in bf16 while the
    InstanceNorm statistics are accumulated in f32.

    x_nchw:    (N, Cin, H, W)
    x_sk_nchw: (N, Csk, 2H, 2W)
    weight:    (Cin, Cout, 4, 4)   -- PyTorch ConvTranspose2d weight layout
    returns:   (N, Cout + Csk, 2H, 2W)
    """
    # TODO(synk): non-default configs (prop=True, stride=1, normalize=False,
    # dropout>0) are not implemented.
    del bias
    N, Cin, H, W = x_nchw.shape
    Cout = weight.shape[1]

    # Zero-pad Cin in [64,128) up to a lane-aligned multiple of 128 so the
    # fused K=4*Cin MXU path applies; below 64 the pad overhead outweighs it.
    cpad = ((-Cin) % 128) if (Cin % 128 != 0 and Cin >= 64) else 0
    Cin_k = Cin + cpad
    fused = (Cin_k % 128 == 0)

    capacity = _vmem_capacity_bytes()
    vmem_limit = _vmem_limit_bytes(capacity)
    th, resident = _choose_tile(N, H, W, Cin_k, Cout, int(0.7 * vmem_limit))
    TH = H // th

    # ---- wrapper-side layout plumbing (no compute) ----
    x = jnp.transpose(x_nchw, (0, 2, 3, 1))                       # NHWC
    x_pad = jnp.pad(x, ((0, 0), (1, 1), (1, 1), (0, cpad))
                    ).astype(jnp.bfloat16)                        # (N,H+2,W+2,Cin_k)

    if resident:
        x_in = x_pad
        x_spec = pl.BlockSpec((1, H + 2, W + 2, Cin_k),
                              lambda b, t: (b, 0, 0, 0))
    else:
        # halo-stacked fallback when the padded image does not fit VMEM
        x_in = jnp.stack([x_pad[:, t * th:t * th + th + 2] for t in range(TH)],
                         axis=1)                                  # (N,TH,th+2,W+2,Cin_k)
        x_spec = pl.BlockSpec((1, 1, th + 2, W + 2, Cin_k),
                              lambda b, t: (b, t, 0, 0, 0))

    # fold the 4 taps of every sub-pixel phase into one (4*Cin_k, Cout) matrix
    w4 = jnp.transpose(weight, (2, 3, 0, 1))                      # (4,4,Cin,Cout)
    w4 = jnp.pad(w4, ((0, 0), (0, 0), (0, cpad), (0, 0)))

    def _fold(ph, pw):
        (_, kha), (_, khb) = _TAPS[ph]
        (_, kwa), (_, kwb) = _TAPS[pw]
        return jnp.concatenate([w4[kha, kwa], w4[kha, kwb],
                                w4[khb, kwa], w4[khb, kwb]], axis=0)

    wf = jnp.stack([jnp.stack([_fold(0, 0), _fold(0, 1)], axis=0),
                    jnp.stack([_fold(1, 0), _fold(1, 1)], axis=0)],
                   axis=0).astype(jnp.bfloat16)                   # (2,2,4Cin_k,Cout)
    # TODO(synk): for very wide layers on v7x (16*Cin*Cout*2 B approaching the
    # 64 MiB VMEM) single-buffer this constant weight block or K-tile 4*Cin.

    yraw_bytes = N * 4 * H * W * Cout * 2

    # ---- pass 1: conv-transpose + per-tile partial stats ----
    y_raw, pstats = pl.pallas_call(
        functools.partial(_conv_kernel, fused=fused, resident=resident),
        out_shape=(jax.ShapeDtypeStruct((N, H, 2, W, 2 * Cout), jnp.bfloat16),
                   jax.ShapeDtypeStruct((N, TH, 2, Cout), jnp.float32)),
        grid_spec=pltpu.PrefetchScalarGridSpec(
            num_scalar_prefetch=0,
            grid=(N, TH),
            in_specs=[
                x_spec,
                pl.BlockSpec((2, 2, 4 * Cin_k, Cout),
                             lambda b, t: (0, 0, 0, 0)),
            ],
            out_specs=(
                pl.BlockSpec((1, th, 2, W, 2 * Cout),
                             lambda b, t: (b, t, 0, 0, 0)),
                pl.BlockSpec((1, 1, 2, Cout),
                             lambda b, t: (b, t, 0, 0)),
            ),
        ),
        compiler_params=pltpu.CompilerParams(
            dimension_semantics=("parallel", "parallel"),
            vmem_limit_bytes=vmem_limit),
        cost_estimate=pl.CostEstimate(
            flops=2 * 16 * H * W * Cin_k * Cout * N,
            transcendentals=0,
            bytes_accessed=int(x_in.size) * 2 + int(wf.size) * 2
                           + yraw_bytes + N * TH * 2 * Cout * 4),
    )(x_in, wf)

    # ---- per-(batch,channel) mean / inv_std computed ONCE (tiny XLA reduce,
    # f32, variance clamped at 0 against E[x^2]-mean^2 cancellation) ----
    n_spatial = float(4 * H * W)
    tot = jnp.sum(pstats, axis=1)                                 # (N, 2, Cout)
    mean = tot[:, 0, :] / n_spatial                               # (N, Cout)
    var = jnp.maximum(tot[:, 1, :] / n_spatial - mean * mean, 0.0)
    inv_std = jax.lax.rsqrt(var + _EPS)
    stats2 = jnp.stack([jnp.concatenate([mean, mean], axis=-1),
                        jnp.concatenate([inv_std, inv_std], axis=-1)],
                       axis=1)                                    # (N, 2, 2*Cout)

    # ---- pass 2: elementwise InstanceNorm apply + LeakyReLU ----
    y_act = pl.pallas_call(
        _norm_kernel,
        out_shape=jax.ShapeDtypeStruct((N, H, 2, W, 2 * Cout), jnp.float32),
        grid_spec=pltpu.PrefetchScalarGridSpec(
            num_scalar_prefetch=0,
            grid=(N, TH),
            in_specs=[
                pl.BlockSpec((1, th, 2, W, 2 * Cout),
                             lambda b, t: (b, t, 0, 0, 0)),
                pl.BlockSpec((1, 2, 2 * Cout), lambda b, t: (b, 0, 0)),
            ],
            out_specs=pl.BlockSpec((1, th, 2, W, 2 * Cout),
                                   lambda b, t: (b, t, 0, 0, 0)),
        ),
        compiler_params=pltpu.CompilerParams(
            dimension_semantics=("parallel", "parallel"),
            vmem_limit_bytes=vmem_limit),
        cost_estimate=pl.CostEstimate(
            flops=6 * N * 4 * H * W * Cout,
            transcendentals=0,
            bytes_accessed=3 * yraw_bytes + N * 4 * Cout * 4),
    )(y_raw, stats2)

    # (N,H,2,W,2*Cout) -> (N,2H,2W,Cout) is a FREE metadata reshape; the one
    # remaining NHWC->NCHW transpose is fused by XLA with the skip concat.
    y = y_act.reshape(N, 2 * H, 2 * W, Cout)
    y_nchw = jnp.transpose(y, (0, 3, 1, 2))
    # torch.cat([model(x), x_sk], dim=1)
    return jnp.concatenate([y_nchw, x_sk_nchw.astype(y_nchw.dtype)], axis=1)


def _reference(x, x_sk, weight, bias):
    """Pure-JAX f32 reference of the same forward (for self-check)."""
    w_flip = jnp.flip(weight, axis=(2, 3)).transpose(1, 0, 2, 3)  # (Cout,Cin,4,4)
    y = jax.lax.conv_general_dilated(
        x, w_flip, window_strides=(1, 1), padding=[(2, 2), (2, 2)],
        lhs_dilation=(2, 2), rhs_dilation=(1, 1),
        dimension_numbers=('NCHW', 'OIHW', 'NCHW'))
    y = y + bias[None, :, None, None]
    mean = jnp.mean(y, axis=(2, 3), keepdims=True)
    var = jnp.mean((y - mean) ** 2, axis=(2, 3), keepdims=True)
    yn = (y - mean) / jnp.sqrt(var + _EPS)
    ya = jnp.where(yn > 0, yn, _NEG_SLOPE * yn)
    return jnp.concatenate([ya, x_sk], axis=1)


def _run_case(key, N, Cin, Cout, Csk, H, W):
    k1, k2, k3, k4 = jax.random.split(key, 4)
    x = jax.random.normal(k1, (N, Cin, H, W), jnp.float32)
    x_sk = jax.random.normal(k2, (N, Csk, 2 * H, 2 * W), jnp.float32)
    weight = jax.random.normal(k3, (Cin, Cout, 4, 4), jnp.float32) * 0.1
    bias = jax.random.normal(k4, (Cout,), jnp.float32) * 0.1
    out = jax.block_until_ready(jax.jit(unet_up_1x2)(x, x_sk, weight, bias))
    ref = jax.block_until_ready(_reference(x, x_sk, weight, bias))
    assert out.shape == (N, Cout + Csk, 2 * H, 2 * W), out.shape
    # tolerance covers bf16 inputs/weights and the bf16 y_raw store
    max_err = float(jnp.max(jnp.abs(out - ref)))
    assert max_err < 5e-2, f"max abs error too large: {max_err}"


if __name__ == "__main__":
    key = jax.random.PRNGKey(0)
    ka, kb, kc = jax.random.split(key, 3)
    # small PyTorch-ish shapes (exercises the Cin<64 per-tap fallback path)
    _run_case(ka, N=2, Cin=4, Cout=4, Csk=4, H=16, W=16)
    # lane-aligned channels (fused K=4*Cin matmul path; N=1 still gets a
    # 2-step parallel tile axis for megacore)
    _run_case(kb, N=1, Cin=128, Cout=8, Csk=4, H=8, W=8)
    # Cin in [64,128): zero-padded to 128 in the wrapper -> fused MXU path
    _run_case(kc, N=1, Cin=64, Cout=8, Csk=4, H=8, W=8)
    print("KERNEL_OK")
</pallas_src>

<mosaic_0001>
module attributes {stable_mosaic.version = 11 : i64} {
  func.func @_conv_kernel(%arg0: i32, %arg1: i32, %arg2: memref<1x18x18x4xbf16, #tpu.memory_space<vmem>>, %arg3: memref<2x2x16x4xbf16, #tpu.memory_space<vmem>>, %arg4: memref<1x16x2x16x8xbf16, #tpu.memory_space<vmem>>, %arg5: memref<1x1x2x4xf32, #tpu.memory_space<vmem>>) attributes {dimension_semantics = [#tpu.dimension_semantics<parallel>, #tpu.dimension_semantics<parallel>], iteration_bounds = array<i64: 2, 1>, scalar_prefetch = 0 : i64, scratch_operands = 0 : i64, tpu.core_type = #tpu.core_type<tc>, window_params = [{transform_indices = @transform_0, window_bounds = array<i64: 1, 18, 18, 4>}, {pipeline_mode = #tpu.pipeline_mode<synchronous>, transform_indices = @transform_1, window_bounds = array<i64: 2, 2, 16, 4>}, {transform_indices = @transform_2, window_bounds = array<i64: 1, 16, 2, 16, 8>}, {transform_indices = @transform_3, window_bounds = array<i64: 1, 1, 2, 4>}]} {
    %c16_i32 = arith.constant 16 : i32
    %0 = arith.muli %arg1, %c16_i32 : i32
    %1 = tpu.assume_multiple %0, 16 : i32
    %c0 = arith.constant 0 : index
    %2 = arith.index_cast %1 : i32 to index
    %c0_0 = arith.constant 0 : index
    %c0_1 = arith.constant 0 : index
    %3 = vector.load %arg2[%c0, %2, %c0_0, %c0_1] : memref<1x18x18x4xbf16, #tpu.memory_space<vmem>>, vector<1x18x16x4xbf16>
    %4 = vector.shape_cast %3 : vector<1x18x16x4xbf16> to vector<18x16x4xbf16>
    %c0_2 = arith.constant 0 : index
    %5 = arith.index_cast %1 : i32 to index
    %c1 = arith.constant 1 : index
    %c0_3 = arith.constant 0 : index
    %6 = vector.load %arg2[%c0_2, %5, %c1, %c0_3] : memref<1x18x18x4xbf16, #tpu.memory_space<vmem>>, vector<1x18x16x4xbf16>
    %7 = vector.shape_cast %6 : vector<1x18x16x4xbf16> to vector<18x16x4xbf16>
    %c0_4 = arith.constant 0 : index
    %8 = arith.index_cast %1 : i32 to index
    %c2 = arith.constant 2 : index
    %c0_5 = arith.constant 0 : index
    %9 = vector.load %arg2[%c0_4, %8, %c2, %c0_5] : memref<1x18x18x4xbf16, #tpu.memory_space<vmem>>, vector<1x18x16x4xbf16>
    %10 = vector.shape_cast %9 : vector<1x18x16x4xbf16> to vector<18x16x4xbf16>
    %cst = arith.constant 0.000000e+00 : f32
    %11 = vector.broadcast %cst : f32 to vector<1x4xf32>
    %cst_6 = arith.constant 0.000000e+00 : f32
    %12 = vector.broadcast %cst_6 : f32 to vector<1x4xf32>
    %13 = vector.extract_strided_slice %7 {offsets = [1, 0, 0], sizes = [16, 16, 4], strides = [1, 1, 1]} : vector<18x16x4xbf16> to vector<16x16x4xbf16>
    %14 = vector.extract_strided_slice %4 {offsets = [1, 0, 0], sizes = [16, 16, 4], strides = [1, 1, 1]} : vector<18x16x4xbf16> to vector<16x16x4xbf16>
    %15 = vector.extract_strided_slice %7 {offsets = [0, 0, 0], sizes = [16, 16, 4], strides = [1, 1, 1]} : vector<18x16x4xbf16> to vector<16x16x4xbf16>
    %16 = vector.extract_strided_slice %4 {offsets = [0, 0, 0], sizes = [16, 16, 4], strides = [1, 1, 1]} : vector<18x16x4xbf16> to vector<16x16x4xbf16>
    %c0_7 = arith.constant 0 : index
    %c0_8 = arith.constant 0 : index
    %c0_9 = arith.constant 0 : index
    %c0_10 = arith.constant 0 : index
    %17 = vector.load %arg3[%c0_7, %c0_8, %c0_9, %c0_10] : memref<2x2x16x4xbf16, #tpu.memory_space<vmem>>, vector<1x1x16x4xbf16>
    %18 = vector.shape_cast %17 : vector<1x1x16x4xbf16> to vector<16x4xbf16>
    %cst_11 = arith.constant 0.000000e+00 : f32
    %19 = vector.broadcast %cst_11 : f32 to vector<256x4xf32>
    %20 = vector.shape_cast %13 : vector<16x16x4xbf16> to vector<256x4xbf16>
    %21 = vector.extract_strided_slice %18 {offsets = [0, 0], sizes = [4, 4], strides = [1, 1]} : vector<16x4xbf16> to vector<4x4xbf16>
    %cst_12 = arith.constant dense<0.000000e+00> : vector<256x4xf32>
    %22 = tpu.matmul %20, %21, %cst_12 {dimension_numbers = #tpu.dot_dimension_numbers<[1], [0], [0], [1], [0, 0, 1, 1], [], []>} : vector<256x4xbf16>, vector<4x4xbf16>, vector<256x4xf32> -> vector<256x4xf32>
    %23 = arith.addf %19, %22 : vector<256x4xf32>
    %24 = vector.shape_cast %14 : vector<16x16x4xbf16> to vector<256x4xbf16>
    %25 = vector.extract_strided_slice %18 {offsets = [4, 0], sizes = [4, 4], strides = [1, 1]} : vector<16x4xbf16> to vector<4x4xbf16>
    %cst_13 = arith.constant dense<0.000000e+00> : vector<256x4xf32>
    %26 = tpu.matmul %24, %25, %cst_13 {dimension_numbers = #tpu.dot_dimension_numbers<[1], [0], [0], [1], [0, 0, 1, 1], [], []>} : vector<256x4xbf16>, vector<4x4xbf16>, vector<256x4xf32> -> vector<256x4xf32>
    %27 = arith.addf %23, %26 : vector<256x4xf32>
    %28 = vector.shape_cast %15 : vector<16x16x4xbf16> to vector<256x4xbf16>
    %29 = vector.extract_strided_slice %18 {offsets = [8, 0], sizes = [4, 4], strides = [1, 1]} : vector<16x4xbf16> to vector<4x4xbf16>
    %cst_14 = arith.constant dense<0.000000e+00> : vector<256x4xf32>
    %30 = tpu.matmul %28, %29, %cst_14 {dimension_numbers = #tpu.dot_dimension_numbers<[1], [0], [0], [1], [0, 0, 1, 1], [], []>} : vector<256x4xbf16>, vector<4x4xbf16>, vector<256x4xf32> -> vector<256x4xf32>
    %31 = arith.addf %27, %30 : vector<256x4xf32>
    %32 = vector.shape_cast %16 : vector<16x16x4xbf16> to vector<256x4xbf16>
    %33 = vector.extract_strided_slice %18 {offsets = [12, 0], sizes = [4, 4], strides = [1, 1]} : vector<16x4xbf16> to vector<4x4xbf16>
    %cst_15 = arith.constant dense<0.000000e+00> : vector<256x4xf32>
    %34 = tpu.matmul %32, %33, %cst_15 {dimension_numbers = #tpu.dot_dimension_numbers<[1], [0], [0], [1], [0, 0, 1, 1], [], []>} : vector<256x4xbf16>, vector<4x4xbf16>, vector<256x4xf32> -> vector<256x4xf32>
    %35 = arith.addf %31, %34 : vector<256x4xf32>
    %cst_16 = arith.constant dense<0.000000e+00> : vector<4xf32>
    %36 = vector.multi_reduction <add>, %35, %cst_16 [0] : vector<256x4xf32> to vector<4xf32>
    %37 = vector.shape_cast %36 : vector<4xf32> to vector<1x4xf32>
    %38 = arith.addf %11, %37 : vector<1x4xf32>
    %39 = arith.mulf %35, %35 : vector<256x4xf32>
    %cst_17 = arith.constant dense<0.000000e+00> : vector<4xf32>
    %40 = vector.multi_reduction <add>, %39, %cst_17 [0] : vector<256x4xf32> to vector<4xf32>
    %41 = vector.shape_cast %40 : vector<4xf32> to vector<1x4xf32>
    %42 = arith.addf %12, %41 : vector<1x4xf32>
    %43 = vector.extract_strided_slice %10 {offsets = [1, 0, 0], sizes = [16, 16, 4], strides = [1, 1, 1]} : vector<18x16x4xbf16> to vector<16x16x4xbf16>
    %44 = vector.extract_strided_slice %7 {offsets = [1, 0, 0], sizes = [16, 16, 4], strides = [1, 1, 1]} : vector<18x16x4xbf16> to vector<16x16x4xbf16>
    %45 = vector.extract_strided_slice %10 {offsets = [0, 0, 0], sizes = [16, 16, 4], strides = [1, 1, 1]} : vector<18x16x4xbf16> to vector<16x16x4xbf16>
    %46 = vector.extract_strided_slice %7 {offsets = [0, 0, 0], sizes = [16, 16, 4], strides = [1, 1, 1]} : vector<18x16x4xbf16> to vector<16x16x4xbf16>
    %c0_18 = arith.constant 0 : index
    %c1_19 = arith.constant 1 : index
    %c0_20 = arith.constant 0 : index
    %c0_21 = arith.constant 0 : index
    %47 = vector.load %arg3[%c0_18, %c1_19, %c0_20, %c0_21] : memref<2x2x16x4xbf16, #tpu.memory_space<vmem>>, vector<1x1x16x4xbf16>
    %48 = vector.shape_cast %47 : vector<1x1x16x4xbf16> to vector<16x4xbf16>
    %cst_22 = arith.constant 0.000000e+00 : f32
    %49 = vector.broadcast %cst_22 : f32 to vector<256x4xf32>
    %50 = vector.shape_cast %43 : vector<16x16x4xbf16> to vector<256x4xbf16>
    %51 = vector.extract_strided_slice %48 {offsets = [0, 0], sizes = [4, 4], strides = [1, 1]} : vector<16x4xbf16> to vector<4x4xbf16>
    %cst_23 = arith.constant dense<0.000000e+00> : vector<256x4xf32>
    %52 = tpu.matmul %50, %51, %cst_23 {dimension_numbers = #tpu.dot_dimension_numbers<[1], [0], [0], [1], [0, 0, 1, 1], [], []>} : vector<256x4xbf16>, vector<4x4xbf16>, vector<256x4xf32> -> vector<256x4xf32>
    %53 = arith.addf %49, %52 : vector<256x4xf32>
    %54 = vector.shape_cast %44 : vector<16x16x4xbf16> to vector<256x4xbf16>
    %55 = vector.extract_strided_slice %48 {offsets = [4, 0], sizes = [4, 4], strides = [1, 1]} : vector<16x4xbf16> to vector<4x4xbf16>
    %cst_24 = arith.constant dense<0.000000e+00> : vector<256x4xf32>
    %56 = tpu.matmul %54, %55, %cst_24 {dimension_numbers = #tpu.dot_dimension_numbers<[1], [0], [0], [1], [0, 0, 1, 1], [], []>} : vector<256x4xbf16>, vector<4x4xbf16>, vector<256x4xf32> -> vector<256x4xf32>
    %57 = arith.addf %53, %56 : vector<256x4xf32>
    %58 = vector.shape_cast %45 : vector<16x16x4xbf16> to vector<256x4xbf16>
    %59 = vector.extract_strided_slice %48 {offsets = [8, 0], sizes = [4, 4], strides = [1, 1]} : vector<16x4xbf16> to vector<4x4xbf16>
    %cst_25 = arith.constant dense<0.000000e+00> : vector<256x4xf32>
    %60 = tpu.matmul %58, %59, %cst_25 {dimension_numbers = #tpu.dot_dimension_numbers<[1], [0], [0], [1], [0, 0, 1, 1], [], []>} : vector<256x4xbf16>, vector<4x4xbf16>, vector<256x4xf32> -> vector<256x4xf32>
    %61 = arith.addf %57, %60 : vector<256x4xf32>
    %62 = vector.shape_cast %46 : vector<16x16x4xbf16> to vector<256x4xbf16>
    %63 = vector.extract_strided_slice %48 {offsets = [12, 0], sizes = [4, 4], strides = [1, 1]} : vector<16x4xbf16> to vector<4x4xbf16>
    %cst_26 = arith.constant dense<0.000000e+00> : vector<256x4xf32>
    %64 = tpu.matmul %62, %63, %cst_26 {dimension_numbers = #tpu.dot_dimension_numbers<[1], [0], [0], [1], [0, 0, 1, 1], [], []>} : vector<256x4xbf16>, vector<4x4xbf16>, vector<256x4xf32> -> vector<256x4xf32>
    %65 = arith.addf %61, %64 : vector<256x4xf32>
    %cst_27 = arith.constant dense<0.000000e+00> : vector<4xf32>
    %66 = vector.multi_reduction <add>, %65, %cst_27 [0] : vector<256x4xf32> to vector<4xf32>
    %67 = vector.shape_cast %66 : vector<4xf32> to vector<1x4xf32>
    %68 = arith.addf %38, %67 : vector<1x4xf32>
    %69 = arith.mulf %65, %65 : vector<256x4xf32>
    %cst_28 = arith.constant dense<0.000000e+00> : vector<4xf32>
    %70 = vector.multi_reduction <add>, %69, %cst_28 [0] : vector<256x4xf32> to vector<4xf32>
    %71 = vector.shape_cast %70 : vector<4xf32> to vector<1x4xf32>
    %72 = arith.addf %42, %71 : vector<1x4xf32>
    %73 = tpu.concatenate %35, %65 in 1 : vector<256x4xf32>, vector<256x4xf32> -> vector<256x8xf32>
    %74 = vector.shape_cast %73 : vector<256x8xf32> to vector<16x16x8xf32>
    %75 = arith.truncf %74 : vector<16x16x8xf32> to vector<16x16x8xbf16>
    %c0_29 = arith.constant 0 : index
    %c0_30 = arith.constant 0 : index
    %c0_31 = arith.constant 0 : index
    %c0_32 = arith.constant 0 : index
    %c0_33 = arith.constant 0 : index
    %76 = vector.load %arg4[%c0_29, %c0_30, %c0_31, %c0_32, %c0_33] : memref<1x16x2x16x8xbf16, #tpu.memory_space<vmem>>, vector<1x16x1x16x8xbf16>
    %77 = vector.shape_cast %76 : vector<1x16x1x16x8xbf16> to vector<16x16x8xbf16>
    %78 = vector.shape_cast %75 : vector<16x16x8xbf16> to vector<1x16x1x16x8xbf16>
    tpu.vector_store %arg4[%c0_29, %c0_30, %c0_31, %c0_32, %c0_33], %78 {strides = array<i32>} : memref<1x16x2x16x8xbf16, #tpu.memory_space<vmem>>, vector<1x16x1x16x8xbf16>,
    %79 = vector.extract_strided_slice %7 {offsets = [2, 0, 0], sizes = [16, 16, 4], strides = [1, 1, 1]} : vector<18x16x4xbf16> to vector<16x16x4xbf16>
    %80 = vector.extract_strided_slice %4 {offsets = [2, 0, 0], sizes = [16, 16, 4], strides = [1, 1, 1]} : vector<18x16x4xbf16> to vector<16x16x4xbf16>
    %81 = vector.extract_strided_slice %7 {offsets = [1, 0, 0], sizes = [16, 16, 4], strides = [1, 1, 1]} : vector<18x16x4xbf16> to vector<16x16x4xbf16>
    %82 = vector.extract_strided_slice %4 {offsets = [1, 0, 0], sizes = [16, 16, 4], strides = [1, 1, 1]} : vector<18x16x4xbf16> to vector<16x16x4xbf16>
    %c1_34 = arith.constant 1 : index
    %c0_35 = arith.constant 0 : index
    %c0_36 = arith.constant 0 : index
    %c0_37 = arith.constant 0 : index
    %83 = vector.load %arg3[%c1_34, %c0_35, %c0_36, %c0_37] : memref<2x2x16x4xbf16, #tpu.memory_space<vmem>>, vector<1x1x16x4xbf16>
    %84 = vector.shape_cast %83 : vector<1x1x16x4xbf16> to vector<16x4xbf16>
    %cst_38 = arith.constant 0.000000e+00 : f32
    %85 = vector.broadcast %cst_38 : f32 to vector<256x4xf32>
    %86 = vector.shape_cast %79 : vector<16x16x4xbf16> to vector<256x4xbf16>
    %87 = vector.extract_strided_slice %84 {offsets = [0, 0], sizes = [4, 4], strides = [1, 1]} : vector<16x4xbf16> to vector<4x4xbf16>
    %cst_39 = arith.constant dense<0.000000e+00> : vector<256x4xf32>
    %88 = tpu.matmul %86, %87, %cst_39 {dimension_numbers = #tpu.dot_dimension_numbers<[1], [0], [0], [1], [0, 0, 1, 1], [], []>} : vector<256x4xbf16>, vector<4x4xbf16>, vector<256x4xf32> -> vector<256x4xf32>
    %89 = arith.addf %85, %88 : vector<256x4xf32>
    %90 = vector.shape_cast %80 : vector<16x16x4xbf16> to vector<256x4xbf16>
    %91 = vector.extract_strided_slice %84 {offsets = [4, 0], sizes = [4, 4], strides = [1, 1]} : vector<16x4xbf16> to vector<4x4xbf16>
    %cst_40 = arith.constant dense<0.000000e+00> : vector<256x4xf32>
    %92 = tpu.matmul %90, %91, %cst_40 {dimension_numbers = #tpu.dot_dimension_numbers<[1], [0], [0], [1], [0, 0, 1, 1], [], []>} : vector<256x4xbf16>, vector<4x4xbf16>, vector<256x4xf32> -> vector<256x4xf32>
    %93 = arith.addf %89, %92 : vector<256x4xf32>
    %94 = vector.shape_cast %81 : vector<16x16x4xbf16> to vector<256x4xbf16>
    %95 = vector.extract_strided_slice %84 {offsets = [8, 0], sizes = [4, 4], strides = [1, 1]} : vector<16x4xbf16> to vector<4x4xbf16>
    %cst_41 = arith.constant dense<0.000000e+00> : vector<256x4xf32>
    %96 = tpu.matmul %94, %95, %cst_41 {dimension_numbers = #tpu.dot_dimension_numbers<[1], [0], [0], [1], [0, 0, 1, 1], [], []>} : vector<256x4xbf16>, vector<4x4xbf16>, vector<256x4xf32> -> vector<256x4xf32>
    %97 = arith.addf %93, %96 : vector<256x4xf32>
    %98 = vector.shape_cast %82 : vector<16x16x4xbf16> to vector<256x4xbf16>
    %99 = vector.extract_strided_slice %84 {offsets = [12, 0], sizes = [4, 4], strides = [1, 1]} : vector<16x4xbf16> to vector<4x4xbf16>
    %cst_42 = arith.constant dense<0.000000e+00> : vector<256x4xf32>
    %100 = tpu.matmul %98, %99, %cst_42 {dimension_numbers = #tpu.dot_dimension_numbers<[1], [0], [0], [1], [0, 0, 1, 1], [], []>} : vector<256x4xbf16>, vector<4x4xbf16>, vector<256x4xf32> -> vector<256x4xf32>
    %101 = arith.addf %97, %100 : vector<256x4xf32>
    %cst_43 = arith.constant dense<0.000000e+00> : vector<4xf32>
    %102 = vector.multi_reduction <add>, %101, %cst_43 [0] : vector<256x4xf32> to vector<4xf32>
    %103 = vector.shape_cast %102 : vector<4xf32> to vector<1x4xf32>
    %104 = arith.addf %68, %103 : vector<1x4xf32>
    %105 = arith.mulf %101, %101 : vector<256x4xf32>
    %cst_44 = arith.constant dense<0.000000e+00> : vector<4xf32>
    %106 = vector.multi_reduction <add>, %105, %cst_44 [0] : vector<256x4xf32> to vector<4xf32>
    %107 = vector.shape_cast %106 : vector<4xf32> to vector<1x4xf32>
    %108 = arith.addf %72, %107 : vector<1x4xf32>
    %109 = vector.extract_strided_slice %10 {offsets = [2, 0, 0], sizes = [16, 16, 4], strides = [1, 1, 1]} : vector<18x16x4xbf16> to vector<16x16x4xbf16>
    %110 = vector.extract_strided_slice %7 {offsets = [2, 0, 0], sizes = [16, 16, 4], strides = [1, 1, 1]} : vector<18x16x4xbf16> to vector<16x16x4xbf16>
    %111 = vector.extract_strided_slice %10 {offsets = [1, 0, 0], sizes = [16, 16, 4], strides = [1, 1, 1]} : vector<18x16x4xbf16> to vector<16x16x4xbf16>
    %112 = vector.extract_strided_slice %7 {offsets = [1, 0, 0], sizes = [16, 16, 4], strides = [1, 1, 1]} : vector<18x16x4xbf16> to vector<16x16x4xbf16>
    %c1_45 = arith.constant 1 : index
    %c1_46 = arith.constant 1 : index
    %c0_47 = arith.constant 0 : index
    %c0_48 = arith.constant 0 : index
    %113 = vector.load %arg3[%c1_45, %c1_46, %c0_47, %c0_48] : memref<2x2x16x4xbf16, #tpu.memory_space<vmem>>, vector<1x1x16x4xbf16>
    %114 = vector.shape_cast %113 : vector<1x1x16x4xbf16> to vector<16x4xbf16>
    %cst_49 = arith.constant 0.000000e+00 : f32
    %115 = vector.broadcast %cst_49 : f32 to vector<256x4xf32>
    %116 = vector.shape_cast %109 : vector<16x16x4xbf16> to vector<256x4xbf16>
    %117 = vector.extract_strided_slice %114 {offsets = [0, 0], sizes = [4, 4], strides = [1, 1]} : vector<16x4xbf16> to vector<4x4xbf16>
    %cst_50 = arith.constant dense<0.000000e+00> : vector<256x4xf32>
    %118 = tpu.matmul %116, %117, %cst_50 {dimension_numbers = #tpu.dot_dimension_numbers<[1], [0], [0], [1], [0, 0, 1, 1], [], []>} : vector<256x4xbf16>, vector<4x4xbf16>, vector<256x4xf32> -> vector<256x4xf32>
    %119 = arith.addf %115, %118 : vector<256x4xf32>
    %120 = vector.shape_cast %110 : vector<16x16x4xbf16> to vector<256x4xbf16>
    %121 = vector.extract_strided_slice %114 {offsets = [4, 0], sizes = [4, 4], strides = [1, 1]} : vector<16x4xbf16> to vector<4x4xbf16>
    %cst_51 = arith.constant dense<0.000000e+00> : vector<256x4xf32>
    %122 = tpu.matmul %120, %121, %cst_51 {dimension_numbers = #tpu.dot_dimension_numbers<[1], [0], [0], [1], [0, 0, 1, 1], [], []>} : vector<256x4xbf16>, vector<4x4xbf16>, vector<256x4xf32> -> vector<256x4xf32>
    %123 = arith.addf %119, %122 : vector<256x4xf32>
    %124 = vector.shape_cast %111 : vector<16x16x4xbf16> to vector<256x4xbf16>
    %125 = vector.extract_strided_slice %114 {offsets = [8, 0], sizes = [4, 4], strides = [1, 1]} : vector<16x4xbf16> to vector<4x4xbf16>
    %cst_52 = arith.constant dense<0.000000e+00> : vector<256x4xf32>
    %126 = tpu.matmul %124, %125, %cst_52 {dimension_numbers = #tpu.dot_dimension_numbers<[1], [0], [0], [1], [0, 0, 1, 1], [], []>} : vector<256x4xbf16>, vector<4x4xbf16>, vector<256x4xf32> -> vector<256x4xf32>
    %127 = arith.addf %123, %126 : vector<256x4xf32>
    %128 = vector.shape_cast %112 : vector<16x16x4xbf16> to vector<256x4xbf16>
    %129 = vector.extract_strided_slice %114 {offsets = [12, 0], sizes = [4, 4], strides = [1, 1]} : vector<16x4xbf16> to vector<4x4xbf16>
    %cst_53 = arith.constant dense<0.000000e+00> : vector<256x4xf32>
    %130 = tpu.matmul %128, %129, %cst_53 {dimension_numbers = #tpu.dot_dimension_numbers<[1], [0], [0], [1], [0, 0, 1, 1], [], []>} : vector<256x4xbf16>, vector<4x4xbf16>, vector<256x4xf32> -> vector<256x4xf32>
    %131 = arith.addf %127, %130 : vector<256x4xf32>
    %cst_54 = arith.constant dense<0.000000e+00> : vector<4xf32>
    %132 = vector.multi_reduction <add>, %131, %cst_54 [0] : vector<256x4xf32> to vector<4xf32>
    %133 = vector.shape_cast %132 : vector<4xf32> to vector<1x4xf32>
    %134 = arith.addf %104, %133 : vector<1x4xf32>
    %135 = arith.mulf %131, %131 : vector<256x4xf32>
    %cst_55 = arith.constant dense<0.000000e+00> : vector<4xf32>
    %136 = vector.multi_reduction <add>, %135, %cst_55 [0] : vector<256x4xf32> to vector<4xf32>
    %137 = vector.shape_cast %136 : vector<4xf32> to vector<1x4xf32>
    %138 = arith.addf %108, %137 : vector<1x4xf32>
    %139 = tpu.concatenate %101, %131 in 1 : vector<256x4xf32>, vector<256x4xf32> -> vector<256x8xf32>
    %140 = vector.shape_cast %139 : vector<256x8xf32> to vector<16x16x8xf32>
    %141 = arith.truncf %140 : vector<16x16x8xf32> to vector<16x16x8xbf16>
    %c0_56 = arith.constant 0 : index
    %c0_57 = arith.constant 0 : index
    %c1_58 = arith.constant 1 : index
    %c0_59 = arith.constant 0 : index
    %c0_60 = arith.constant 0 : index
    %142 = vector.load %arg4[%c0_56, %c0_57, %c1_58, %c0_59, %c0_60] : memref<1x16x2x16x8xbf16, #tpu.memory_space<vmem>>, vector<1x16x1x16x8xbf16>
    %143 = vector.shape_cast %142 : vector<1x16x1x16x8xbf16> to vector<16x16x8xbf16>
    %144 = vector.shape_cast %141 : vector<16x16x8xbf16> to vector<1x16x1x16x8xbf16>
    tpu.vector_store %arg4[%c0_56, %c0_57, %c1_58, %c0_59, %c0_60], %144 {strides = array<i32>} : memref<1x16x2x16x8xbf16, #tpu.memory_space<vmem>>, vector<1x16x1x16x8xbf16>,
    %c0_61 = arith.constant 0 : index
    %c0_62 = arith.constant 0 : index
    %c0_63 = arith.constant 0 : index
    %c0_64 = arith.constant 0 : index
    %145 = vector.load %arg5[%c0_61, %c0_62, %c0_63, %c0_64] : memref<1x1x2x4xf32, #tpu.memory_space<vmem>>, vector<1x1x1x4xf32>
    %146 = vector.shape_cast %145 : vector<1x1x1x4xf32> to vector<1x4xf32>
    %147 = vector.shape_cast %134 : vector<1x4xf32> to vector<1x1x1x4xf32>
    tpu.vector_store %arg5[%c0_61, %c0_62, %c0_63, %c0_64], %147 {strides = array<i32>} : memref<1x1x2x4xf32, #tpu.memory_space<vmem>>, vector<1x1x1x4xf32>,
    %c0_65 = arith.constant 0 : index
    %c0_66 = arith.constant 0 : index
    %c1_67 = arith.constant 1 : index
    %c0_68 = arith.constant 0 : index
    %148 = vector.load %arg5[%c0_65, %c0_66, %c1_67, %c0_68] : memref<1x1x2x4xf32, #tpu.memory_space<vmem>>, vector<1x1x1x4xf32>
    %149 = vector.shape_cast %148 : vector<1x1x1x4xf32> to vector<1x4xf32>
    %150 = vector.shape_cast %138 : vector<1x4xf32> to vector<1x1x1x4xf32>
    tpu.vector_store %arg5[%c0_65, %c0_66, %c1_67, %c0_68], %150 {strides = array<i32>} : memref<1x1x2x4xf32, #tpu.memory_space<vmem>>, vector<1x1x1x4xf32>,
    return
  }
  func.func @transform_0(%arg0: i32, %arg1: i32) -> (i32, i32, i32, i32) {
    %c0_i32 = arith.constant 0 : i32
    %c0_i32_0 = arith.constant 0 : i32
    %c0_i32_1 = arith.constant 0 : i32
    %c0_i32_2 = arith.constant 0 : i32
    return %arg0, %c0_i32, %c0_i32_0, %c0_i32_1 : i32, i32, i32, i32
  }
  func.func @transform_1(%arg0: i32, %arg1: i32) -> (i32, i32, i32, i32) {
    %c0_i32 = arith.constant 0 : i32
    %c0_i32_0 = arith.constant 0 : i32
    %c0_i32_1 = arith.constant 0 : i32
    %c0_i32_2 = arith.constant 0 : i32
    %c0_i32_3 = arith.constant 0 : i32
    return %c0_i32, %c0_i32_0, %c0_i32_1, %c0_i32_2 : i32, i32, i32, i32
  }
  func.func @transform_2(%arg0: i32, %arg1: i32) -> (i32, i32, i32, i32, i32) {
    %c0_i32 = arith.constant 0 : i32
    %c0_i32_0 = arith.constant 0 : i32
    %c0_i32_1 = arith.constant 0 : i32
    %c0_i32_2 = arith.constant 0 : i32
    return %arg0, %arg1, %c0_i32, %c0_i32_0, %c0_i32_1 : i32, i32, i32, i32, i32
  }
  func.func @transform_3(%arg0: i32, %arg1: i32) -> (i32, i32, i32, i32) {
    %c0_i32 = arith.constant 0 : i32
    %c0_i32_0 = arith.constant 0 : i32
    %c0_i32_1 = arith.constant 0 : i32
    return %arg0, %arg1, %c0_i32, %c0_i32_0 : i32, i32, i32, i32
  }
}

module attributes {stable_mosaic.version = 11 : i64} {
  func.func @_norm_kernel(%arg0: i32, %arg1: i32, %arg2: memref<1x16x2x16x8xbf16, #tpu.memory_space<vmem>>, %arg3: memref<1x2x8xf32, #tpu.memory_space<vmem>>, %arg4: memref<1x16x2x16x8xf32, #tpu.memory_space<vmem>>) attributes {dimension_semantics = [#tpu.dimension_semantics<parallel>, #tpu.dimension_semantics<parallel>], iteration_bounds = array<i64: 2, 1>, scalar_prefetch = 0 : i64, scratch_operands = 0 : i64, tpu.core_type = #tpu.core_type<tc>, window_params = [{transform_indices = @transform_0, window_bounds = array<i64: 1, 16, 2, 16, 8>}, {transform_indices = @transform_1, window_bounds = array<i64: 1, 2, 8>}, {transform_indices = @transform_2, window_bounds = array<i64: 1, 16, 2, 16, 8>}]} {
    %c0 = arith.constant 0 : index
    %c0_0 = arith.constant 0 : index
    %c0_1 = arith.constant 0 : index
    %0 = vector.load %arg3[%c0, %c0_0, %c0_1] : memref<1x2x8xf32, #tpu.memory_space<vmem>>, vector<1x1x8xf32>
    %1 = vector.shape_cast %0 : vector<1x1x8xf32> to vector<1x8xf32>
    %2 = vector.shape_cast %1 : vector<1x8xf32> to vector<1x1x8xf32>
    %c0_2 = arith.constant 0 : index
    %c1 = arith.constant 1 : index
    %c0_3 = arith.constant 0 : index
    %3 = vector.load %arg3[%c0_2, %c1, %c0_3] : memref<1x2x8xf32, #tpu.memory_space<vmem>>, vector<1x1x8xf32>
    %4 = vector.shape_cast %3 : vector<1x1x8xf32> to vector<1x8xf32>
    %5 = vector.shape_cast %4 : vector<1x8xf32> to vector<1x1x8xf32>
    %c0_4 = arith.constant 0 : index
    %c0_5 = arith.constant 0 : index
    %c0_6 = arith.constant 0 : index
    %c0_7 = arith.constant 0 : index
    %c0_8 = arith.constant 0 : index
    %6 = vector.load %arg2[%c0_4, %c0_5, %c0_6, %c0_7, %c0_8] : memref<1x16x2x16x8xbf16, #tpu.memory_space<vmem>>, vector<1x16x1x16x8xbf16>
    %7 = vector.shape_cast %6 : vector<1x16x1x16x8xbf16> to vector<16x16x8xbf16>
    %8 = arith.extf %7 : vector<16x16x8xbf16> to vector<16x16x8xf32>
    %9 = vector.broadcast %2 : vector<1x1x8xf32> to vector<16x16x8xf32>
    %10 = arith.subf %8, %9 : vector<16x16x8xf32>
    %11 = vector.broadcast %5 : vector<1x1x8xf32> to vector<16x16x8xf32>
    %12 = arith.mulf %10, %11 : vector<16x16x8xf32>
    %cst = arith.constant 0.000000e+00 : f32
    %13 = vector.broadcast %cst : f32 to vector<16x16x8xf32>
    %14 = arith.cmpf ogt, %12, %13 : vector<16x16x8xf32>
    %cst_9 = arith.constant 2.000000e-01 : f32
    %15 = vector.broadcast %cst_9 : f32 to vector<16x16x8xf32>
    %16 = arith.mulf %15, %12 : vector<16x16x8xf32>
    %17 = arith.select %14, %12, %16 : vector<16x16x8xi1>, vector<16x16x8xf32>
    %c0_10 = arith.constant 0 : index
    %c0_11 = arith.constant 0 : index
    %c0_12 = arith.constant 0 : index
    %c0_13 = arith.constant 0 : index
    %c0_14 = arith.constant 0 : index
    %18 = vector.load %arg4[%c0_10, %c0_11, %c0_12, %c0_13, %c0_14] : memref<1x16x2x16x8xf32, #tpu.memory_space<vmem>>, vector<1x16x1x16x8xf32>
    %19 = vector.shape_cast %18 : vector<1x16x1x16x8xf32> to vector<16x16x8xf32>
    %20 = vector.shape_cast %17 : vector<16x16x8xf32> to vector<1x16x1x16x8xf32>
    tpu.vector_store %arg4[%c0_10, %c0_11, %c0_12, %c0_13, %c0_14], %20 {strides = array<i32>} : memref<1x16x2x16x8xf32, #tpu.memory_space<vmem>>, vector<1x16x1x16x8xf32>,
    %c0_15 = arith.constant 0 : index
    %c0_16 = arith.constant 0 : index
    %c1_17 = arith.constant 1 : index
    %c0_18 = arith.constant 0 : index
    %c0_19 = arith.constant 0 : index
    %21 = vector.load %arg2[%c0_15, %c0_16, %c1_17, %c0_18, %c0_19] : memref<1x16x2x16x8xbf16, #tpu.memory_space<vmem>>, vector<1x16x1x16x8xbf16>
    %22 = vector.shape_cast %21 : vector<1x16x1x16x8xbf16> to vector<16x16x8xbf16>
    %23 = arith.extf %22 : vector<16x16x8xbf16> to vector<16x16x8xf32>
    %24 = vector.broadcast %2 : vector<1x1x8xf32> to vector<16x16x8xf32>
    %25 = arith.subf %23, %24 : vector<16x16x8xf32>
    %26 = vector.broadcast %5 : vector<1x1x8xf32> to vector<16x16x8xf32>
    %27 = arith.mulf %25, %26 : vector<16x16x8xf32>
    %cst_20 = arith.constant 0.000000e+00 : f32
    %28 = vector.broadcast %cst_20 : f32 to vector<16x16x8xf32>
    %29 = arith.cmpf ogt, %27, %28 : vector<16x16x8xf32>
    %cst_21 = arith.constant 2.000000e-01 : f32
    %30 = vector.broadcast %cst_21 : f32 to vector<16x16x8xf32>
    %31 = arith.mulf %30, %27 : vector<16x16x8xf32>
    %32 = arith.select %29, %27, %31 : vector<16x16x8xi1>, vector<16x16x8xf32>
    %c0_22 = arith.constant 0 : index
    %c0_23 = arith.constant 0 : index
    %c1_24 = arith.constant 1 : index
    %c0_25 = arith.constant 0 : index
    %c0_26 = arith.constant 0 : index
    %33 = vector.load %arg4[%c0_22, %c0_23, %c1_24, %c0_25, %c0_26] : memref<1x16x2x16x8xf32, #tpu.memory_space<vmem>>, vector<1x16x1x16x8xf32>
    %34 = vector.shape_cast %33 : vector<1x16x1x16x8xf32> to vector<16x16x8xf32>
    %35 = vector.shape_cast %32 : vector<16x16x8xf32> to vector<1x16x1x16x8xf32>
    tpu.vector_store %arg4[%c0_22, %c0_23, %c1_24, %c0_25, %c0_26], %35 {strides = array<i32>} : memref<1x16x2x16x8xf32, #tpu.memory_space<vmem>>, vector<1x16x1x16x8xf32>,
    return
  }
  func.func @transform_0(%arg0: i32, %arg1: i32) -> (i32, i32, i32, i32, i32) {
    %c0_i32 = arith.constant 0 : i32
    %c0_i32_0 = arith.constant 0 : i32
    %c0_i32_1 = arith.constant 0 : i32
    %c0_i32_2 = arith.constant 0 : i32
    return %arg0, %arg1, %c0_i32, %c0_i32_0, %c0_i32_1 : i32, i32, i32, i32, i32
  }
  func.func @transform_1(%arg0: i32, %arg1: i32) -> (i32, i32, i32) {
    %c0_i32 = arith.constant 0 : i32
    %c0_i32_0 = arith.constant 0 : i32
    %c0_i32_1 = arith.constant 0 : i32
    return %arg0, %c0_i32, %c0_i32_0 : i32, i32, i32
  }
  func.func @transform_2(%arg0: i32, %arg1: i32) -> (i32, i32, i32, i32, i32) {
    %c0_i32 = arith.constant 0 : i32
    %c0_i32_0 = arith.constant 0 : i32
    %c0_i32_1 = arith.constant 0 : i32
    %c0_i32_2 = arith.constant 0 : i32
    return %arg0, %arg1, %c0_i32, %c0_i32_0, %c0_i32_1 : i32, i32, i32, i32, i32
  }
}

</mosaic_0001>

<bundles_post_ra>
// kernel: unet_up_1x2.3
= control target key start
LH: loop header
LB: loop body
LE: loop exit
PB: predicated region body
PF: predicated region fallthrough
CT: control target
= control target key end

     0   :  { %7 = vsyncpa [#allocation3], 0  ;;  %s1875_s0 = inlined_call_operand.hbm [shape: bf16[2,16,2,16,8], index: 0, kind: input, shape index: {}]   ;;  %s1876_s1 = inlined_call_operand.hbm [shape: f32[2,2,8], index: 1, kind: input, shape index: {}]   ;;  %s1877_s2 = inlined_call_operand.hbm [shape: f32[2,16,2,16,8], index: 2, kind: output, shape index: {}]  }
   0x1   :  { %9 = vsyncpa [#allocation3 + $0x1], 0 }
   0x2   :  { %10 = vsyncpa [#allocation6], 0 }
   0x3   :  { %12 = vsyncpa [#allocation6 + $0x1], 0 }
   0x4   :  { %13 = vsyncpa [#allocation4], 0 }
   0x5   :  { %15 = vsyncpa [#allocation4 + $0x1], 0  ;;  %s1358_s9 = smov 0   ;;  %s1360_s10 = smov 0  }
   0x6   :  { %s1362_s11 = smov 0   ;;  %s1364_s12 = smov 0  }
   0x7   :  { %s1366_s13 = smov 0   ;;  %s1368_s14 = smov 0  }
   0x8 LB: > { %s872_s15 = sadd.s32 4294967295, %s1334_s14   ;;  %s873_s16 = sadd.s32 4294967294, %s1334_s14   ;;  %s1334_s14 = sphi %s1368_s14, %s21_s14   ;;  %s1330_s13 = sphi %s1366_s13, %s1896_s13   ;;  %s1326_s12 = sphi %s1364_s12, %s1895_s12   ;;  %s1322_s11 = sphi %s1362_s11, %s1894_s11   ;;  %s1318_s10 = sphi %s1360_s10, %s1893_s10   ;;  %s1314_s9 = sphi %s1358_s9, %s1892_s9  }
   0x9   : > { %s33_s17 = sadd.s32 1, %s1330_s13  ;;  %s42_s18 = sadd.s32 1, %s1322_s11 }
   0xa   : > { %p35_p0 = scmp.ge.s32.totalorder %s33_s17, 2  ;;  %p49_p1 = scmp.ne.s32.totalorder %s1322_s11, %s1318_s10 }
   0xb   : > { %p50_p2 = scmp.eq.s32.totalorder %s1334_s14, 0  ;;  %p55_p3 = scmp.ne.s32.totalorder %s1318_s10, %s1314_s9 }
   0xc   : > { %s1898_s17 = smov (%p35_p0, %s33_s17), 0  ;;  %p56_p5 = scmp.eq.s32.totalorder %s872_s15, 0 }
   0xd   : > { %p1399_p4 = por %p50_p2, %p49_p1  ;;  %s37_s20 = ssub.s32 %s1330_s13, %s1898_s17 }
   0xe   : > { %p107_p6 = scmp.eq.s32.totalorder %s872_s15, 1  ;;  %p40_p7 = scmp.eq.s32.totalorder %s37_s20, 0 }
   0xf   : > { %p1405_p8 = por %p56_p5, %p55_p3  ;;  %p113_p10 = scmp.eq.s32.totalorder %s873_s16, 1 }
  0x10   : > { %p1409_p9 = por %p107_p6, %p49_p1  ;;  %p1134_p13 = scmp.lt.s32.totalorder %s1334_s14, 2 }
  0x11   : > { %s1881_s21 = scalar_select %p1405_p8, 1, 0 }
  0x12   : > { %s1882_s22 = scalar_select %p1409_p9, 1, 0 }
  0x13   : > { %s1414_s23 = scalar_select %p40_p7, %s1322_s11, %s42_s18  }
  0x14   : > { %p1416_p11 = por %p113_p10, %p55_p3  ;;  %s1423_s25 = sand.u32 1, %s1322_s11  }
  0x15   : > { %s876_s26 = sshll.u32 %s1423_s25, 8  ;;  %s956_s27 = sshll.u32 %s1330_s13, 12 }
  0x16   : > { %s1883_s24 = scalar_select %p1416_p11, 1, 0 }
  0x17   : > { %s1430_s30 = scalar_lea.hbm %s1875_s0, %s956_s27  ;;  %s137_s3 = scalar_lea.vmem [#allocation2], %s876_s26 }
  0x18   : > { %s147_s4 = sshll.u32 %s137_s3, 4  ;;  %p1436_p0 = pnand %p1134_p13, %p1399_p4  ;;  %s1432_s4 = int_to_ptr.vmem [resolvable:$true] %s147_s4 }
  0x19   : > { %s134_s6 = scalar_lea.sflag [#allocation3], %s1423_s25  ;;  %s1188_s7 = scalar_lea.hbm %s1430_s30, 4096 }
  0x1a   : > { %p1189_p2 = scmp.ne.s32.totalorder %s1430_s30, %s1188_s7  ;;  %p1190_p3 = pneg %p1436_p0 }
  0x1b   : > { %s1193_s16 = scalar_lea.hbm %s1875_s0, 8192  ;;  %p1194_p4 = scmp.lt.u32.totalorder %s1430_s30, %s1875_s0 }
  0x1c   : > { %p1191_p5 = pnand %p1190_p3, %p1189_p2  ;;  %p1195_p7 = scmp.lt.u32.totalorder %s1193_s16, %s1188_s7 }
  0x1d   : > { %p1197_p13 = scmp.lt.u32.totalorder %s1188_s7, %s1430_s30 }
  0x1e   : > { %p1192_p6 = pneg %p1191_p5  ;;  %p1196_p10 = por %p1195_p7, %p1194_p4 }
  0x20   : > { %p1198_p12 = por %p1197_p13, %p1196_p10 }
  0x22   : > { %p1199_p1 = pnand %p1198_p12, %p1192_p6 }
  0x24   : > { %1202 = shalt.err (!%p1199_p1)
}
  0x25   : > { %s1203_s20 = scalar_lea.vmem %s1432_s4, 4096  ;;  %s1336_s26 = smov [#allocation2]  }
  0x26   : > { %p1204_p2 = scmp.ne.s32.totalorder %s1432_s4, %s1203_s20  ;;  %s1208_s27 = sshll.u32 %s1336_s26, 4  ;;  %s1209_s27 = int_to_ptr.vmem [resolvable:$false] %s1208_s27 }
  0x27   : > { %s1210_s28 = scalar_lea.vmem %s1209_s27, 8192  ;;  %p1211_p9 = scmp.lt.s32.totalorder %s1432_s4, %s1209_s27 }
  0x28   : > { %p1206_p5 = pnand %p1204_p2, %p1190_p3  ;;  %p1212_p4 = scmp.lt.s32.totalorder %s1210_s28, %s1203_s20 }
  0x2a   : > { %p1207_p11 = pneg %p1206_p5  ;;  %p1213_p7 = por %p1212_p4, %p1211_p9 }
  0x2c   : > { %p1214_p10 = pnand %p1213_p7, %p1207_p11 }
  0x2e   : > { %1217 = shalt.err (!%p1214_p10)
}
  0x2f   : > { %s1337_s29 = smov 64   ;;  %s1338_s3 = smov 4  }
  0x30   : > { %1126 = dma.hbm_to_vmem [thread:$0]  (!%p1436_p0), %s1430_s30, 4096, %s1432_s4, %s134_s6, %s1337_s29, %s1337_s29, %s1338_s3  }
  0x31   : > { %p173_p12 = scmp.lt.s32.totalorder %s1334_s14, 3  ;;  %s879_s7 = sshll.u32 %s1423_s25, 1 }
  0x32   : > { %s880_s8 = sshll.u32 %s1330_s13, 5  ;;  %p1885_p9 = scmp.ge.s32.totalorder %s1334_s14, 1 }
  0x33   : > { %s1481_s19 = scalar_lea.hbm %s1876_s1, %s880_s8  ;;  %s161_s20 = scalar_lea.vmem [#allocation5], %s879_s7 }
  0x34   : > { %p1474_p11 = pnand %p1885_p9, %p173_p12  ;;  %s168_s26 = sshll.u32 %s161_s20, 4  ;;  %s169_s26 = int_to_ptr.vmem [resolvable:$true] %s168_s26 }
  0x35   : > { %s158_s30 = scalar_lea.sflag [#allocation6], %s1423_s25  ;;  %s1218_s4 = scalar_lea.hbm %s1481_s19, 32 }
  0x36   : > { %s1886_s15 = scalar_select %p1474_p11, 1, 0 }
  0x37   : > { %p1219_p1 = scmp.ne.s32.totalorder %s1481_s19, %s1218_s4  ;;  %s1223_s28 = scalar_lea.hbm %s1876_s1, 64 }
  0x38   : > { %p1224_p2 = scmp.lt.u32.totalorder %s1481_s19, %s1876_s1  ;;  %p1225_p5 = scmp.lt.u32.totalorder %s1223_s28, %s1218_s4 }
  0x39   : > { %p1221_p6 = pnand %p1219_p1, %p1190_p3  ;;  %p1227_p7 = scmp.lt.u32.totalorder %s1218_s4, %s1481_s19 }
  0x3a   : > { %p1226_p4 = por %p1225_p5, %p1224_p2 }
  0x3b   : > { %p1222_p13 = pneg %p1221_p6 }
  0x3c   : > { %p1228_p10 = por %p1227_p7, %p1226_p4 }
  0x3e   : > { %p1229_p12 = pnand %p1228_p10, %p1222_p13 }
  0x40   : > { %1232 = shalt.err (!%p1229_p12)
}
  0x41   : > { %s1233_s25 = scalar_lea.vmem %s169_s26, 32  ;;  %s1339_s7 = smov [#allocation5]  }
  0x42   : > { %p1234_p9 = scmp.ne.s32.totalorder %s169_s26, %s1233_s25  ;;  %s1238_s8 = sshll.u32 %s1339_s7, 4  ;;  %s1239_s8 = int_to_ptr.vmem [resolvable:$false] %s1238_s8 }
  0x43   : > { %s1240_s16 = scalar_lea.vmem %s1239_s8, 64  ;;  %p1241_p8 = scmp.lt.s32.totalorder %s169_s26, %s1239_s8 }
  0x44   : > { %p1236_p1 = pnand %p1234_p9, %p1190_p3  ;;  %p1242_p11 = scmp.lt.s32.totalorder %s1240_s16, %s1233_s25 }
  0x46   : > { %p1237_p6 = pneg %p1236_p1  ;;  %p1243_p2 = por %p1242_p11, %p1241_p8 }
  0x48   : > { %p1244_p5 = pnand %p1243_p2, %p1237_p6 }
  0x4a   : > { %1247 = shalt.err (!%p1244_p5)
}
  0x4b   : > { %1129 = dma.hbm_to_vmem [thread:$0]  (!%p1436_p0), %s1481_s19, 32, %s169_s26, %s158_s30  }
  0x4c   : > { %p1887_p13 = scmp.ne.s32.totalorder %s1886_s15, 0 }
  0x4d   : > { %s1506_s18 = sand.u32 (!%p1887_p13), 1, %s1318_s10   ;;  %p1888_p8 = scmp.ne.s32.totalorder (!%p1887_p13), %s1881_s21, 0 }
  0x4e   : > { %177 = sbr.rel (%p1887_p13) target bundleno = 205 (0xcd), region = 28  ;;  %s882_s20 = sshll.u32 (!%p1887_p13), %s1506_s18, 8 }
  0x4f   : > { %s180_s4 = scalar_lea.sflag (!%p1887_p13), [#allocation3], %s1506_s18  ;;  %s1510_s6 = scalar_lea.vmem (!%p1887_p13), [#allocation2], %s882_s20 }
  0x55   : > { %1301 = dma.done.wait (%p1888_p8), %s180_s4, 4096  }
  0x56   : > { %1303 = vsyncadd (%p1888_p8), %s180_s4, 4294963200  ;;  %s883_s5 = sshll.u32 %s1506_s18, 1  ;;  %s189_s15 = scalar_lea.sflag [#allocation6], %s1506_s18 }
  0x57   : > { %s192_s19 = scalar_lea.vmem [#allocation5], %s883_s5 }
  0x58   : > { %1305 = dma.done.wait (%p1888_p8), %s189_s15, 32  }
  0x59   : > { %1307 = vsyncadd (%p1888_p8), %s189_s15, 4294967264  ;;  %v1522_v0 = vld [vmem:[%s192_s19] ss:$0 sm:$0xff]  ;;  %vm454_vm0 = vcmask 64512   ;;  %v1086_v4 = vld [vmem:[%s1510_s6 + $0x10] sm:$0xff]   ;;  %s884_s21 = sshll.u32 %s1506_s18, 9 }
  0x5a   : > { %v959_v1 = vld [vmem:[%s1510_s6] sm:$0xff]   ;;  %v1088_v6 = vld [vmem:[%s1510_s6 + $0x30] sm:$0xff]   ;;  %v964_v8 = vunpack.c.l.bf16 %v1086_v4  ;;  %v965_v9 = vunpack.c.h.bf16 %v1086_v4  ;;  %s1549_s26 = scalar_lea.vmem [#allocation7], %s884_s21  ;;  %s957_s30 = sshll.u32 %s1326_s12, 13 }
  0x5b   : > { %v960_v2 = vunpack.c.l.bf16 %v959_v1  ;;  %v961_v3 = vunpack.c.h.bf16 %v959_v1  ;;  %v1087_v5 = vld [vmem:[%s1510_s6 + $0x20] sm:$0xff]   ;;  %v972_v14 = vunpack.c.l.bf16 %v1088_v6  ;;  %v973_v15 = vunpack.c.h.bf16 %v1088_v6  ;;  %v1090_v36 = vld [vmem:[%s1510_s6 + $0x50] sm:$0xff]   ;;  %s762_s27 = sshll.u32 %s1549_s26, 4  ;;  %s1820_s29 = scalar_lea.hbm %s1877_s2, %s957_s30  ;;  %s1822_s27 = int_to_ptr.vmem [resolvable:$true] %s762_s27 }
  0x5c   : > { %v1528_v7 = vld [vmem:[%s192_s19 + $0x1] ss:$0 sm:$0xff]  ;;  %v968_v10 = vunpack.c.l.bf16 %v1087_v5  ;;  %v969_v11 = vunpack.c.h.bf16 %v1087_v5  ;;  %v292_v16 = vsub.f32 %v964_v8, %v1522_v0  ;;  %v293_v17 = vsub.f32 %v965_v9, %v1522_v0  ;;  %v1092_v55 = vld [vmem:[%s1510_s6 + $0x70] sm:$0xff]   ;;  %s746_s3 = scalar_lea.sflag [#allocation4], %s1506_s18  ;;  %s1248_s25 = scalar_lea.vmem %s1822_s27, 8192 }
  0x5d   : > { %v290_v12 = vsub.f32 %v960_v2, %v1522_v0  ;;  %v291_v13 = vsub.f32 %v961_v3, %v1522_v0  ;;  %v296_v22 = vsub.f32 %v972_v14, %v1522_v0  ;;  %v297_v23 = vsub.f32 %v973_v15, %v1522_v0  ;;  %v1089_v28 = vld [vmem:[%s1510_s6 + $0x40] sm:$0xff]   ;;  %p1249_p0 = scmp.ne.s32.totalorder %s1822_s27, %s1248_s25  ;;  %p1889_p3 = scmp.ne.s32.totalorder %s1882_s22, 0 }
  0x5e   : > { %v294_v18 = vsub.f32 %v968_v10, %v1522_v0  ;;  %v295_v19 = vsub.f32 %v969_v11, %v1522_v0  ;;  %v328_v24 = vmul.f32 %v1528_v7, %v292_v16  ;;  %v329_v25 = vmul.f32 %v1528_v7, %v293_v17  ;;  %v1091_v48 = vld [vmem:[%s1510_s6 + $0x60] sm:$0xff]   ;;  %s1340_s7 = smov [#allocation7]  }
  0x5f   : > { %v326_v20 = vmul.f32 %v1528_v7, %v290_v12  ;;  %v327_v21 = vmul.f32 %v1528_v7, %v291_v13  ;;  %v332_v41 = vmul.f32 %v1528_v7, %v296_v22  ;;  %v333_v42 = vmul.f32 %v1528_v7, %v297_v23  ;;  %v1093_v14 = vld [vmem:[%s1510_s6 + $0x80] sm:$0xff]   ;;  %p1250_p11 = pnand %p1249_p0, %p1889_p3  ;;  %s1252_s8 = sshll.u32 %s1340_s7, 4  ;;  %s1253_s8 = int_to_ptr.vmem [resolvable:$false] %s1252_s8 }
  0x60   : > { %v330_v26 = vmul.f32 %v1528_v7, %v294_v18  ;;  %v331_v27 = vmul.f32 %v1528_v7, %v295_v19  ;;  %vm360_vm3 = vcmp.gt.f32.partialorder %v328_v24, 0.0  ;;  %v392_v31 = vmul.f32 0.2, %v328_v24  ;;  %v1094_v19 = vld [vmem:[%s1510_s6 + $0x90] sm:$0xff]   ;;  %s1254_s16 = scalar_lea.vmem %s1253_s8, 16384  ;;  %p1255_p7 = scmp.lt.s32.totalorder %s1822_s27, %s1253_s8 }
  0x61   : > { %vm358_vm1 = vcmp.gt.f32.partialorder %v326_v20, 0.0  ;;  %v390_v29 = vmul.f32 0.2, %v326_v20  ;;  %vm359_vm2 = vcmp.gt.f32.partialorder %v327_v21, 0.0  ;;  %v391_v30 = vmul.f32 0.2, %v327_v21  ;;  %p1251_p4 = pneg %p1250_p11  ;;  %p1256_p10 = scmp.lt.s32.totalorder %s1254_s16, %s1248_s25 }
  0x62   : > { %vm361_vm4 = vcmp.gt.f32.partialorder %v329_v25, 0.0  ;;  %v393_v32 = vmul.f32 0.2, %v329_v25  ;;  %vm362_vm5 = vcmp.gt.f32.partialorder %v330_v26, 0.0  ;;  %v394_v35 = vmul.f32 0.2, %v330_v26 }
  0x63   : > { %v422_v33 = vsel %vm358_vm1, %v326_v20, %v390_v29  ;;  %v423_v34 = vsel %vm359_vm2, %v327_v21, %v391_v30  ;;  %v424_v37 = vsel %vm360_vm3, %v328_v24, %v392_v31  ;;  %vm363_vm6 = vcmp.gt.f32.partialorder %v331_v27, 0.0  ;;  %v1095_v30 = vld [vmem:[%s1510_s6 + $0xa0] sm:$0xff]   ;;  %p1257_p12 = por %p1256_p10, %p1255_p7 }
  0x64   : > { %455 = vst.msk [vmem:[%s1549_s26] sm:$0xff] %vm454_vm0, %v422_v33  ;;  %456 = vst.msk [vmem:[%s1549_s26 + $0x8] sm:$0xff] %vm454_vm0, %v423_v34  ;;  %v425_v38 = vsel %vm361_vm4, %v329_v25, %v393_v32  ;;  %v395_v39 = vmul.f32 0.2, %v331_v27  ;;  %v426_v40 = vsel %vm362_vm5, %v330_v26, %v394_v35  ;;  %v976_v43 = vunpack.c.l.bf16 %v1089_v28 }
  0x65   : > { %457 = vst.msk [vmem:[%s1549_s26 + $0x20] sm:$0xff] %vm454_vm0, %v424_v37  ;;  %458 = vst.msk [vmem:[%s1549_s26 + $0x28] sm:$0xff] %vm454_vm0, %v425_v38  ;;  %v977_v45 = vunpack.c.h.bf16 %v1089_v28  ;;  %v980_v46 = vunpack.c.l.bf16 %v1090_v36  ;;  %v981_v47 = vunpack.c.h.bf16 %v1090_v36  ;;  %vm364_vm7 = vcmp.gt.f32.partialorder %v332_v41, 0.0  ;;  %v1096_v37 = vld [vmem:[%s1510_s6 + $0xb0] sm:$0xff]   ;;  %p1258_p9 = pnand %p1257_p12, %p1251_p4 }
  0x66   : > { %459 = vst.msk [vmem:[%s1549_s26 + $0x40] sm:$0xff] %vm454_vm0, %v426_v40  ;;  %v427_v44 = vsel %vm363_vm6, %v331_v27, %v395_v39  ;;  %v396_v49 = vmul.f32 0.2, %v332_v41  ;;  %vm365_vm8 = vcmp.gt.f32.partialorder %v333_v42, 0.0  ;;  %v397_v50 = vmul.f32 0.2, %v333_v42 }
  0x67   : > { %460 = vst.msk [vmem:[%s1549_s26 + $0x48] sm:$0xff] %vm454_vm0, %v427_v44  ;;  %v298_v51 = vsub.f32 %v976_v43, %v1522_v0  ;;  %v299_v52 = vsub.f32 %v977_v45, %v1522_v0  ;;  %v300_v53 = vsub.f32 %v980_v46, %v1522_v0  ;;  %v301_v54 = vsub.f32 %v981_v47, %v1522_v0 }
  0x68   : > { %v428_v56 = vsel %vm364_vm7, %v332_v41, %v396_v49  ;;  %v429_v57 = vsel %vm365_vm8, %v333_v42, %v397_v50  ;;  %v984_v58 = vunpack.c.l.bf16 %v1091_v48  ;;  %v985_v59 = vunpack.c.h.bf16 %v1091_v48 }
  0x69   : > { %461 = vst.msk [vmem:[%s1549_s26 + $0x60] sm:$0xff] %vm454_vm0, %v428_v56  ;;  %462 = vst.msk [vmem:[%s1549_s26 + $0x68] sm:$0xff] %vm454_vm0, %v429_v57  ;;  %v334_v60 = vmul.f32 %v1528_v7, %v298_v51  ;;  %v335_v61 = vmul.f32 %v1528_v7, %v299_v52  ;;  %v336_v62 = vmul.f32 %v1528_v7, %v300_v53  ;;  %v988_v3 = vunpack.c.l.bf16 %v1092_v55 }
  0x6a   : > { %v337_v63 = vmul.f32 %v1528_v7, %v301_v54  ;;  %v302_v1 = vsub.f32 %v984_v58, %v1522_v0  ;;  %v303_v2 = vsub.f32 %v985_v59, %v1522_v0  ;;  %v989_v4 = vunpack.c.h.bf16 %v1092_v55  ;;  %v1097_v58 = vld [vmem:[%s1510_s6 + $0xc0] sm:$0xff]  }
  0x6b   : > { %vm366_vm9 = vcmp.gt.f32.partialorder %v334_v60, 0.0  ;;  %v398_v5 = vmul.f32 0.2, %v334_v60  ;;  %vm367_vm10 = vcmp.gt.f32.partialorder %v335_v61, 0.0  ;;  %v399_v6 = vmul.f32 0.2, %v335_v61 }
  0x6c   : > { %vm368_vm11 = vcmp.gt.f32.partialorder %v336_v62, 0.0  ;;  %v400_v8 = vmul.f32 0.2, %v336_v62  ;;  %vm369_vm12 = vcmp.gt.f32.partialorder %v337_v63, 0.0  ;;  %v401_v9 = vmul.f32 0.2, %v337_v63 }
  0x6d   : > { %v430_v10 = vsel %vm366_vm9, %v334_v60, %v398_v5  ;;  %v431_v11 = vsel %vm367_vm10, %v335_v61, %v399_v6  ;;  %v338_v12 = vmul.f32 %v1528_v7, %v302_v1  ;;  %v339_v13 = vmul.f32 %v1528_v7, %v303_v2 }
  0x6e   : > { %463 = vst.msk [vmem:[%s1549_s26 + $0x80] sm:$0xff] %vm454_vm0, %v430_v10  ;;  %464 = vst.msk [vmem:[%s1549_s26 + $0x88] sm:$0xff] %vm454_vm0, %v431_v11  ;;  %v432_v15 = vsel %vm368_vm11, %v336_v62, %v400_v8  ;;  %v433_v16 = vsel %vm369_vm12, %v337_v63, %v401_v9  ;;  %v304_v17 = vsub.f32 %v988_v3, %v1522_v0  ;;  %v992_v24 = vunpack.c.l.bf16 %v1093_v14  ;;  %v1098_v63 = vld [vmem:[%s1510_s6 + $0xd0] sm:$0xff]  }
  0x6f   : > { %v305_v18 = vsub.f32 %v989_v4, %v1522_v0  ;;  %465 = vst.msk [vmem:[%s1549_s26 + $0xa0] sm:$0xff] %vm454_vm0, %v432_v15  ;;  %466 = vst.msk [vmem:[%s1549_s26 + $0xa8] sm:$0xff] %vm454_vm0, %v433_v16  ;;  %vm370_vm13 = vcmp.gt.f32.partialorder %v338_v12, 0.0  ;;  %v402_v20 = vmul.f32 0.2, %v338_v12  ;;  %vm371_vm14 = vcmp.gt.f32.partialorder %v339_v13, 0.0 }
  0x70   : > { %v403_v21 = vmul.f32 0.2, %v339_v13  ;;  %v340_v22 = vmul.f32 %v1528_v7, %v304_v17  ;;  %v993_v25 = vunpack.c.h.bf16 %v1093_v14  ;;  %v996_v28 = vunpack.c.l.bf16 %v1094_v19 }
  0x71   : > { %v341_v23 = vmul.f32 %v1528_v7, %v305_v18  ;;  %v434_v26 = vsel %vm370_vm13, %v338_v12, %v402_v20  ;;  %v997_v29 = vunpack.c.h.bf16 %v1094_v19  ;;  %v306_v33 = vsub.f32 %v992_v24, %v1522_v0  ;;  %v1099_v12 = vld [vmem:[%s1510_s6 + $0xe0] sm:$0xff]   ;;  %v1100_v19 = vld [vmem:[%s1510_s6 + $0xf0] sm:$0xff]  }
  0x72   : > { %v435_v27 = vsel %vm371_vm14, %v339_v13, %v403_v21  ;;  %467 = vst.msk [vmem:[%s1549_s26 + $0xc0] sm:$0xff] %vm454_vm0, %v434_v26  ;;  %vm372_vm15 = vcmp.gt.f32.partialorder %v340_v22, 0.0  ;;  %v404_v31 = vmul.f32 0.2, %v340_v22  ;;  %v307_v34 = vsub.f32 %v993_v25, %v1522_v0 }
  0x73   : > { %468 = vst.msk [vmem:[%s1549_s26 + $0xc8] sm:$0xff] %vm454_vm0, %v435_v27  ;;  %vm373_vm1 = vcmp.gt.f32.partialorder %v341_v23, 0.0  ;;  %v405_v32 = vmul.f32 0.2, %v341_v23  ;;  %v308_v35 = vsub.f32 %v996_v28, %v1522_v0  ;;  %v309_v36 = vsub.f32 %v997_v29, %v1522_v0 }
  0x74   : > { %v436_v38 = vsel %vm372_vm15, %v340_v22, %v404_v31  ;;  %v1000_v40 = vunpack.c.l.bf16 %v1095_v30  ;;  %v1001_v41 = vunpack.c.h.bf16 %v1095_v30  ;;  %v342_v42 = vmul.f32 %v1528_v7, %v306_v33 }
  0x75   : > { %v437_v39 = vsel %vm373_vm1, %v341_v23, %v405_v32  ;;  %469 = vst.msk [vmem:[%s1549_s26 + $0xe0] sm:$0xff] %vm454_vm0, %v436_v38  ;;  %v343_v43 = vmul.f32 %v1528_v7, %v307_v34  ;;  %v344_v44 = vmul.f32 %v1528_v7, %v308_v35  ;;  %v345_v45 = vmul.f32 %v1528_v7, %v309_v36 }
  0x76   : > { %470 = vst.msk [vmem:[%s1549_s26 + $0xe8] sm:$0xff] %vm454_vm0, %v437_v39  ;;  %v310_v46 = vsub.f32 %v1000_v40, %v1522_v0  ;;  %v311_v47 = vsub.f32 %v1001_v41, %v1522_v0  ;;  %v1004_v48 = vunpack.c.l.bf16 %v1096_v37  ;;  %v1005_v49 = vunpack.c.h.bf16 %v1096_v37  ;;  %v1101_v40 = vld [vmem:[%s1510_s6 + $0x8] sm:$0xff]  }
  0x77   : > { %vm374_vm2 = vcmp.gt.f32.partialorder %v342_v42, 0.0  ;;  %v406_v50 = vmul.f32 0.2, %v342_v42  ;;  %vm375_vm3 = vcmp.gt.f32.partialorder %v343_v43, 0.0  ;;  %v407_v51 = vmul.f32 0.2, %v343_v43 }
  0x78   : > { %vm376_vm4 = vcmp.gt.f32.partialorder %v344_v44, 0.0  ;;  %v408_v52 = vmul.f32 0.2, %v344_v44  ;;  %vm377_vm5 = vcmp.gt.f32.partialorder %v345_v45, 0.0  ;;  %v409_v53 = vmul.f32 0.2, %v345_v45 }
  0x79   : > { %v438_v54 = vsel %vm374_vm2, %v342_v42, %v406_v50  ;;  %v439_v55 = vsel %vm375_vm3, %v343_v43, %v407_v51  ;;  %v346_v56 = vmul.f32 %v1528_v7, %v310_v46  ;;  %v347_v57 = vmul.f32 %v1528_v7, %v311_v47 }
  0x7a   : > { %471 = vst.msk [vmem:[%s1549_s26 + $0x100] sm:$0xff] %vm454_vm0, %v438_v54  ;;  %472 = vst.msk [vmem:[%s1549_s26 + $0x108] sm:$0xff] %vm454_vm0, %v439_v55  ;;  %v440_v59 = vsel %vm376_vm4, %v344_v44, %v408_v52  ;;  %v441_v60 = vsel %vm377_vm5, %v345_v45, %v409_v53  ;;  %v312_v61 = vsub.f32 %v1004_v48, %v1522_v0  ;;  %v1008_v5 = vunpack.c.l.bf16 %v1097_v58  ;;  %v1102_v45 = vld [vmem:[%s1510_s6 + $0x18] sm:$0xff]  }
  0x7b   : > { %v313_v62 = vsub.f32 %v1005_v49, %v1522_v0  ;;  %473 = vst.msk [vmem:[%s1549_s26 + $0x120] sm:$0xff] %vm454_vm0, %v440_v59  ;;  %474 = vst.msk [vmem:[%s1549_s26 + $0x128] sm:$0xff] %vm454_vm0, %v441_v60  ;;  %vm378_vm6 = vcmp.gt.f32.partialorder %v346_v56, 0.0  ;;  %v410_v1 = vmul.f32 0.2, %v346_v56  ;;  %vm379_vm7 = vcmp.gt.f32.partialorder %v347_v57, 0.0 }
  0x7c   : > { %v411_v2 = vmul.f32 0.2, %v347_v57  ;;  %v348_v3 = vmul.f32 %v1528_v7, %v312_v61  ;;  %v1009_v6 = vunpack.c.h.bf16 %v1097_v58  ;;  %v1012_v10 = vunpack.c.l.bf16 %v1098_v63 }
  0x7d   : > { %v349_v4 = vmul.f32 %v1528_v7, %v313_v62  ;;  %v442_v8 = vsel %vm378_vm6, %v346_v56, %v410_v1  ;;  %v1013_v11 = vunpack.c.h.bf16 %v1098_v63  ;;  %v314_v15 = vsub.f32 %v1008_v5, %v1522_v0  ;;  %v1103_v56 = vld [vmem:[%s1510_s6 + $0x28] sm:$0xff]   ;;  %v1104_v63 = vld [vmem:[%s1510_s6 + $0x38] sm:$0xff]  }
  0x7e   : > { %v443_v9 = vsel %vm379_vm7, %v347_v57, %v411_v2  ;;  %475 = vst.msk [vmem:[%s1549_s26 + $0x140] sm:$0xff] %vm454_vm0, %v442_v8  ;;  %vm380_vm8 = vcmp.gt.f32.partialorder %v348_v3, 0.0  ;;  %v412_v13 = vmul.f32 0.2, %v348_v3  ;;  %v315_v16 = vsub.f32 %v1009_v6, %v1522_v0 }
  0x7f   : > { %476 = vst.msk [vmem:[%s1549_s26 + $0x148] sm:$0xff] %vm454_vm0, %v443_v9  ;;  %vm381_vm9 = vcmp.gt.f32.partialorder %v349_v4, 0.0  ;;  %v413_v14 = vmul.f32 0.2, %v349_v4  ;;  %v316_v17 = vsub.f32 %v1012_v10, %v1522_v0  ;;  %v317_v18 = vsub.f32 %v1013_v11, %v1522_v0 }
  0x80   : > { %v444_v20 = vsel %vm380_vm8, %v348_v3, %v412_v13  ;;  %v1016_v22 = vunpack.c.l.bf16 %v1099_v12  ;;  %v1017_v23 = vunpack.c.h.bf16 %v1099_v12  ;;  %v350_v24 = vmul.f32 %v1528_v7, %v314_v15 }
  0x81   : > { %v445_v21 = vsel %vm381_vm9, %v349_v4, %v413_v14  ;;  %477 = vst.msk [vmem:[%s1549_s26 + $0x160] sm:$0xff] %vm454_vm0, %v444_v20  ;;  %v351_v25 = vmul.f32 %v1528_v7, %v315_v16  ;;  %v352_v26 = vmul.f32 %v1528_v7, %v316_v17  ;;  %v353_v27 = vmul.f32 %v1528_v7, %v317_v18 }
  0x82   : > { %478 = vst.msk [vmem:[%s1549_s26 + $0x168] sm:$0xff] %vm454_vm0, %v445_v21  ;;  %v318_v28 = vsub.f32 %v1016_v22, %v1522_v0  ;;  %v319_v29 = vsub.f32 %v1017_v23, %v1522_v0  ;;  %v1020_v30 = vunpack.c.l.bf16 %v1100_v19  ;;  %v1021_v31 = vunpack.c.h.bf16 %v1100_v19  ;;  %v1105_v22 = vld [vmem:[%s1510_s6 + $0x48] sm:$0xff]  }
  0x83   : > { %vm382_vm10 = vcmp.gt.f32.partialorder %v350_v24, 0.0  ;;  %v414_v32 = vmul.f32 0.2, %v350_v24  ;;  %vm383_vm11 = vcmp.gt.f32.partialorder %v351_v25, 0.0  ;;  %v415_v33 = vmul.f32 0.2, %v351_v25 }
  0x84   : > { %vm384_vm12 = vcmp.gt.f32.partialorder %v352_v26, 0.0  ;;  %v416_v34 = vmul.f32 0.2, %v352_v26  ;;  %vm385_vm13 = vcmp.gt.f32.partialorder %v353_v27, 0.0  ;;  %v417_v35 = vmul.f32 0.2, %v353_v27 }
  0x85   : > { %v446_v36 = vsel %vm382_vm10, %v350_v24, %v414_v32  ;;  %v447_v37 = vsel %vm383_vm11, %v351_v25, %v415_v33  ;;  %v354_v38 = vmul.f32 %v1528_v7, %v318_v28  ;;  %v355_v39 = vmul.f32 %v1528_v7, %v319_v29 }
  0x86   : > { %479 = vst.msk [vmem:[%s1549_s26 + $0x180] sm:$0xff] %vm454_vm0, %v446_v36  ;;  %480 = vst.msk [vmem:[%s1549_s26 + $0x188] sm:$0xff] %vm454_vm0, %v447_v37  ;;  %v448_v41 = vsel %vm384_vm12, %v352_v26, %v416_v34  ;;  %v449_v42 = vsel %vm385_vm13, %v353_v27, %v417_v35  ;;  %v320_v43 = vsub.f32 %v1020_v30, %v1522_v0  ;;  %v1024_v50 = vunpack.c.l.bf16 %v1101_v40  ;;  %v1106_v27 = vld [vmem:[%s1510_s6 + $0x58] sm:$0xff]  }
  0x87   : > { %v321_v44 = vsub.f32 %v1021_v31, %v1522_v0  ;;  %481 = vst.msk [vmem:[%s1549_s26 + $0x1a0] sm:$0xff] %vm454_vm0, %v448_v41  ;;  %482 = vst.msk [vmem:[%s1549_s26 + $0x1a8] sm:$0xff] %vm454_vm0, %v449_v42  ;;  %vm386_vm14 = vcmp.gt.f32.partialorder %v354_v38, 0.0  ;;  %v418_v46 = vmul.f32 0.2, %v354_v38  ;;  %vm387_vm15 = vcmp.gt.f32.partialorder %v355_v39, 0.0 }
  0x88   : > { %v419_v47 = vmul.f32 0.2, %v355_v39  ;;  %v356_v48 = vmul.f32 %v1528_v7, %v320_v43  ;;  %v1025_v51 = vunpack.c.h.bf16 %v1101_v40  ;;  %v1028_v54 = vunpack.c.l.bf16 %v1102_v45 }
  0x89   : > { %v357_v49 = vmul.f32 %v1528_v7, %v321_v44  ;;  %v450_v52 = vsel %vm386_vm14, %v354_v38, %v418_v46  ;;  %v1029_v55 = vunpack.c.h.bf16 %v1102_v45  ;;  %v552_v59 = vsub.f32 %v1024_v50, %v1522_v0  ;;  %v1107_v38 = vld [vmem:[%s1510_s6 + $0x68] sm:$0xff]   ;;  %v1108_v45 = vld [vmem:[%s1510_s6 + $0x78] sm:$0xff]  }
  0x8a   : > { %v451_v53 = vsel %vm387_vm15, %v355_v39, %v419_v47  ;;  %483 = vst.msk [vmem:[%s1549_s26 + $0x1c0] sm:$0xff] %vm454_vm0, %v450_v52  ;;  %vm388_vm1 = vcmp.gt.f32.partialorder %v356_v48, 0.0  ;;  %v420_v57 = vmul.f32 0.2, %v356_v48  ;;  %v553_v60 = vsub.f32 %v1025_v51, %v1522_v0 }
  0x8b   : > { %484 = vst.msk [vmem:[%s1549_s26 + $0x1c8] sm:$0xff] %vm454_vm0, %v451_v53  ;;  %vm389_vm2 = vcmp.gt.f32.partialorder %v357_v49, 0.0  ;;  %v421_v58 = vmul.f32 0.2, %v357_v49  ;;  %v554_v61 = vsub.f32 %v1028_v54, %v1522_v0  ;;  %v555_v62 = vsub.f32 %v1029_v55, %v1522_v0 }
  0x8c   : > { %v452_v1 = vsel %vm388_vm1, %v356_v48, %v420_v57  ;;  %v1032_v3 = vunpack.c.l.bf16 %v1103_v56  ;;  %v1033_v4 = vunpack.c.h.bf16 %v1103_v56  ;;  %v584_v5 = vmul.f32 %v1528_v7, %v552_v59 }
  0x8d   : > { %v453_v2 = vsel %vm389_vm2, %v357_v49, %v421_v58  ;;  %485 = vst.msk [vmem:[%s1549_s26 + $0x1e0] sm:$0xff] %vm454_vm0, %v452_v1  ;;  %v585_v6 = vmul.f32 %v1528_v7, %v553_v60  ;;  %v586_v8 = vmul.f32 %v1528_v7, %v554_v61  ;;  %v587_v9 = vmul.f32 %v1528_v7, %v555_v62 }
  0x8e   : > { %486 = vst.msk [vmem:[%s1549_s26 + $0x1e8] sm:$0xff] %vm454_vm0, %v453_v2  ;;  %v556_v10 = vsub.f32 %v1032_v3, %v1522_v0  ;;  %v557_v11 = vsub.f32 %v1033_v4, %v1522_v0  ;;  %v1036_v12 = vunpack.c.l.bf16 %v1104_v63  ;;  %v1037_v13 = vunpack.c.h.bf16 %v1104_v63  ;;  %v1109_v3 = vld [vmem:[%s1510_s6 + $0x88] sm:$0xff]  }
  0x8f   : > { %vm616_vm3 = vcmp.gt.f32.partialorder %v584_v5, 0.0  ;;  %v648_v14 = vmul.f32 0.2, %v584_v5  ;;  %vm617_vm4 = vcmp.gt.f32.partialorder %v585_v6, 0.0  ;;  %v649_v15 = vmul.f32 0.2, %v585_v6 }
  0x90   : > { %vm618_vm5 = vcmp.gt.f32.partialorder %v586_v8, 0.0  ;;  %v650_v16 = vmul.f32 0.2, %v586_v8  ;;  %vm619_vm6 = vcmp.gt.f32.partialorder %v587_v9, 0.0  ;;  %v651_v17 = vmul.f32 0.2, %v587_v9 }
  0x91   : > { %v680_v18 = vsel %vm616_vm3, %v584_v5, %v648_v14  ;;  %v681_v19 = vsel %vm617_vm4, %v585_v6, %v649_v15  ;;  %v588_v20 = vmul.f32 %v1528_v7, %v556_v10  ;;  %v589_v21 = vmul.f32 %v1528_v7, %v557_v11 }
  0x92   : > { %919 = vst.msk [vmem:[%s1549_s26 + $0x10] sm:$0xff] %vm454_vm0, %v680_v18  ;;  %920 = vst.msk [vmem:[%s1549_s26 + $0x18] sm:$0xff] %vm454_vm0, %v681_v19  ;;  %v682_v23 = vsel %vm618_vm5, %v586_v8, %v650_v16  ;;  %v683_v24 = vsel %vm619_vm6, %v587_v9, %v651_v17  ;;  %v558_v25 = vsub.f32 %v1036_v12, %v1522_v0  ;;  %v1040_v32 = vunpack.c.l.bf16 %v1105_v22  ;;  %v1110_v9 = vld [vmem:[%s1510_s6 + $0x98] sm:$0xff]  }
  0x93   : > { %v559_v26 = vsub.f32 %v1037_v13, %v1522_v0  ;;  %921 = vst.msk [vmem:[%s1549_s26 + $0x30] sm:$0xff] %vm454_vm0, %v682_v23  ;;  %922 = vst.msk [vmem:[%s1549_s26 + $0x38] sm:$0xff] %vm454_vm0, %v683_v24  ;;  %vm620_vm7 = vcmp.gt.f32.partialorder %v588_v20, 0.0  ;;  %v652_v28 = vmul.f32 0.2, %v588_v20  ;;  %vm621_vm8 = vcmp.gt.f32.partialorder %v589_v21, 0.0 }
  0x94   : > { %v653_v29 = vmul.f32 0.2, %v589_v21  ;;  %v590_v30 = vmul.f32 %v1528_v7, %v558_v25  ;;  %v1041_v33 = vunpack.c.h.bf16 %v1105_v22  ;;  %v1044_v36 = vunpack.c.l.bf16 %v1106_v27 }
  0x95   : > { %v591_v31 = vmul.f32 %v1528_v7, %v559_v26  ;;  %v684_v34 = vsel %vm620_vm7, %v588_v20, %v652_v28  ;;  %v1045_v37 = vunpack.c.h.bf16 %v1106_v27  ;;  %v560_v41 = vsub.f32 %v1040_v32, %v1522_v0  ;;  %v1111_v20 = vld [vmem:[%s1510_s6 + $0xa8] sm:$0xff]   ;;  %v1112_v27 = vld [vmem:[%s1510_s6 + $0xb8] sm:$0xff]  }
  0x96   : > { %v685_v35 = vsel %vm621_vm8, %v589_v21, %v653_v29  ;;  %923 = vst.msk [vmem:[%s1549_s26 + $0x50] sm:$0xff] %vm454_vm0, %v684_v34  ;;  %vm622_vm9 = vcmp.gt.f32.partialorder %v590_v30, 0.0  ;;  %v654_v39 = vmul.f32 0.2, %v590_v30  ;;  %v561_v42 = vsub.f32 %v1041_v33, %v1522_v0 }
  0x97   : > { %924 = vst.msk [vmem:[%s1549_s26 + $0x58] sm:$0xff] %vm454_vm0, %v685_v35  ;;  %vm623_vm10 = vcmp.gt.f32.partialorder %v591_v31, 0.0  ;;  %v655_v40 = vmul.f32 0.2, %v591_v31  ;;  %v562_v43 = vsub.f32 %v1044_v36, %v1522_v0  ;;  %v563_v44 = vsub.f32 %v1045_v37, %v1522_v0 }
  0x98   : > { %v686_v46 = vsel %vm622_vm9, %v590_v30, %v654_v39  ;;  %v1048_v48 = vunpack.c.l.bf16 %v1107_v38  ;;  %v1049_v49 = vunpack.c.h.bf16 %v1107_v38  ;;  %v592_v50 = vmul.f32 %v1528_v7, %v560_v41 }
  0x99   : > { %v687_v47 = vsel %vm623_vm10, %v591_v31, %v655_v40  ;;  %925 = vst.msk [vmem:[%s1549_s26 + $0x70] sm:$0xff] %vm454_vm0, %v686_v46  ;;  %v593_v51 = vmul.f32 %v1528_v7, %v561_v42  ;;  %v594_v52 = vmul.f32 %v1528_v7, %v562_v43  ;;  %v595_v53 = vmul.f32 %v1528_v7, %v563_v44 }
  0x9a   : > { %926 = vst.msk [vmem:[%s1549_s26 + $0x78] sm:$0xff] %vm454_vm0, %v687_v47  ;;  %v564_v54 = vsub.f32 %v1048_v48, %v1522_v0  ;;  %v565_v55 = vsub.f32 %v1049_v49, %v1522_v0  ;;  %v1052_v56 = vunpack.c.l.bf16 %v1108_v45  ;;  %v1053_v57 = vunpack.c.h.bf16 %v1108_v45  ;;  %v1113_v48 = vld [vmem:[%s1510_s6 + $0xc8] sm:$0xff]  }
  0x9b   : > { %vm624_vm11 = vcmp.gt.f32.partialorder %v592_v50, 0.0  ;;  %v656_v58 = vmul.f32 0.2, %v592_v50  ;;  %vm625_vm12 = vcmp.gt.f32.partialorder %v593_v51, 0.0  ;;  %v657_v59 = vmul.f32 0.2, %v593_v51 }
  0x9c   : > { %vm626_vm13 = vcmp.gt.f32.partialorder %v594_v52, 0.0  ;;  %v658_v60 = vmul.f32 0.2, %v594_v52  ;;  %vm627_vm14 = vcmp.gt.f32.partialorder %v595_v53, 0.0  ;;  %v659_v61 = vmul.f32 0.2, %v595_v53 }
  0x9d   : > { %v688_v62 = vsel %vm624_vm11, %v592_v50, %v656_v58  ;;  %v689_v63 = vsel %vm625_vm12, %v593_v51, %v657_v59  ;;  %v596_v1 = vmul.f32 %v1528_v7, %v564_v54  ;;  %v597_v2 = vmul.f32 %v1528_v7, %v565_v55 }
  0x9e   : > { %927 = vst.msk [vmem:[%s1549_s26 + $0x90] sm:$0xff] %vm454_vm0, %v688_v62  ;;  %928 = vst.msk [vmem:[%s1549_s26 + $0x98] sm:$0xff] %vm454_vm0, %v689_v63  ;;  %v690_v4 = vsel %vm626_vm13, %v594_v52, %v658_v60  ;;  %v691_v5 = vsel %vm627_vm14, %v595_v53, %v659_v61  ;;  %v566_v6 = vsub.f32 %v1052_v56, %v1522_v0  ;;  %v1056_v14 = vunpack.c.l.bf16 %v1109_v3  ;;  %v1114_v53 = vld [vmem:[%s1510_s6 + $0xd8] sm:$0xff]  }
  0x9f   : > { %v567_v8 = vsub.f32 %v1053_v57, %v1522_v0  ;;  %929 = vst.msk [vmem:[%s1549_s26 + $0xb0] sm:$0xff] %vm454_vm0, %v690_v4  ;;  %930 = vst.msk [vmem:[%s1549_s26 + $0xb8] sm:$0xff] %vm454_vm0, %v691_v5  ;;  %vm628_vm15 = vcmp.gt.f32.partialorder %v596_v1, 0.0  ;;  %v660_v10 = vmul.f32 0.2, %v596_v1  ;;  %vm629_vm1 = vcmp.gt.f32.partialorder %v597_v2, 0.0 }
  0xa0   : > { %v661_v11 = vmul.f32 0.2, %v597_v2  ;;  %v598_v12 = vmul.f32 %v1528_v7, %v566_v6  ;;  %v1057_v15 = vunpack.c.h.bf16 %v1109_v3  ;;  %v1060_v18 = vunpack.c.l.bf16 %v1110_v9 }
  0xa1   : > { %v599_v13 = vmul.f32 %v1528_v7, %v567_v8  ;;  %v692_v16 = vsel %vm628_vm15, %v596_v1, %v660_v10  ;;  %v1061_v19 = vunpack.c.h.bf16 %v1110_v9  ;;  %v568_v23 = vsub.f32 %v1056_v14, %v1522_v0  ;;  %v1115_v1 = vld [vmem:[%s1510_s6 + $0xe8] sm:$0xff]   ;;  %v1116_v9 = vld [vmem:[%s1510_s6 + $0xf8] sm:$0xff]  }
  0xa2   : > { %v693_v17 = vsel %vm629_vm1, %v597_v2, %v661_v11  ;;  %931 = vst.msk [vmem:[%s1549_s26 + $0xd0] sm:$0xff] %vm454_vm0, %v692_v16  ;;  %vm630_vm2 = vcmp.gt.f32.partialorder %v598_v12, 0.0  ;;  %v662_v21 = vmul.f32 0.2, %v598_v12  ;;  %v569_v24 = vsub.f32 %v1057_v15, %v1522_v0 }
  0xa3   : > { %932 = vst.msk [vmem:[%s1549_s26 + $0xd8] sm:$0xff] %vm454_vm0, %v693_v17  ;;  %vm631_vm3 = vcmp.gt.f32.partialorder %v599_v13, 0.0  ;;  %v663_v22 = vmul.f32 0.2, %v599_v13  ;;  %v570_v25 = vsub.f32 %v1060_v18, %v1522_v0  ;;  %v571_v26 = vsub.f32 %v1061_v19, %v1522_v0 }
  0xa4   : > { %v694_v28 = vsel %vm630_vm2, %v598_v12, %v662_v21  ;;  %v1064_v30 = vunpack.c.l.bf16 %v1111_v20  ;;  %v1065_v31 = vunpack.c.h.bf16 %v1111_v20  ;;  %v600_v32 = vmul.f32 %v1528_v7, %v568_v23 }
  0xa5   : > { %v695_v29 = vsel %vm631_vm3, %v599_v13, %v663_v22  ;;  %933 = vst.msk [vmem:[%s1549_s26 + $0xf0] sm:$0xff] %vm454_vm0, %v694_v28  ;;  %v601_v33 = vmul.f32 %v1528_v7, %v569_v24  ;;  %v602_v34 = vmul.f32 %v1528_v7, %v570_v25  ;;  %v603_v35 = vmul.f32 %v1528_v7, %v571_v26 }
  0xa6   : > { %934 = vst.msk [vmem:[%s1549_s26 + $0xf8] sm:$0xff] %vm454_vm0, %v695_v29  ;;  %v572_v36 = vsub.f32 %v1064_v30, %v1522_v0  ;;  %v573_v37 = vsub.f32 %v1065_v31, %v1522_v0  ;;  %v1068_v38 = vunpack.c.l.bf16 %v1112_v27  ;;  %v1069_v39 = vunpack.c.h.bf16 %v1112_v27 }
  0xa7   : > { %vm632_vm4 = vcmp.gt.f32.partialorder %v600_v32, 0.0  ;;  %v664_v40 = vmul.f32 0.2, %v600_v32  ;;  %vm633_vm5 = vcmp.gt.f32.partialorder %v601_v33, 0.0  ;;  %v665_v41 = vmul.f32 0.2, %v601_v33 }
  0xa8   : > { %vm634_vm6 = vcmp.gt.f32.partialorder %v602_v34, 0.0  ;;  %v666_v42 = vmul.f32 0.2, %v602_v34  ;;  %vm635_vm7 = vcmp.gt.f32.partialorder %v603_v35, 0.0  ;;  %v667_v43 = vmul.f32 0.2, %v603_v35 }
  0xa9   : > { %v696_v44 = vsel %vm632_vm4, %v600_v32, %v664_v40  ;;  %v697_v45 = vsel %vm633_vm5, %v601_v33, %v665_v41  ;;  %v604_v46 = vmul.f32 %v1528_v7, %v572_v36  ;;  %v605_v47 = vmul.f32 %v1528_v7, %v573_v37 }
  0xaa   : > { %935 = vst.msk [vmem:[%s1549_s26 + $0x110] sm:$0xff] %vm454_vm0, %v696_v44  ;;  %936 = vst.msk [vmem:[%s1549_s26 + $0x118] sm:$0xff] %vm454_vm0, %v697_v45  ;;  %v698_v49 = vsel %vm634_vm6, %v602_v34, %v666_v42  ;;  %v699_v50 = vsel %vm635_vm7, %v603_v35, %v667_v43  ;;  %v574_v51 = vsub.f32 %v1068_v38, %v1522_v0  ;;  %v1072_v58 = vunpack.c.l.bf16 %v1113_v48 }
  0xab   : > { %v575_v52 = vsub.f32 %v1069_v39, %v1522_v0  ;;  %937 = vst.msk [vmem:[%s1549_s26 + $0x130] sm:$0xff] %vm454_vm0, %v698_v49  ;;  %938 = vst.msk [vmem:[%s1549_s26 + $0x138] sm:$0xff] %vm454_vm0, %v699_v50  ;;  %vm636_vm8 = vcmp.gt.f32.partialorder %v604_v46, 0.0  ;;  %v668_v54 = vmul.f32 0.2, %v604_v46  ;;  %vm637_vm9 = vcmp.gt.f32.partialorder %v605_v47, 0.0 }
  0xac   : > { %v669_v55 = vmul.f32 0.2, %v605_v47  ;;  %v606_v56 = vmul.f32 %v1528_v7, %v574_v51  ;;  %v1073_v59 = vunpack.c.h.bf16 %v1113_v48  ;;  %v1076_v62 = vunpack.c.l.bf16 %v1114_v53 }
  0xad   : > { %v607_v57 = vmul.f32 %v1528_v7, %v575_v52  ;;  %v700_v60 = vsel %vm636_vm8, %v604_v46, %v668_v54  ;;  %v1077_v63 = vunpack.c.h.bf16 %v1114_v53  ;;  %v576_v4 = vsub.f32 %v1072_v58, %v1522_v0 }
  0xae   : > { %v701_v61 = vsel %vm637_vm9, %v605_v47, %v669_v55  ;;  %939 = vst.msk [vmem:[%s1549_s26 + $0x150] sm:$0xff] %vm454_vm0, %v700_v60  ;;  %vm638_vm10 = vcmp.gt.f32.partialorder %v606_v56, 0.0  ;;  %v670_v2 = vmul.f32 0.2, %v606_v56  ;;  %v577_v5 = vsub.f32 %v1073_v59, %v1522_v0 }
  0xaf   : > { %940 = vst.msk [vmem:[%s1549_s26 + $0x158] sm:$0xff] %vm454_vm0, %v701_v61  ;;  %vm639_vm11 = vcmp.gt.f32.partialorder %v607_v57, 0.0  ;;  %v671_v3 = vmul.f32 0.2, %v607_v57  ;;  %v578_v6 = vsub.f32 %v1076_v62, %v1522_v0  ;;  %v579_v8 = vsub.f32 %v1077_v63, %v1522_v0 }
  0xb0   : > { %v702_v10 = vsel %vm638_vm10, %v606_v56, %v670_v2  ;;  %v1080_v12 = vunpack.c.l.bf16 %v1115_v1  ;;  %v1081_v13 = vunpack.c.h.bf16 %v1115_v1  ;;  %v608_v14 = vmul.f32 %v1528_v7, %v576_v4 }
  0xb1   : > { %v703_v11 = vsel %vm639_vm11, %v607_v57, %v671_v3  ;;  %941 = vst.msk [vmem:[%s1549_s26 + $0x170] sm:$0xff] %vm454_vm0, %v702_v10  ;;  %v609_v15 = vmul.f32 %v1528_v7, %v577_v5  ;;  %v610_v16 = vmul.f32 %v1528_v7, %v578_v6  ;;  %v611_v17 = vmul.f32 %v1528_v7, %v579_v8 }
  0xb2   : > { %942 = vst.msk [vmem:[%s1549_s26 + $0x178] sm:$0xff] %vm454_vm0, %v703_v11  ;;  %v580_v18 = vsub.f32 %v1080_v12, %v1522_v0  ;;  %v581_v19 = vsub.f32 %v1081_v13, %v1522_v0  ;;  %v1084_v20 = vunpack.c.l.bf16 %v1116_v9  ;;  %v1085_v21 = vunpack.c.h.bf16 %v1116_v9 }
  0xb3   : > { %vm640_vm12 = vcmp.gt.f32.partialorder %v608_v14, 0.0  ;;  %v672_v22 = vmul.f32 0.2, %v608_v14  ;;  %vm641_vm13 = vcmp.gt.f32.partialorder %v609_v15, 0.0  ;;  %v673_v23 = vmul.f32 0.2, %v609_v15 }
  0xb4   : > { %vm642_vm14 = vcmp.gt.f32.partialorder %v610_v16, 0.0  ;;  %v674_v24 = vmul.f32 0.2, %v610_v16  ;;  %vm643_vm15 = vcmp.gt.f32.partialorder %v611_v17, 0.0  ;;  %v675_v25 = vmul.f32 0.2, %v611_v17 }
  0xb5   : > { %v704_v26 = vsel %vm640_vm12, %v608_v14, %v672_v22  ;;  %v705_v27 = vsel %vm641_vm13, %v609_v15, %v673_v23  ;;  %v612_v28 = vmul.f32 %v1528_v7, %v580_v18  ;;  %v613_v29 = vmul.f32 %v1528_v7, %v581_v19 }
  0xb6   : > { %943 = vst.msk [vmem:[%s1549_s26 + $0x190] sm:$0xff] %vm454_vm0, %v704_v26  ;;  %944 = vst.msk [vmem:[%s1549_s26 + $0x198] sm:$0xff] %vm454_vm0, %v705_v27  ;;  %v706_v30 = vsel %vm642_vm14, %v610_v16, %v674_v24  ;;  %v707_v31 = vsel %vm643_vm15, %v611_v17, %v675_v25  ;;  %v582_v32 = vsub.f32 %v1084_v20, %v1522_v0 }
  0xb7   : > { %v583_v33 = vsub.f32 %v1085_v21, %v1522_v0  ;;  %945 = vst.msk [vmem:[%s1549_s26 + $0x1b0] sm:$0xff] %vm454_vm0, %v706_v30  ;;  %946 = vst.msk [vmem:[%s1549_s26 + $0x1b8] sm:$0xff] %vm454_vm0, %v707_v31  ;;  %vm644_vm1 = vcmp.gt.f32.partialorder %v612_v28, 0.0  ;;  %v676_v34 = vmul.f32 0.2, %v612_v28  ;;  %vm645_vm2 = vcmp.gt.f32.partialorder %v613_v29, 0.0 }
  0xb8   : > { %v677_v35 = vmul.f32 0.2, %v613_v29  ;;  %v614_v36 = vmul.f32 %v1528_v7, %v582_v32 }
  0xb9   : > { %v615_v37 = vmul.f32 %v1528_v7, %v583_v33  ;;  %v708_v38 = vsel %vm644_vm1, %v612_v28, %v676_v34 }
  0xba   : > { %v709_v39 = vsel %vm645_vm2, %v613_v29, %v677_v35  ;;  %947 = vst.msk [vmem:[%s1549_s26 + $0x1d0] sm:$0xff] %vm454_vm0, %v708_v38  ;;  %vm646_vm3 = vcmp.gt.f32.partialorder %v614_v36, 0.0  ;;  %v678_v0 = vmul.f32 0.2, %v614_v36 }
  0xbb   : > { %948 = vst.msk [vmem:[%s1549_s26 + $0x1d8] sm:$0xff] %vm454_vm0, %v709_v39  ;;  %vm647_vm4 = vcmp.gt.f32.partialorder %v615_v37, 0.0  ;;  %v679_v40 = vmul.f32 0.2, %v615_v37 }
  0xbc   : > { %v710_v7 = vsel %vm646_vm3, %v614_v36, %v678_v0 }
  0xbd   : > { %v711_v41 = vsel %vm647_vm4, %v615_v37, %v679_v40  ;;  %949 = vst.msk [vmem:[%s1549_s26 + $0x1f0] sm:$0xff] %vm454_vm0, %v710_v7 }
  0xbe   : > { %950 = vst.msk [vmem:[%s1549_s26 + $0x1f8] sm:$0xff] %vm454_vm0, %v711_v41 }
  0xbf   : > { %1261 = shalt.err (!%p1258_p9)
}
  0xc0   : > { %s1262_s20 = scalar_lea.hbm %s1820_s29, 8192  ;;  %s1266_s5 = scalar_lea.hbm %s1877_s2, 16384 }
  0xc1   : > { %p1263_p1 = scmp.ne.s32.totalorder %s1820_s29, %s1262_s20  ;;  %p1267_p5 = scmp.lt.u32.totalorder %s1820_s29, %s1877_s2 }
  0xc2   : > { %p1268_p13 = scmp.lt.u32.totalorder %s1266_s5, %s1262_s20  ;;  %p1270_p0 = scmp.lt.u32.totalorder %s1262_s20, %s1820_s29 }
  0xc3   : > { %p1264_p6 = pnand %p1263_p1, %p1889_p3 }
  0xc4   : > { %p1269_p8 = por %p1268_p13, %p1267_p5 }
  0xc5   : > { %p1265_p2 = pneg %p1264_p6 }
  0xc6   : > { %p1271_p11 = por %p1270_p0, %p1269_p8 }
  0xc8   : > { %p1272_p4 = pnand %p1271_p11, %p1265_p2 }
  0xca   : > { %1275 = shalt.err (!%p1272_p4)
}
  0xcb   : > { %s1341_s21 = smov 128   ;;  %s1342_s26 = smov 8  }
  0xcc   : > { %1121 = dma.vmem_to_hbm [thread:$0]  (%p1889_p3), %s1822_s27, 8192, %s1820_s29, %s746_s3, %s1341_s21, %s1341_s21, %s1342_s26  }
  0xcd PF: > { %s777_s30 = sand.u32 1, %s1314_s9   ;;  %p1890_p7 = scmp.ne.s32.totalorder %s1883_s24, 0 }
  0xce   : > { %p1891_p10 = scmp.ge.s32.totalorder %s1334_s14, 2  ;;  %s778_s12 = scalar_lea.sflag [#allocation4], %s777_s30 }
  0xd0   : > { %p1131_p12 = pnand %p1891_p10, %p1890_p7 }
  0xd2   : > { %1309 = dma.done.wait (!%p1131_p12), %s778_s12, 8192  }
  0xd3   : > { %1311 = vsyncadd (!%p1131_p12), %s778_s12, 4294959104  ;;  %s21_s14 = sadd.s32 1, %s1334_s14   ;;  %s1892_s9 = smov %s1318_s10 }
  0xd4   : > { %p18_p9 = scmp.ge.s32.totalorder %s21_s14, 4   ;;  %s1893_s10 = smov %s1322_s11 }
  0xd5   : > { %s1894_s11 = smov %s1414_s23  ;;  %s1895_s12 = smov %s1330_s13 }
  0xd6   : > { %s1896_s13 = smov %s1898_s17  ;;  %20 = sbr.rel (!%p18_p9) target bundleno = 8 (0x8), region = 88 }
  0xdd   :  { %783 = vsyncpa [#allocation3], 1 }
  0xde   :  { %785 = vsyncpa [#allocation3 + $0x1], 1 }
  0xdf   :  { %786 = vsyncpa [#allocation6], 1 }
  0xe0   :  { %788 = vsyncpa [#allocation6 + $0x1], 1 }
  0xe1   :  { %789 = vsyncpa [#allocation4], 1 }
  0xe2   :  { %791 = vsyncpa [#allocation4 + $0x1], 1 }

// kernel: unet_up_1x2.2
= control target key start
LH: loop header
LB: loop body
LE: loop exit
PB: predicated region body
PF: predicated region fallthrough
CT: control target
= control target key end

     0   :  { %9 = vsyncpa [#allocation3], 0  ;;  %s10356_s0 = inlined_call_operand.hbm [shape: bf16[2,18,18,4], index: 0, kind: input, shape index: {}]   ;;  %s10357_s1 = inlined_call_operand.hbm [shape: bf16[2,2,16,4], index: 1, kind: input, shape index: {}]   ;;  %s10358_s2 = inlined_call_operand.hbm [shape: bf16[2,16,2,16,8], index: 2, kind: output, shape index: {0}]   ;;  %s10359_s3 = inlined_call_operand.hbm [shape: f32[2,1,2,4], index: 3, kind: output, shape index: {1}]  }
   0x1   :  { %11 = vsyncpa [#allocation3 + $0x1], 0 }
   0x2   :  { %12 = vsyncpa [#allocation6], 0 }
   0x3   :  { %13 = vsyncpa [#allocation4], 0 }
   0x4   :  { %15 = vsyncpa [#allocation4 + $0x1], 0 }
   0x5   :  { %16 = vsyncpa [#allocation9], 0 }
   0x6   :  { %18 = vsyncpa [#allocation9 + $0x1], 0  ;;  %s7899_s12 = smov 0   ;;  %s7901_s13 = smov 0  }
   0x7   :  { %s7903_s14 = smov 0   ;;  %s7905_s15 = smov 0  }
   0x8   :  { %s7907_s16 = smov 0   ;;  %s7909_s17 = smov 0  }
   0x9 LB: > { %s5692_s18 = sadd.s32 4294967295, %s7869_s17   ;;  %s5693_s19 = sadd.s32 4294967294, %s7869_s17   ;;  %s7869_s17 = sphi %s7909_s17, %s24_s17   ;;  %s7865_s16 = sphi %s7907_s16, %s10542_s16   ;;  %s7861_s15 = sphi %s7905_s15, %s10541_s15   ;;  %s7857_s14 = sphi %s7903_s14, %s10540_s14   ;;  %s7853_s13 = sphi %s7901_s13, %s10539_s13   ;;  %s7849_s12 = sphi %s7899_s12, %s10538_s12  }
   0xa   : > { %p56_p0 = scmp.ne.s32.totalorder %s7853_s13, %s7849_s12  ;;  %p7933_p1 = scmp.eq.s32.totalorder %s5692_s18, 0 }
   0xb   : > { %p7937_p2 = scmp.eq.s32.totalorder %s5692_s18, 1  ;;  %p109_p3 = scmp.eq.s32.totalorder %s5693_s19, 1 }
   0xc   : > { %s10431_s20 = scalar_select %p7933_p1, 1, 0 }
   0xd   : > { %s10432_s21 = scalar_select %p7937_p2, 1, 0 }
   0xe   : > { %p7943_p4 = por %p7933_p1, %p56_p0  ;;  %p5694_p5 = scmp.ge.s32.totalorder %s7869_s17, 1 }
   0xf   : > { %p7948_p6 = por %p109_p3, %p56_p0  ;;  %p144_p7 = scmp.lt.s32.totalorder %s7869_s17, 3 }
  0x10   : > { %s10433_s22 = scalar_select %p7943_p4, 1, 0 }
  0x11   : > { %s10434_s23 = scalar_select %p7948_p6, 1, 0 }
  0x12   : > { %p7953_p8 = pnand %p5694_p5, %p144_p7  ;;  %s7871_s25 = smov [#allocation5]  }
  0x13   : > { %s156_s26 = sshll.u32 %s7871_s25, 4  ;;  %s36_s28 = sadd.s32 1, %s7865_s16  ;;  %s157_s26 = int_to_ptr.vmem [resolvable:$true] %s156_s26 }
  0x14   : > { %s10435_s24 = scalar_select %p7953_p8, 1, 0 }
  0x15   : > { %p7435_p9 = pneg %p7953_p8  ;;  %s7693_s4 = scalar_lea.hbm %s10357_s1, 512 }
  0x16   : > { %p7694_p12 = scmp.ne.s32.totalorder %s10357_s1, %s7693_s4  ;;  %p7700_p5 = scmp.lt.u32.totalorder %s7693_s4, %s10357_s1 }
  0x17   : > { %p7962_p11 = pnand %p7435_p9, %p7933_p1 }
  0x19   : > { %p7695_p13 = pneg %p7962_p11 }
  0x1b   : > { %p7696_p0 = pnand %p7695_p13, %p7694_p12 }
  0x1d   : > { %p7697_p3 = pneg %p7696_p0 }
  0x1f   : > { %p7702_p7 = pnand %p7700_p5, %p7697_p3 }
  0x21   : > { %7705 = shalt.err (!%p7702_p7)
}
  0x22   : > { %s7706_s9 = scalar_lea.vmem %s157_s26, 512  ;;  %p7714_p1 = scmp.lt.s32.totalorder %s157_s26, %s157_s26 }
  0x23   : > { %p7707_p9 = scmp.ne.s32.totalorder %s157_s26, %s7706_s9  ;;  %p7715_p4 = scmp.lt.s32.totalorder %s7706_s9, %s7706_s9 }
  0x25   : > { %p7709_p10 = pnand %p7707_p9, %p7695_p13  ;;  %p7716_p8 = por %p7715_p4, %p7714_p1 }
  0x27   : > { %p7710_p6 = pneg %p7709_p10 }
  0x29   : > { %p7717_p2 = pnand %p7716_p8, %p7710_p6 }
  0x2b   : > { %7720 = shalt.err (!%p7717_p2)
}
  0x2c   : > { %s7872_s10 = smov 64   ;;  %s7873_s11 = smov 4  }
  0x2d   : > { %7438 = dma.hbm_to_vmem [thread:$0]  (!%p7962_p11), %s10357_s1, 512, %s157_s26, [#allocation6], %s7872_s10, %s7872_s10, %s7873_s11  }
  0x2e   : > { %p38_p1 = scmp.ge.s32.totalorder %s36_s28, 2  ;;  %s43_s25 = sadd.s32 1, %s7857_s14 }
  0x2f   : > { %p50_p2 = scmp.ne.s32.totalorder %s7857_s14, %s7853_s13  ;;  %p51_p4 = scmp.eq.s32.totalorder %s7869_s17, 0 }
  0x30   : > { %s10544_s28 = smov (%p38_p1, %s36_s28), 0  ;;  %p10437_p8 = scmp.ne.s32.totalorder %s10432_s21, 0 }
  0x31   : > { %p52_p6 = por %p51_p4, %p50_p2  ;;  %s40_s27 = ssub.s32 %s7865_s16, %s10544_s28 }
  0x32   : > { %p7994_p10 = por %p10437_p8, %p50_p2  ;;  %p7451_p12 = scmp.lt.s32.totalorder %s7869_s17, 2 }
  0x33   : > { %p41_p13 = scmp.eq.s32.totalorder %s40_s27, 0  ;;  %s170_s30 = sand.u32 1, %s7857_s14  }
  0x34   : > { %s7422_s4 = smul.u32 216, %s170_s30  ;;  %p8006_p11 = pnand %p7451_p12, %p52_p6 }
  0x35   : > { %s8003_s5 = scalar_select %p41_p13, %s7857_s14, %s43_s25  }
  0x36   : > { %s7423_s26 = smul.u32 3456, %s7865_s16  ;;  %s174_s6 = scalar_lea.vmem [#allocation2], %s7422_s4 }
  0x37   : > { %s181_s7 = sshll.u32 %s174_s6, 4  ;;  %s8017_s19 = scalar_lea.sflag [#allocation3], %s170_s30  ;;  %s8015_s7 = int_to_ptr.vmem [resolvable:$true] %s181_s7 }
  0x38   : > { %s8013_s18 = scalar_lea.hbm %s10356_s0, %s7423_s26  ;;  %p7723_p3 = pneg %p8006_p11 }
  0x39   : > { %s7721_s25 = scalar_lea.hbm %s8013_s18, 3456  ;;  %s7726_s26 = scalar_lea.hbm %s10356_s0, 6912 }
  0x3a   : > { %p7722_p0 = scmp.ne.s32.totalorder %s8013_s18, %s7721_s25  ;;  %p7727_p9 = scmp.lt.u32.totalorder %s8013_s18, %s10356_s0 }
  0x3b   : > { %p7728_p1 = scmp.lt.u32.totalorder %s7726_s26, %s7721_s25  ;;  %p7730_p4 = scmp.lt.u32.totalorder %s7721_s25, %s8013_s18 }
  0x3c   : > { %p7724_p5 = pnand %p7723_p3, %p7722_p0 }
  0x3d   : > { %p7729_p2 = por %p7728_p1, %p7727_p9 }
  0x3e   : > { %p7725_p7 = pneg %p7724_p5 }
  0x3f   : > { %p7731_p6 = por %p7730_p4, %p7729_p2 }
  0x41   : > { %p7732_p8 = pnand %p7731_p6, %p7725_p7 }
  0x43   : > { %7735 = shalt.err (!%p7732_p8)
}
  0x44   : > { %s7736_s30 = scalar_lea.vmem %s8015_s7, 3456  ;;  %s7874_s21 = smov [#allocation2]  }
  0x45   : > { %p7737_p12 = scmp.ne.s32.totalorder %s8015_s7, %s7736_s30  ;;  %s7741_s27 = sshll.u32 %s7874_s21, 4  ;;  %s7742_s27 = int_to_ptr.vmem [resolvable:$false] %s7741_s27 }
  0x46   : > { %s7743_s4 = scalar_lea.vmem %s7742_s27, 6912  ;;  %p7744_p5 = scmp.lt.s32.totalorder %s8015_s7, %s7742_s27 }
  0x47   : > { %p7739_p13 = pnand %p7737_p12, %p7723_p3  ;;  %p7745_p9 = scmp.lt.s32.totalorder %s7743_s4, %s7736_s30 }
  0x49   : > { %p7740_p0 = pneg %p7739_p13  ;;  %p7746_p1 = por %p7745_p9, %p7744_p5 }
  0x4b   : > { %p7747_p2 = pnand %p7746_p1, %p7740_p0 }
  0x4d   : > { %7750 = shalt.err (!%p7747_p2)
}
  0x4e   : > { %7442 = dma.hbm_to_vmem [thread:$0]  (!%p8006_p11), %s8013_s18, 3456, %s8015_s7, %s8017_s19, %s7872_s10, %s7872_s10, %s7873_s11  }
  0x4f   : > { %p10440_p3 = scmp.ne.s32.totalorder %s10435_s24, 0 }
  0x51   : > { %193 = sbr.rel (%p10440_p3) target bundleno = 995 (0x3e3), region = 28 }
  0x58   : > { %s8051_s25 = sand.u32 1, %s7853_s13   ;;  %p10441_p7 = scmp.ne.s32.totalorder %s10433_s22, 0 }
  0x59   : > { %s7424_s26 = smul.u32 216, %s8051_s25  ;;  %s196_s6 = scalar_lea.sflag [#allocation3], %s8051_s25 }
  0x5b   : > { %s8055_s9 = scalar_lea.vmem [#allocation2], %s7424_s26 }
  0x5c   : > { %7832 = dma.done.wait (%p10441_p7), %s196_s6, 3456  }
  0x5d   : > { %7834 = vsyncadd (%p10441_p7), %s196_s6, 4294963840  ;;  %p10442_p11 = scmp.ne.s32.totalorder %s10431_s20, 0 }
  0x5f   : > { %7836 = dma.done.wait (%p10442_p11), [#allocation6], 512  }
  0x60   : > { %7838 = vsyncadd (%p10442_p11), [#allocation6], 4294966784  ;;  %vm831_vm0 = vcmask 1041408   ;;  %vm311_vm1 = vsmask.f32 3328  ;;  %vm782_vm3 = vcmask 31744  }
  0x61   : > { %vm312_vm2 = vsmask.f32 7440  ;;  %v8065_v0 = vld [vmem:[#allocation5] sm:$0xf]  ;;  %v239_v1 = vld [vmem:[%s8055_s9 + $0xc] sm:$0xf] }
  0x62   : > { %v8069_v2 = vld [vmem:[%s8055_s9 + $0x10] sm:$0xf]  ;;  %v5718_v3 = vcombine.low %v8065_v0, %v8065_v0  ;;  %v8074_v4 = vld [vmem:[%s8055_s9 + $0x14] sm:$0x1]  ;;  %v315_v5 = vshrl.u32 %v239_v1, 16  ;;  %v318_v6 = vshll.u32 %v239_v1, 16  ;;  %vm8096_vm4 = vmor %vm311_vm1, %vm312_vm2 }
  0x63   : > { %v324_v7 = vshll.u32 %v8069_v2, 16  ;;  %v328_v8 = vshrl.u32 %v8069_v2, 16  ;;  %v334_v9 = vshll.u32 %v8074_v4, 16  ;;  %v8080_v10 = vcombine.low %v239_v1, %v8069_v2  ;;  %v1863_v12 = vld [vmem:[#allocation5 + $0x8] sm:$0xf]  ;;  %s7875_s20 = smov 4  }
  0x64   : > { %v781_v13 = vrot.slane %v5718_v3, 2  ;;  %v317_v14 = vrot.slane %v315_v5, 4  ;;  %v320_v15 = vrot.slane %v318_v6, 5  ;;  %v241_v17 = vld [vmem:[%s8055_s9 + $0x18] sm:$0xf]  ;;  %v5818_v20 = vcombine.low %v1863_v12, %v1863_v12  ;;  %s5700_s22 = sshll.u32 %s8051_s25, 8 }
  0x65   : > { %10443 = vst [vmem:[#allocation14_spill] sm:$0xff] %v8080_v10  ;;  %v326_v16 = vrot.slane %v324_v7, 5  ;;  %v330_v18 = vrot.slane %v328_v8, 4  ;;  %v336_v19 = vrot.slane %v334_v9, 5  ;;  %6480 = vmatprep.mubr.msk.bf16.mxu0 %vm782_vm3, %v8080_v10  ;;  %v8087_v21 = vld [vmem:[%s8055_s9 + $0x1c] sm:$0xf] }
  0x66   : > { %v8090_v22 = vld [vmem:[%s8055_s9 + $0x20] sm:$0x1]  ;;  %7406 = vmatprep.subr.msk.bf16.mxu0 %vm831_vm0, %v781_v13  ;;  %v833_v23 = vsel %vm831_vm0, %v781_v13, 0  ;;  %v321_v24 = vor.u32 %v320_v15, %v317_v14  ;;  %v339_v25 = vshrl.u32 %v241_v17, 16  ;;  %v342_v26 = vshll.u32 %v241_v17, 16  ;;  %s9600_s24 = scalar_lea.vmem [#allocation7], %s5700_s22 }
  0x67   : > { %6479 = vmatpush3.bf16.msra.mxu0 %v833_v23  ;;  %v331_v28 = vor.u32 %v330_v18, %v326_v16  ;;  %v2015_v29 = vrot.slane %v5818_v20, 2  ;;  %v348_v30 = vshll.u32 %v8087_v21, 16  ;;  %v352_v31 = vshrl.u32 %v8087_v21, 16  ;;  %v243_v40 = vld [vmem:[%s8055_s9 + $0x24] sm:$0xf]  ;;  %s5701_s10 = sshll.u32 %s8051_s25, 1 }
  0x68   : > { %v322_v32 = vrot.slane %v321_v24, 4  ;;  %v341_v33 = vrot.slane %v339_v25, 4  ;;  %v344_v34 = vrot.slane %v342_v26, 5  ;;  %v358_v35 = vshll.u32 %v8090_v22, 16  ;;  %7407 = vmatprep.subr.msk.bf16.mxu0 %vm831_vm0, %v8065_v0  ;;  %v8114_v45 = vld [vmem:[%s8055_s9 + $0x28] sm:$0xf] }
  0x69   : > { %v332_v36 = vrot.slane %v331_v28, 4  ;;  %7410 = vmatprep.subr.msk.bf16.mxu1 %vm831_vm0, %v2015_v29  ;;  %v350_v37 = vrot.slane %v348_v30, 5  ;;  %v354_v38 = vrot.slane %v352_v31, 4  ;;  %v8107_v39 = vcombine.low %v241_v17, %v8087_v21  ;;  %v8123_v50 = vld [vmem:[%s8055_s9 + $0x2c] sm:$0x1]  ;;  %s6138_s11 = sshll.u32 %s7861_s15, 5 }
  0x6a   : > { %v327_v41 = vsel %vm8096_vm4, %v322_v32, %v326_v16  ;;  %v345_v42 = vor.u32 %v344_v34, %v341_v33  ;;  %v360_v43 = vrot.slane %v358_v35, 5  ;;  %v10364_v44 = vrot.slane %v8087_v21, 5  ;;  %v245_v59 = vld [vmem:[%s8055_s9 + $0x30] sm:$0xf]  ;;  %v8144_v1 = vld [vmem:[%s8055_s9 + $0x34] sm:$0xf]  ;;  %s10145_s30 = scalar_lea.hbm %s10359_s3, %s6138_s11 }
  0x6b   : > { %10446 = vst [vmem:[#allocation15_spill] sm:$0xff] %v8107_v39  ;;  %v337_v46 = vsel %vm8096_vm4, %v332_v36, %v336_v19  ;;  %v355_v47 = vor.u32 %v354_v38, %v350_v37  ;;  %6481 = vmatmul.mubr.msk.bf16.vlgmr.msra.gmra.mrb[0].mxu0 %vm782_vm3, %v8107_v39  ;;  %v2017_v48 = vsel %vm831_vm0, %v2015_v29, 0  ;;  %v2277_v49 = vsel %vm831_vm0, %v1863_v12, 0  ;;  %v8149_v8 = vld [vmem:[%s8055_s9 + $0x38] sm:$0x1]  ;;  %s230_s7 = scalar_lea.vmem [#allocation8], %s5701_s10 }
  0x6c   : > { %v8125_v51 = vcombine.low %v327_v41, %v337_v46  ;;  %v346_v52 = vrot.slane %v345_v42, 4  ;;  %v8129_v53 = vrot.slane %v10364_v44, 4  ;;  %6615 = vmatpush3.bf16.msra.mxu1 %v2017_v48  ;;  %v363_v54 = vshrl.u32 %v243_v40, 16  ;;  %v247_v19 = vld [vmem:[%s8055_s9 + $0x3c] sm:$0xf]  ;;  %s5566_s8 = sshll.u32 %s230_s7, 4  ;;  %s10147_s8 = int_to_ptr.vmem [resolvable:$true] %s5566_s8 }
  0x6d   : > { %v356_v55 = vrot.slane %v355_v47, 4  ;;  %7411 = vmatprep.subr.msk.bf16.mxu1 %vm831_vm0, %v1863_v12  ;;  %v366_v56 = vshll.u32 %v243_v40, 16  ;;  %v372_v57 = vshll.u32 %v8114_v45, 16  ;;  %v376_v58 = vshrl.u32 %v8114_v45, 16  ;;  %v8165_v26 = vld [vmem:[%s8055_s9 + $0x40] sm:$0xf] }
  0x6e   : > { %v351_v60 = vsel %vm8096_vm4, %v346_v52, %v350_v37  ;;  %6616 = vmatprep.mubr.msk.bf16.mxu1 %vm782_vm3, %v8125_v51  ;;  %v365_v61 = vrot.slane %v363_v54, 4  ;;  %v382_v62 = vshll.u32 %v8123_v50, 16  ;;  %v8141_v63 = vcombine.low %v243_v40, %v8114_v45  ;;  %v8170_v34 = vld [vmem:[%s8055_s9 + $0x44] sm:$0x1]  ;;  %v249_v42 = vld [vmem:[%s8055_s9 + $0x48] sm:$0xf] }
  0x6f   : > { %v361_v3 = vsel %vm8096_vm4, %v356_v55, %v360_v43  ;;  %v368_v5 = vrot.slane %v366_v56, 5  ;;  %v374_v6 = vrot.slane %v372_v57, 5  ;;  %v378_v7 = vrot.slane %v376_v58, 4  ;;  %v8183_v56 = vld [vmem:[%s8055_s9 + $0x4c] sm:$0xf]  ;;  %s5533_s21 = scalar_lea.sflag [#allocation9], %s8051_s25 }
  0x70   : > { %10447 = vst [vmem:[#allocation16_spill] sm:$0xff] %v8141_v63  ;;  %v8151_v9 = vcombine.low %v351_v60, %v361_v3  ;;  %v384_v12 = vrot.slane %v382_v62, 5  ;;  %6484 = vmatprep.mubr.msk.bf16.mxu0 %vm782_vm3, %v8141_v63  ;;  %v387_v13 = vshrl.u32 %v245_v59, 16  ;;  %v390_v14 = vshll.u32 %v245_v59, 16  ;;  %v8193_v60 = vld [vmem:[%s8055_s9 + $0x50] sm:$0x1] }
  0x71   : > { %v369_v15 = vor.u32 %v368_v5, %v365_v61  ;;  %v379_v16 = vor.u32 %v378_v7, %v374_v6  ;;  %v396_v17 = vshll.u32 %v8144_v1, 16  ;;  %v400_v18 = vshrl.u32 %v8144_v1, 16  ;;  %v251_v7 = vld [vmem:[%s8055_s9 + $0x54] sm:$0xf]  ;;  %v261_v11 = vld [vmem:[%s8055_s9 + $0x90] sm:$0xf] }
  0x72   : > { %6617 = vmatmul.mubr.msk.bf16.vlgmr.msra.gmra.mrb[0].mxu1 %vm782_vm3, %v8151_v9  ;;  %v389_v20 = vrot.slane %v387_v13, 4  ;;  %v392_v23 = vrot.slane %v390_v14, 5  ;;  %v406_v24 = vshll.u32 %v8149_v8, 16  ;;  %v8162_v25 = vcombine.low %v245_v59, %v8144_v1  ;;  %s7751_s27 = scalar_lea.vmem %s10147_s8, 32  ;;  %s7876_s4 = smov [#allocation8]  }
  0x73   : > { %6649 = vmatpush3.bf16.msra.mxu1 %v2277_v49  ;;  %v370_v28 = vrot.slane %v369_v15, 4  ;;  %v380_v29 = vrot.slane %v379_v16, 4  ;;  %v398_v30 = vrot.slane %v396_v17, 5  ;;  %v402_v31 = vrot.slane %v400_v18, 4  ;;  %p7752_p4 = scmp.ne.s32.totalorder %s10147_s8, %s7751_s27  ;;  %s7755_s26 = sshll.u32 %s7876_s4, 4  ;;  %s7756_s26 = int_to_ptr.vmem [resolvable:$false] %s7755_s26 }
  0x74   : > { %10448 = vst [vmem:[#allocation17_spill] sm:$0xff] %v8162_v25  ;;  %v393_v32 = vor.u32 %v392_v23, %v389_v20  ;;  %v408_v33 = vrot.slane %v406_v24, 5  ;;  %6485 = vmatmul.mubr.msk.bf16.gmra.mrb[4].mxu0 %vm782_vm3, %v8162_v25  ;;  %v411_v35 = vshrl.u32 %v247_v19, 16  ;;  %v414_v36 = vshll.u32 %v247_v19, 16  ;;  %v8206_v20 = vld [vmem:[%s8055_s9 + $0x58] sm:$0xf]  ;;  %p7758_p12 = scmp.lt.s32.totalorder %s10147_s8, %s7756_s26 }
  0x75   : > { %v375_v37 = vsel %vm8096_vm4, %v370_v28, %v374_v6  ;;  %v385_v38 = vsel %vm8096_vm4, %v380_v29, %v384_v12  ;;  %v403_v40 = vor.u32 %v402_v31, %v398_v30  ;;  %v420_v41 = vshll.u32 %v8165_v26, 16  ;;  %v8216_v29 = vld [vmem:[%s8055_s9 + $0x5c] sm:$0x1]  ;;  %p7753_p6 = pnand %p7752_p4, %p7994_p10  ;;  %s7757_s6 = scalar_lea.vmem %s7756_s26, 64 }
  0x76   : > { %v8178_v43 = vcombine.low %v375_v37, %v385_v38  ;;  %v394_v46 = vrot.slane %v393_v32, 4  ;;  %v413_v47 = vrot.slane %v411_v35, 4  ;;  %v416_v48 = vrot.slane %v414_v36, 5  ;;  %p7759_p13 = scmp.lt.s32.totalorder %s7757_s6, %s7751_s27 }
  0x77   : > { %v404_v49 = vrot.slane %v403_v40, 4  ;;  %v422_v52 = vrot.slane %v420_v41, 5  ;;  %v424_v54 = vshrl.u32 %v8165_v26, 16  ;;  %v430_v55 = vshll.u32 %v8170_v34, 16  ;;  %p7754_p8 = pneg %p7753_p6 }
  0x78   : > { %v399_v57 = vsel %vm8096_vm4, %v394_v46, %v398_v30  ;;  %6620 = vmatprep.mubr.msk.bf16.mxu1 %vm782_vm3, %v8178_v43  ;;  %v417_v58 = vor.u32 %v416_v48, %v413_v47  ;;  %v8190_v59 = vcombine.low %v247_v19, %v8165_v26  ;;  %v435_v61 = vshrl.u32 %v249_v42, 16  ;;  %v253_v48 = vld [vmem:[%s8055_s9 + $0x60] sm:$0xf]  ;;  %p7760_p0 = por %p7759_p13, %p7758_p12 }
  0x79   : > { %v409_v62 = vsel %vm8096_vm4, %v404_v49, %v408_v33  ;;  %v426_v3 = vrot.slane %v424_v54, 4  ;;  %v432_v5 = vrot.slane %v430_v55, 5  ;;  %v438_v6 = vshll.u32 %v249_v42, 16  ;;  %v8227_v49 = vld [vmem:[%s8055_s9 + $0x64] sm:$0xf] }
  0x7a   : > { %10449 = vst [vmem:[#allocation18_spill] sm:$0xff] %v8190_v59  ;;  %v8198_v12 = vcombine.low %v399_v57, %v409_v62  ;;  %v418_v13 = vrot.slane %v417_v58, 4  ;;  %6488 = vmatprep.mubr.msk.bf16.mxu0 %vm782_vm3, %v8190_v59  ;;  %v437_v14 = vrot.slane %v435_v61, 4  ;;  %v444_v15 = vshll.u32 %v8183_v56, 16  ;;  %v8232_v58 = vld [vmem:[%s8055_s9 + $0x68] sm:$0x1]  ;;  %p7761_p5 = pnand %p7760_p0, %p7754_p8 }
  0x7b   : > { %v427_v16 = vor.u32 %v426_v3, %v422_v52  ;;  %v440_v17 = vrot.slane %v438_v6, 5  ;;  %v448_v18 = vshrl.u32 %v8183_v56, 16  ;;  %v454_v19 = vshll.u32 %v8193_v60, 16 }
  0x7c   : > { %6621 = vmatmul.mubr.msk.bf16.gmra.mrb[4].mxu1 %vm782_vm3, %v8198_v12  ;;  %v423_v23 = vsel %vm8096_vm4, %v418_v13, %v422_v52  ;;  %v446_v24 = vrot.slane %v444_v15, 5  ;;  %v8213_v28 = vcombine.low %v249_v42, %v8183_v56  ;;  %v459_v30 = vshrl.u32 %v251_v7, 16 }
  0x7d   : > { %v428_v31 = vrot.slane %v427_v16, 4  ;;  %v441_v32 = vor.u32 %v440_v17, %v437_v14  ;;  %v450_v33 = vrot.slane %v448_v18, 4  ;;  %v456_v35 = vrot.slane %v454_v19, 5  ;;  %v255_v19 = vld [vmem:[%s8055_s9 + $0x6c] sm:$0xf] }
  0x7e   : > { %10450 = vst [vmem:[#allocation19_spill] sm:$0xff] %v8213_v28  ;;  %6489 = vmatmul.mubr.msk.bf16.gmra.mrb[8].mxu0 %vm782_vm3, %v8213_v28  ;;  %v461_v36 = vrot.slane %v459_v30, 4  ;;  %v462_v37 = vshll.u32 %v251_v7, 16  ;;  %v468_v38 = vshll.u32 %v8206_v20, 16  ;;  %v472_v40 = vshrl.u32 %v8206_v20, 16 }
  0x7f   : > { %v433_v41 = vsel %vm8096_vm4, %v428_v31, %v432_v5  ;;  %v442_v42 = vrot.slane %v441_v32, 4  ;;  %v451_v46 = vor.u32 %v450_v33, %v446_v24  ;;  %v478_v47 = vshll.u32 %v8216_v29, 16  ;;  %v8252_v32 = vld [vmem:[%s8055_s9 + $0x70] sm:$0xf] }
  0x80   : > { %v8229_v52 = vcombine.low %v423_v23, %v433_v41  ;;  %v464_v54 = vrot.slane %v462_v37, 5  ;;  %v470_v55 = vrot.slane %v468_v38, 5  ;;  %v474_v57 = vrot.slane %v472_v40, 4  ;;  %v8255_v38 = vld [vmem:[%s8055_s9 + $0x74] sm:$0x1] }
  0x81   : > { %v447_v61 = vsel %vm8096_vm4, %v442_v42, %v446_v24  ;;  %v452_v62 = vrot.slane %v451_v46, 4  ;;  %v480_v3 = vrot.slane %v478_v47, 5  ;;  %v8237_v5 = vcombine.low %v251_v7, %v8206_v20  ;;  %v8266_v47 = vld [vmem:[#allocation5 + $0xc] sm:$0xf] }
  0x82   : > { %6624 = vmatprep.mubr.msk.bf16.mxu1 %vm782_vm3, %v8229_v52  ;;  %v465_v6 = vor.u32 %v464_v54, %v461_v36  ;;  %v475_v13 = vor.u32 %v474_v57, %v470_v55  ;;  %v483_v14 = vshrl.u32 %v253_v48, 16  ;;  %v486_v15 = vshll.u32 %v253_v48, 16  ;;  %7412 = vmatprep.subr.msk.bf16.mxu1 %vm831_vm0, %v8266_v47 }
  0x83   : > { %10451 = vst [vmem:[#allocation20_spill] sm:$0xff] %v8237_v5  ;;  %v457_v16 = vsel %vm8096_vm4, %v452_v62, %v456_v35  ;;  %6492 = vmatprep.mubr.msk.bf16.mxu0 %vm782_vm3, %v8237_v5  ;;  %v492_v17 = vshll.u32 %v8227_v49, 16  ;;  %v496_v7 = vshrl.u32 %v8227_v49, 16  ;;  %v502_v18 = vshll.u32 %v8232_v58, 16 }
  0x84   : > { %v8249_v23 = vcombine.low %v447_v61, %v457_v16  ;;  %v466_v24 = vrot.slane %v465_v6, 4  ;;  %v476_v30 = vrot.slane %v475_v13, 4  ;;  %v485_v31 = vrot.slane %v483_v14, 4  ;;  %v257_v6 = vld [vmem:[%s8055_s9 + $0x78] sm:$0xf] }
  0x85   : > { %v488_v33 = vrot.slane %v486_v15, 5  ;;  %v494_v35 = vrot.slane %v492_v17, 5  ;;  %v498_v36 = vrot.slane %v496_v7, 4  ;;  %v504_v37 = vrot.slane %v502_v18, 5  ;;  %v8284_v7 = vld [vmem:[%s8055_s9 + $0x7c] sm:$0xf] }
  0x86   : > { %6625 = vmatmul.mubr.msk.bf16.gmra.mrb[8].mxu1 %vm782_vm3, %v8249_v23  ;;  %v471_v40 = vsel %vm8096_vm4, %v466_v24, %v470_v55  ;;  %v481_v41 = vsel %vm8096_vm4, %v476_v30, %v480_v3  ;;  %v8264_v42 = vcombine.low %v253_v48, %v8227_v49  ;;  %v507_v46 = vshrl.u32 %v255_v19, 16 }
  0x87   : > { %v8268_v54 = vcombine.low %v471_v40, %v481_v41  ;;  %v489_v57 = vor.u32 %v488_v33, %v485_v31  ;;  %v499_v61 = vor.u32 %v498_v36, %v494_v35  ;;  %v510_v62 = vshll.u32 %v255_v19, 16  ;;  %v8287_v31 = vld [vmem:[%s8055_s9 + $0x80] sm:$0x1] }
  0x88   : > { %10452 = vst [vmem:[#allocation21_spill] sm:$0xff] %v8264_v42  ;;  %6493 = vmatmul.mubr.msk.bf16.gmra.mrb[12].mxu0 %vm782_vm3, %v8264_v42  ;;  %v509_v55 = vrot.slane %v507_v46, 4  ;;  %v516_v48 = vshll.u32 %v8252_v32, 16  ;;  %v520_v3 = vshrl.u32 %v8252_v32, 16  ;;  %v526_v13 = vshll.u32 %v8255_v38, 16 }
  0x89   : > { %v490_v14 = vrot.slane %v489_v57, 4  ;;  %v500_v15 = vrot.slane %v499_v61, 4  ;;  %6628 = vmatprep.mubr.msk.bf16.mxu1 %vm782_vm3, %v8268_v54  ;;  %v512_v16 = vrot.slane %v510_v62, 5  ;;  %v8281_v17 = vcombine.low %v255_v19, %v8252_v32  ;;  %v259_v46 = vld [vmem:[%s8055_s9 + $0x84] sm:$0xf] }
  0x8a   : > { %v518_v18 = vrot.slane %v516_v48, 5  ;;  %v522_v24 = vrot.slane %v520_v3, 4  ;;  %v528_v30 = vrot.slane %v526_v13, 5  ;;  %v531_v33 = vshrl.u32 %v257_v6, 16 }
  0x8b   : > { %10453 = vst [vmem:[#allocation22_spill] sm:$0xff] %v8281_v17  ;;  %v495_v36 = vsel %vm8096_vm4, %v490_v14, %v494_v35  ;;  %v505_v40 = vsel %vm8096_vm4, %v500_v15, %v504_v37  ;;  %v513_v41 = vor.u32 %v512_v16, %v509_v55  ;;  %6496 = vmatprep.mubr.msk.bf16.mxu0 %vm782_vm3, %v8281_v17  ;;  %v534_v19 = vshll.u32 %v257_v6, 16  ;;  %v8302_v37 = vld [vmem:[%s8055_s9 + $0x88] sm:$0xf] }
  0x8c   : > { %v8296_v57 = vcombine.low %v495_v36, %v505_v40  ;;  %v523_v61 = vor.u32 %v522_v24, %v518_v18  ;;  %v533_v62 = vrot.slane %v531_v33, 4  ;;  %v540_v48 = vshll.u32 %v8284_v7, 16 }
  0x8d   : > { %v514_v3 = vrot.slane %v513_v41, 4  ;;  %v536_v13 = vrot.slane %v534_v19, 5  ;;  %v544_v35 = vshrl.u32 %v8284_v7, 16  ;;  %v550_v14 = vshll.u32 %v8287_v31, 16  ;;  %v8312_v19 = vld [vmem:[%s8055_s9 + $0x8c] sm:$0x1] }
  0x8e   : > { %10454 = vst [vmem:[#allocation23_spill] sm:$0xff] %v8296_v57  ;;  %6629 = vmatmul.mubr.msk.bf16.gmra.mrb[12].mxu1 %vm782_vm3, %v8296_v57  ;;  %v524_v55 = vrot.slane %v523_v61, 4  ;;  %v542_v15 = vrot.slane %v540_v48, 5  ;;  %v8307_v16 = vcombine.low %v257_v6, %v8284_v7  ;;  %v555_v24 = vshrl.u32 %v259_v46, 16 }
  0x8f   : > { %v519_v33 = vsel %vm8096_vm4, %v514_v3, %v518_v18  ;;  %v537_v36 = vor.u32 %v536_v13, %v533_v62  ;;  %v546_v40 = vrot.slane %v544_v35, 4  ;;  %v552_v41 = vrot.slane %v550_v14, 5  ;;  %v8324_v3 = vld [vmem:[%s8055_s9 + $0x94] sm:$0xf] }
  0x90   : > { %10455 = vst [vmem:[#allocation24_spill] sm:$0xff] %v8307_v16  ;;  %v529_v44 = vsel %vm8096_vm4, %v524_v55, %v528_v30  ;;  %6497 = vmatmul.mubr.msk.bf16.gmra.mrb[16].mxu0 %vm782_vm3, %v8307_v16  ;;  %v557_v61 = vrot.slane %v555_v24, 4  ;;  %v558_v48 = vshll.u32 %v259_v46, 16  ;;  %v564_v6 = vshll.u32 %v8302_v37, 16  ;;  %v263_v16 = vld [vmem:[%s8055_s9 + $0x9c] sm:$0xf] }
  0x91   : > { %v8320_v17 = vcombine.low %v519_v33, %v529_v44  ;;  %v538_v42 = vrot.slane %v537_v36, 4  ;;  %v547_v18 = vor.u32 %v546_v40, %v542_v15  ;;  %v568_v62 = vshrl.u32 %v8302_v37, 16 }
  0x92   : > { %v560_v13 = vrot.slane %v558_v48, 5  ;;  %v566_v35 = vrot.slane %v564_v6, 5  ;;  %v574_v30 = vshll.u32 %v8312_v19, 16  ;;  %v8328_v14 = vcombine.low %v259_v46, %v8302_v37  ;;  %v8337_v48 = vld [vmem:[%s8055_s9 + $0x98] sm:$0x1] }
  0x93   : > { %10456 = vst [vmem:[#allocation25_spill] sm:$0xff] %v8320_v17  ;;  %v543_v55 = vsel %vm8096_vm4, %v538_v42, %v542_v15  ;;  %v548_v44 = vrot.slane %v547_v18, 4  ;;  %6632 = vmatprep.mubr.msk.bf16.mxu1 %vm782_vm3, %v8320_v17  ;;  %v570_v24 = vrot.slane %v568_v62, 4  ;;  %v579_v33 = vshrl.u32 %v261_v11, 16 }
  0x94   : > { %10457 = vst [vmem:[#allocation26_spill] sm:$0xff] %v8328_v14  ;;  %v561_v36 = vor.u32 %v560_v13, %v557_v61  ;;  %v576_v40 = vrot.slane %v574_v30, 5  ;;  %6500 = vmatprep.mubr.msk.bf16.mxu0 %vm782_vm3, %v8328_v14  ;;  %v582_v46 = vshll.u32 %v261_v11, 16  ;;  %v588_v6 = vshll.u32 %v8324_v3, 16  ;;  %v8347_v14 = vld [vmem:[%s8055_s9 + $0xa0] sm:$0xf] }
  0x95   : > { %v553_v42 = vsel %vm8096_vm4, %v548_v44, %v552_v41  ;;  %v571_v15 = vor.u32 %v570_v24, %v566_v35  ;;  %v581_v18 = vrot.slane %v579_v33, 4  ;;  %v592_v62 = vshrl.u32 %v8324_v3, 16  ;;  %10459 = vst [vmem:[#allocation28_spill] sm:$0xff] %v8347_v14  ;;  %v8358_v24 = vld [vmem:[%s8055_s9 + $0xa4] sm:$0x1] }
  0x96   : > { %v8344_v5 = vcombine.low %v543_v55, %v553_v42  ;;  %v562_v61 = vrot.slane %v561_v36, 4  ;;  %v584_v13 = vrot.slane %v582_v46, 5  ;;  %v590_v30 = vrot.slane %v588_v6, 5  ;;  %10461 = vst [vmem:[#allocation30_spill] sm:$0xff] %v8358_v24 }
  0x97   : > { %v572_v28 = vrot.slane %v571_v15, 4  ;;  %v594_v59 = vrot.slane %v592_v62, 4  ;;  %v598_v25 = vshll.u32 %v8337_v48, 16  ;;  %v8351_v41 = vcombine.low %v261_v11, %v8324_v3  ;;  %v265_v15 = vld [vmem:[%s8055_s9 + $0xa8] sm:$0xf] }
  0x98   : > { %10458 = vst [vmem:[#allocation27_spill] sm:$0xff] %v8344_v5  ;;  %6633 = vmatmul.mubr.msk.bf16.gmra.mrb[16].mxu1 %vm782_vm3, %v8344_v5  ;;  %v567_v55 = vsel %vm8096_vm4, %v562_v61, %v566_v35  ;;  %v585_v44 = vor.u32 %v584_v13, %v581_v18  ;;  %v603_v33 = vshrl.u32 %v263_v16, 16  ;;  %v606_v36 = vshll.u32 %v263_v16, 16 }
  0x99   : > { %10460 = vst [vmem:[#allocation29_spill] sm:$0xff] %v8351_v41  ;;  %v577_v46 = vsel %vm8096_vm4, %v572_v28, %v576_v40  ;;  %v595_v6 = vor.u32 %v594_v59, %v590_v30  ;;  %v600_v42 = vrot.slane %v598_v25, 5  ;;  %6501 = vmatmul.mubr.msk.bf16.gmra.mrb[20].mxu0 %vm782_vm3, %v8351_v41  ;;  %v612_v11 = vshll.u32 %v8347_v14, 16  ;;  %v8371_v25 = vld [vmem:[%s8055_s9 + $0xac] sm:$0xf] }
  0x9a   : > { %v8366_v62 = vcombine.low %v567_v55, %v577_v46  ;;  %v586_v35 = vrot.slane %v585_v44, 4  ;;  %v605_v18 = vrot.slane %v603_v33, 4  ;;  %v608_v61 = vrot.slane %v606_v36, 5  ;;  %v8381_v44 = vld [vmem:[%s8055_s9 + $0xb0] sm:$0x1] }
  0x9b   : > { %v596_v13 = vrot.slane %v595_v6, 4  ;;  %v614_v63 = vrot.slane %v612_v11, 5  ;;  %v616_v39 = vshrl.u32 %v8347_v14, 16  ;;  %v622_v59 = vshll.u32 %v8358_v24, 16  ;;  %v267_v41 = vld [vmem:[%s8055_s9 + $0xb4] sm:$0xf] }
  0x9c   : > { %10462 = vst [vmem:[#allocation31_spill] sm:$0xff] %v8366_v62  ;;  %v591_v28 = vsel %vm8096_vm4, %v586_v35, %v590_v30  ;;  %6636 = vmatprep.mubr.msk.bf16.mxu1 %vm782_vm3, %v8366_v62  ;;  %v609_v40 = vor.u32 %v608_v61, %v605_v18  ;;  %v8378_v55 = vcombine.low %v263_v16, %v8347_v14  ;;  %v627_v33 = vshrl.u32 %v265_v15, 16 }
  0x9d   : > { %v601_v36 = vsel %vm8096_vm4, %v596_v13, %v600_v42  ;;  %v618_v46 = vrot.slane %v616_v39, 4  ;;  %v624_v6 = vrot.slane %v622_v59, 5  ;;  %v630_v11 = vshll.u32 %v265_v15, 16  ;;  %v8394_v13 = vld [vmem:[%s8055_s9 + $0xb8] sm:$0xf] }
  0x9e   : > { %10463 = vst [vmem:[#allocation32_spill] sm:$0xff] %v8378_v55  ;;  %v8386_v10 = vcombine.low %v591_v28, %v601_v36  ;;  %v610_v30 = vrot.slane %v609_v40, 4  ;;  %6504 = vmatprep.mubr.msk.bf16.mxu0 %vm782_vm3, %v8378_v55  ;;  %v629_v16 = vrot.slane %v627_v33, 4  ;;  %v636_v35 = vshll.u32 %v8371_v25, 16  ;;  %v8404_v33 = vld [vmem:[%s8055_s9 + $0xbc] sm:$0x1] }
  0x9f   : > { %vm1897_vm5 = vcmask 1042432   ;;  %vm1898_vm6 = vcmask 1046532   ;;  %v619_v18 = vor.u32 %v618_v46, %v614_v63  ;;  %v632_v61 = vrot.slane %v630_v11, 5 }
  0xa0   : > { %10464 = vst [vmem:[#allocation33_spill] sm:$0xff] %v8386_v10  ;;  %v640_v42 = vshrl.u32 %v8371_v25, 16  ;;  %v646_v39 = vshll.u32 %v8381_v44, 16  ;;  %6637 = vmatmul.mubr.msk.bf16.gmra.mrb[20].mxu1 %vm782_vm3, %v8386_v10  ;;  %v615_v59 = vsel %vm8096_vm4, %v610_v30, %v614_v63  ;;  %v638_v28 = vrot.slane %v636_v35, 5  ;;  %vm8444_vm7 = vmor %vm1897_vm5, %vm1898_vm6 }
  0xa1   : > { %v8401_v40 = vcombine.low %v265_v15, %v8371_v25  ;;  %v651_v36 = vshrl.u32 %v267_v41, 16  ;;  %v620_v46 = vrot.slane %v619_v18, 4  ;;  %v633_v11 = vor.u32 %v632_v61, %v629_v16  ;;  %v269_v16 = vld [vmem:[%s8055_s9 + $0xc0] sm:$0xf] }
  0xa2   : > { %v642_v55 = vrot.slane %v640_v42, 4  ;;  %v648_v24 = vrot.slane %v646_v39, 5  ;;  %v654_v14 = vshll.u32 %v267_v41, 16  ;;  %v660_v63 = vshll.u32 %v8394_v13, 16 }
  0xa3   : > { %10465 = vst [vmem:[#allocation34_spill] sm:$0xff] %v8401_v40  ;;  %6505 = vmatmul.mubr.msk.bf16.gmra.mrb[24].mxu0 %vm782_vm3, %v8401_v40  ;;  %v653_v10 = vrot.slane %v651_v36, 4  ;;  %v664_v30 = vshrl.u32 %v8394_v13, 16  ;;  %v625_v15 = vsel %vm8096_vm4, %v620_v46, %v624_v6  ;;  %v634_v35 = vrot.slane %v633_v11, 4  ;;  %v8417_v36 = vld [vmem:[%s8055_s9 + $0xc4] sm:$0xf] }
  0xa4   : > { %v643_v62 = vor.u32 %v642_v55, %v638_v28  ;;  %v670_v18 = vshll.u32 %v8404_v33, 16  ;;  %v8414_v61 = vcombine.low %v615_v59, %v625_v15  ;;  %v656_v42 = vrot.slane %v654_v14, 5  ;;  %v8427_v11 = vld [vmem:[%s8055_s9 + $0xc8] sm:$0x1] }
  0xa5   : > { %v662_v39 = vrot.slane %v660_v63, 5  ;;  %v666_v40 = vrot.slane %v664_v30, 4  ;;  %v639_v5 = vsel %vm8096_vm4, %v634_v35, %v638_v28  ;;  %v8422_v6 = vcombine.low %v267_v41, %v8394_v13  ;;  %v292_v30 = vld [vmem:[%s8055_s9 + $0xc] sm:$0xe] }
  0xa6   : > { %10466 = vst [vmem:[#allocation35_spill] sm:$0xff] %v8414_v61  ;;  %v644_v17 = vrot.slane %v643_v62, 4  ;;  %v672_v57 = vrot.slane %v670_v18, 5  ;;  %6640 = vmatprep.mubr.msk.bf16.mxu1 %vm782_vm3, %v8414_v61  ;;  %v657_v55 = vor.u32 %v656_v42, %v653_v10  ;;  %v675_v46 = vshrl.u32 %v269_v16, 16 }
  0xa7   : > { %10467 = vst [vmem:[#allocation36_spill] sm:$0xff] %v8422_v6  ;;  %v667_v59 = vor.u32 %v666_v40, %v662_v39  ;;  %v678_v14 = vshll.u32 %v269_v16, 16  ;;  %6508 = vmatprep.mubr.msk.bf16.mxu0 %vm782_vm3, %v8422_v6  ;;  %v684_v62 = vshll.u32 %v8417_v36, 16  ;;  %v688_v41 = vshrl.u32 %v8417_v36, 16 }
  0xa8   : > { %v649_v63 = vsel %vm8096_vm4, %v644_v17, %v648_v24  ;;  %v8436_v28 = vcombine.low %v269_v16, %v8417_v36  ;;  %v658_v40 = vrot.slane %v657_v55, 4  ;;  %v677_v35 = vrot.slane %v675_v46, 4  ;;  %v8448_v16 = vld [vmem:[#allocation5 + $0x4] sm:$0xf] }
  0xa9   : > { %v8439_v10 = vcombine.low %v639_v5, %v649_v63  ;;  %v668_v15 = vrot.slane %v667_v59, 4  ;;  %v680_v18 = vrot.slane %v678_v14, 5  ;;  %v686_v42 = vrot.slane %v684_v62, 5  ;;  %v293_v14 = vld [vmem:[%s8055_s9 + $0x18] sm:$0xe] }
  0xaa   : > { %10468 = vst [vmem:[#allocation37_spill] sm:$0xff] %v8436_v28  ;;  %v690_v17 = vrot.slane %v688_v41, 4  ;;  %v694_v24 = vshll.u32 %v8427_v11, 16  ;;  %v663_v5 = vsel %vm8096_vm4, %v658_v40, %v662_v39  ;;  %v1093_v59 = vsel %vm831_vm0, %v8065_v0, 0  ;;  %v294_v39 = vld [vmem:[%s8055_s9 + $0x24] sm:$0xe] }
  0xab   : > { %6641 = vmatmul.mubr.msk.bf16.gmra.mrb[24].mxu1 %vm782_vm3, %v8439_v10  ;;  %v673_v55 = vsel %vm8096_vm4, %v668_v15, %v672_v57  ;;  %6509 = vmatmul.mubr.msk.bf16.gmra.mrb[28].mxu0 %vm782_vm3, %v8436_v28  ;;  %v5802_v46 = vrot.slane %v292_v30, 9  ;;  %v681_v62 = vor.u32 %v680_v18, %v677_v35  ;;  %v10471_v57 = vrot.slane %v8069_v2, 5 }
  0xac   : > { %v8461_v63 = vcombine.low %v663_v5, %v673_v55  ;;  %v691_v41 = vor.u32 %v690_v17, %v686_v42  ;;  %v696_v61 = vrot.slane %v694_v24, 5  ;;  %6513 = vmatpush3.bf16.msra.mxu0 %v1093_v59  ;;  %6514 = vmatprep.mubr.msk.bf16.mxu0 %vm782_vm3, %v8125_v51  ;;  %v1905_v15 = vrot.slane %v8074_v4, 5 }
  0xad   : > { %v1903_v40 = vsel %vm8444_vm7, %v5802_v46, %v10471_v57  ;;  %v10472_v0 = vmov %v10471_v57  ;;  %v5885_v35 = vcombine.low %v8266_v47, %v8266_v47  ;;  %7408 = vmatprep.subr.msk.bf16.mxu0 %vm831_vm0, %v8448_v16  ;;  %v682_v18 = vrot.slane %v681_v62, 4  ;;  %v295_v46 = vld [vmem:[%s8055_s9 + $0x30] sm:$0xe] }
  0xae   : > { %v1904_v30 = vrot.slane %v10472_v0, 4  ;;  %v692_v17 = vrot.slane %v691_v41, 4  ;;  %6644 = vmatprep.mubr.msk.bf16.mxu1 %vm782_vm3, %v8461_v63  ;;  %v5803_v24 = vrot.slane %v293_v14, 9  ;;  %v1912_v5 = vrot.slane %v8090_v22, 5  ;;  %v296_v0 = vld [vmem:[%s8055_s9 + $0x3c] sm:$0xe] }
  0xaf   : > { %v8482_v4 = vrot.slane %v5885_v35, 2  ;;  %v8486_v55 = vsel %vm831_vm0, %v8266_v47, 0  ;;  %v5804_v59 = vrot.slane %v294_v39, 9  ;;  %v687_v62 = vsel %vm8096_vm4, %v682_v18, %v686_v42 }
  0xb0   : > { %v1906_v2 = vsel %vm8444_vm7, %v1904_v30, %v1905_v15  ;;  %v697_v14 = vsel %vm8096_vm4, %v692_v17, %v696_v61  ;;  %v10473_v22 = vrot.slane %v8087_v21, 5  ;;  %v1913_v47 = vsel %vm8444_vm7, %v8129_v53, %v1912_v5  ;;  %v297_v61 = vld [vmem:[%s8055_s9 + $0x48] sm:$0xe]  ;;  %v298_v17 = vld [vmem:[%s8055_s9 + $0x54] sm:$0xe] }
  0xb1   : > { %v8493_v41 = vcombine.low %v1903_v40, %v1906_v2  ;;  %v8500_v30 = vcombine.low %v687_v62, %v697_v14  ;;  %v1916_v42 = vrot.slane %v8114_v45, 5  ;;  %v1919_v39 = vrot.slane %v8123_v50, 5  ;;  %v299_v62 = vld [vmem:[%s8055_s9 + $0x60] sm:$0xe] }
  0xb2   : > { %v1910_v57 = vsel %vm8444_vm7, %v5803_v24, %v10473_v22  ;;  %v5805_v15 = vrot.slane %v295_v46, 9  ;;  %v1923_v21 = vrot.slane %v8144_v1, 5  ;;  %v1926_v35 = vrot.slane %v8149_v8, 5 }
  0xb3   : > { %v8508_v40 = vcombine.low %v1910_v57, %v1913_v47  ;;  %6645 = vmatmul.mubr.msk.bf16.gmra.mrb[28].mxu1 %vm782_vm3, %v8500_v30  ;;  %6515 = vmatmul.mubr.msk.bf16.vlgmr.msra.gmra.mrb[0].mxu0 %vm782_vm3, %v8151_v9  ;;  %v1917_v45 = vsel %vm8444_vm7, %v5804_v59, %v1916_v42  ;;  %v1918_v53 = vrot.slane %v1916_v42, 4  ;;  %v5806_v50 = vrot.slane %v296_v0, 9  ;;  %v300_v0 = vld [vmem:[%s8055_s9 + $0x6c] sm:$0xe] }
  0xb4   : > { %v1930_v18 = vrot.slane %v8165_v26, 5  ;;  %6650 = vmatprep.mubr.msk.bf16.mxu1 %vm782_vm3, %v8493_v41  ;;  %6518 = vmatprep.mubr.msk.bf16.mxu0 %vm782_vm3, %v8178_v43  ;;  %v1924_v1 = vsel %vm8444_vm7, %v5805_v15, %v1923_v21  ;;  %v1925_v8 = vrot.slane %v1923_v21, 4  ;;  %v1933_v24 = vrot.slane %v8170_v34, 5 }
  0xb5   : > { %v5807_v5 = vrot.slane %v297_v61, 9  ;;  %v1920_v2 = vsel %vm8444_vm7, %v1918_v53, %v1919_v39  ;;  %v1937_v46 = vrot.slane %v8183_v56, 5  ;;  %v1940_v57 = vrot.slane %v8193_v60, 5  ;;  %v301_v60 = vld [vmem:[%s8055_s9 + $0x78] sm:$0xe] }
  0xb6   : > { %v1931_v26 = vsel %vm8444_vm7, %v5806_v50, %v1930_v18  ;;  %v1932_v59 = vrot.slane %v1930_v18, 4  ;;  %v8533_v14 = vcombine.low %v1917_v45, %v1920_v2  ;;  %v1927_v22 = vsel %vm8444_vm7, %v1925_v8, %v1926_v35 }
  0xb7   : > { %v5808_v34 = vrot.slane %v298_v17, 9  ;;  %v8539_v47 = vcombine.low %v1924_v1, %v1927_v22  ;;  %v1938_v39 = vsel %vm8444_vm7, %v5807_v5, %v1937_v46  ;;  %v1939_v56 = vrot.slane %v1937_v46, 4  ;;  %v303_v46 = vld [vmem:[%s8055_s9 + $0x90] sm:$0xe] }
  0xb8   : > { %v1934_v42 = vsel %vm8444_vm7, %v1932_v59, %v1933_v24  ;;  %v1944_v15 = vrot.slane %v8206_v20, 5  ;;  %v1947_v21 = vrot.slane %v8216_v29, 5  ;;  %v5809_v35 = vrot.slane %v299_v62, 9  ;;  %v302_v29 = vld [vmem:[%s8055_s9 + $0x84] sm:$0xe] }
  0xb9   : > { %v8545_v61 = vcombine.low %v1931_v26, %v1934_v42  ;;  %v1941_v45 = vsel %vm8444_vm7, %v1939_v56, %v1940_v57  ;;  %v1951_v53 = vrot.slane %v8227_v49, 5  ;;  %v1954_v50 = vrot.slane %v8232_v58, 5 }
  0xba   : > { %v5810_v18 = vrot.slane %v300_v0, 9  ;;  %v8554_v17 = vcombine.low %v1938_v39, %v1941_v45  ;;  %v1945_v1 = vsel %vm8444_vm7, %v5808_v34, %v1944_v15  ;;  %v1946_v8 = vrot.slane %v1944_v15, 4  ;;  %v305_v15 = vld [vmem:[%s8055_s9 + $0xa8] sm:$0xe] }
  0xbb   : > { %v1958_v20 = vrot.slane %v8252_v32, 5  ;;  %6651 = vmatmul.mubr.msk.bf16.vlgmr.msra.gmra.mrb[0].mxu1 %vm782_vm3, %v8508_v40  ;;  %6519 = vmatmul.mubr.msk.bf16.gmra.mrb[4].mxu0 %vm782_vm3, %v8198_v12  ;;  %v1952_v49 = vsel %vm8444_vm7, %v5809_v35, %v1951_v53  ;;  %v1953_v58 = vrot.slane %v1951_v53, 4  ;;  %v1961_v24 = vrot.slane %v8255_v38, 5 }
  0xbc   : > { %v5811_v5 = vrot.slane %v301_v60, 9  ;;  %6683 = vmatpush3.bf16.msra.mxu1 %v8486_v55  ;;  %6654 = vmatprep.mubr.msk.bf16.mxu1 %vm782_vm3, %v8533_v14  ;;  %v1948_v32 = vsel %vm8444_vm7, %v1946_v8, %v1947_v21  ;;  %v1965_v59 = vrot.slane %v8284_v7, 5  ;;  %v1968_v62 = vrot.slane %v8287_v31, 5 }
  0xbd   : > { %v1959_v2 = vsel %vm8444_vm7, %v5810_v18, %v1958_v20  ;;  %v1960_v26 = vrot.slane %v1958_v20, 4  ;;  %6522 = vmatprep.mubr.msk.bf16.mxu0 %vm782_vm3, %v8229_v52  ;;  %v8578_v38 = vcombine.low %v1945_v1, %v1948_v32  ;;  %v1955_v55 = vsel %vm8444_vm7, %v1953_v58, %v1954_v50  ;;  %7413 = vmatprep.subr.msk.bf16.mxu1 %vm831_vm0, %v8482_v4  ;;  %v306_v18 = vld [vmem:[%s8055_s9 + $0xb4] sm:$0xe]  ;;  %v307_v58 = vld [vmem:[%s8055_s9 + $0xc0] sm:$0xe] }
  0xbe   : > { %v5812_v22 = vrot.slane %v302_v29, 9  ;;  %v8585_v57 = vcombine.low %v1952_v49, %v1955_v55  ;;  %v1966_v34 = vsel %vm8444_vm7, %v5811_v5, %v1965_v59  ;;  %v1967_v0 = vrot.slane %v1965_v59, 4 }
  0xbf   : > { %v1962_v7 = vsel %vm8444_vm7, %v1960_v26, %v1961_v24  ;;  %v1972_v39 = vrot.slane %v8302_v37, 5  ;;  %v1975_v31 = vrot.slane %v8312_v19, 5  ;;  %v5813_v56 = vrot.slane %v303_v46, 9 }
  0xc0   : > { %v8591_v42 = vcombine.low %v1959_v2, %v1962_v7  ;;  %v1969_v21 = vsel %vm8444_vm7, %v1967_v0, %v1968_v62  ;;  %v1979_v35 = vrot.slane %v8324_v3, 5  ;;  %v1982_v60 = vrot.slane %v8337_v48, 5 }
  0xc1   : > { %v8600_v45 = vcombine.low %v1966_v34, %v1969_v21  ;;  %v1973_v53 = vsel %vm8444_vm7, %v5812_v22, %v1972_v39  ;;  %v1974_v50 = vrot.slane %v1972_v39, 4  ;;  %v5815_v1 = vrot.slane %v305_v15, 9  ;;  %v8665_v15 = vld [vmem:[%s8055_s9] sm:$0xf]  ;;  %v8668_v21 = vld [vmem:[%s8055_s9 + $0x4] sm:$0xf] }
  0xc2   : > { %v1980_v37 = vsel %vm8444_vm7, %v5813_v56, %v1979_v35  ;;  %v1981_v19 = vrot.slane %v1979_v35, 4  ;;  %v1993_v48 = vrot.slane %v8371_v25, 5  ;;  %v1996_v29 = vrot.slane %v8381_v44, 5 }
  0xc3   : > { %6655 = vmatmul.mubr.msk.bf16.gmra.mrb[4].mxu1 %vm782_vm3, %v8539_v47  ;;  %6523 = vmatmul.mubr.msk.bf16.gmra.mrb[8].mxu0 %vm782_vm3, %v8249_v23  ;;  %v1976_v3 = vsel %vm8444_vm7, %v1974_v50, %v1975_v31  ;;  %v5816_v49 = vrot.slane %v306_v18, 9  ;;  %v2000_v32 = vrot.slane %v8394_v13, 5  ;;  %v2003_v2 = vrot.slane %v8404_v33, 5  ;;  %v10478_v50 = vld [vmem:[#allocation28_spill] sm:$0xff] }
  0xc4   : > { %6658 = vmatprep.mubr.msk.bf16.mxu1 %vm782_vm3, %v8545_v61  ;;  %6526 = vmatprep.mubr.msk.bf16.mxu0 %vm782_vm3, %v8268_v54  ;;  %v8618_v8 = vcombine.low %v1973_v53, %v1976_v3  ;;  %v1983_v20 = vsel %vm8444_vm7, %v1981_v19, %v1982_v60  ;;  %v1994_v25 = vsel %vm8444_vm7, %v5815_v1, %v1993_v48  ;;  %v1995_v5 = vrot.slane %v1993_v48, 4  ;;  %v10476_v60 = vld [vmem:[#allocation27_spill] sm:$0xff] }
  0xc5   : > { %v8624_v24 = vcombine.low %v1980_v37, %v1983_v20  ;;  %v5785_v26 = vcombine.low %v8448_v16, %v8448_v16  ;;  %v5817_v46 = vrot.slane %v307_v58, 9  ;;  %v2007_v44 = vrot.slane %v8417_v36, 5  ;;  %v10477_v53 = vld [vmem:[#allocation31_spill] sm:$0xff] }
  0xc6   : > { %v1997_v59 = vsel %vm8444_vm7, %v1995_v5, %v1996_v29  ;;  %v2010_v55 = vrot.slane %v8427_v11, 5  ;;  %v2001_v22 = vsel %vm8444_vm7, %v5816_v49, %v2000_v32  ;;  %v2002_v13 = vrot.slane %v2000_v32, 4  ;;  %v10474_v11 = vld [vmem:[#allocation23_spill] sm:$0xff]  ;;  %v10479_v49 = vld [vmem:[#allocation30_spill] sm:$0xff] }
  0xc7   : > { %v8636_v62 = vcombine.low %v1994_v25, %v1997_v59  ;;  %v8640_v33 = vrot.slane %v5785_v26, 2  ;;  %v2008_v7 = vsel %vm8444_vm7, %v5817_v46, %v2007_v44  ;;  %v2009_v34 = vrot.slane %v2007_v44, 4  ;;  %v304_v37 = vld [vmem:[%s8055_s9 + $0x9c] sm:$0xe]  ;;  %v273_v26 = vld [vmem:[%s8055_s9 + $0x8] sm:$0x1] }
  0xc8   : > { %v1287_v0 = vsel %vm831_vm0, %v8448_v16, 0  ;;  %v2004_v36 = vsel %vm8444_vm7, %v2002_v13, %v2003_v2  ;;  %v10475_v16 = vld [vmem:[#allocation25_spill] sm:$0xff]  ;;  %v5784_v35 = vcombine.low %v8665_v15, %v8668_v21  ;;  %v1986_v18 = vrot.slane %v10478_v50, 5  ;;  %v10481_v46 = vld [vmem:[#allocation35_spill] sm:$0xff] }
  0xc9   : > { %6547 = vmatpush3.bf16.msra.mxu0 %v1287_v0  ;;  %v8652_v39 = vcombine.low %v2001_v22, %v2004_v36  ;;  %v2011_v31 = vsel %vm8444_vm7, %v2009_v34, %v2010_v55  ;;  %v1257_v19 = vshrl.u32 %v8665_v15, 16  ;;  %v1260_v1 = vshll.u32 %v8665_v15, 16  ;;  %v10480_v59 = vld [vmem:[#allocation33_spill] sm:$0xff] }
  0xca   : > { %v8660_v56 = vcombine.low %v2008_v7, %v2011_v31  ;;  %7409 = vmatprep.subr.msk.bf16.mxu0 %vm831_vm0, %v8640_v33  ;;  %v1266_v3 = vshll.u32 %v8668_v21, 16  ;;  %v1270_v48 = vshrl.u32 %v8668_v21, 16  ;;  %v5814_v20 = vrot.slane %v304_v37, 9 }
  0xcb   : > { %6659 = vmatmul.mubr.msk.bf16.gmra.mrb[8].mxu1 %vm782_vm3, %v8554_v17  ;;  %6527 = vmatmul.mubr.msk.bf16.gmra.mrb[12].mxu0 %vm782_vm3, %v10474_v11  ;;  %v1988_v29 = vrot.slane %v1986_v18, 4  ;;  %v1989_v58 = vrot.slane %v10479_v49, 5  ;;  %v1259_v25 = vrot.slane %v1257_v19, 4  ;;  %v1262_v5 = vrot.slane %v1260_v1, 5  ;;  %v291_v19 = vld [vmem:[%s8055_s9] sm:$0xe] }
  0xcc   : > { %6662 = vmatprep.mubr.msk.bf16.mxu1 %vm782_vm3, %v8578_v38  ;;  %6530 = vmatprep.mubr.msk.bf16.mxu0 %vm782_vm3, %v10475_v16  ;;  %v1268_v32 = vrot.slane %v1266_v3, 5  ;;  %v1272_v2 = vrot.slane %v1270_v48, 4  ;;  %v1987_v44 = vsel %vm8444_vm7, %v5814_v20, %v1986_v18  ;;  %v1276_v7 = vshll.u32 %v273_v26, 16 }
  0xcd   : > { %v1990_v55 = vsel %vm8444_vm7, %v1988_v29, %v1989_v58  ;;  %v1263_v22 = vor.u32 %v1262_v5, %v1259_v25  ;;  %v2444_v37 = vrot.slane %v8668_v21, 5  ;;  %v5867_v3 = vrot.slane %v291_v19, 9  ;;  %v8727_v58 = vld [vmem:[#allocation5 + $0x10] sm:$0xf]  ;;  %v10484_v21 = vld [vmem:[#allocation16_spill] sm:$0xff]  ;;  %v10493_v19 = vld [vmem:[#allocation29_spill] sm:$0xff] }
  0xce   : > { %v1273_v13 = vor.u32 %v1272_v2, %v1268_v32  ;;  %v8700_v34 = vcombine.low %v1987_v44, %v1990_v55  ;;  %v1278_v31 = vrot.slane %v1276_v7, 5  ;;  %v2447_v20 = vrot.slane %v273_v26, 5  ;;  %v8733_v2 = vld [vmem:[#allocation5 + $0x18] sm:$0xf]  ;;  %v10486_v7 = vld [vmem:[#allocation18_spill] sm:$0xff] }
  0xcf   : > { %v1264_v0 = vrot.slane %v1263_v22, 4  ;;  %v2446_v48 = vrot.slane %v2444_v37, 4  ;;  %v2445_v29 = vsel %vm8444_vm7, %v5867_v3, %v2444_v37  ;;  %v5935_v25 = vcombine.low %v8727_v58, %v8727_v58  ;;  %v10482_v22 = vld [vmem:[#allocation14_spill] sm:$0xff] }
  0xd0   : > { %v1274_v36 = vrot.slane %v1273_v13, 4  ;;  %v6003_v44 = vcombine.low %v8733_v2, %v8733_v2  ;;  %v10483_v13 = vld [vmem:[#allocation15_spill] sm:$0xff]  ;;  %v10492_v37 = vld [vmem:[#allocation26_spill] sm:$0xff]  ;;  %vm3311_vm8 = vcmask 60416   ;;  %vm5524_vm9 = vcmask 24576  }
  0xd1   : > { %v1269_v50 = vsel %vm8096_vm4, %v1264_v0, %v1268_v32  ;;  %v2448_v49 = vsel %vm8444_vm7, %v2446_v48, %v2447_v20  ;;  %v1495_v32 = vsel %vm831_vm0, %v8640_v33, 0  ;;  %v3379_v26 = vrot.slane %v5935_v25, 2  ;;  %v10487_v0 = vld [vmem:[#allocation19_spill] sm:$0xff]  ;;  %v10495_v3 = vld [vmem:[#allocation34_spill] sm:$0xff]  ;;  %v10496_v48 = vld [vmem:[#allocation36_spill] sm:$0xff] }
  0xd2   : > { %v1279_v18 = vsel %vm8096_vm4, %v1274_v36, %v1278_v31  ;;  %v5868_v5 = vcombine.low %v2445_v29, %v2448_v49  ;;  %v2656_v33 = vsel %vm831_vm0, %v8482_v4, 0  ;;  %v4300_v55 = vrot.slane %v6003_v44, 2  ;;  %v10488_v36 = vld [vmem:[#allocation20_spill] sm:$0xff]  ;;  %v10489_v31 = vld [vmem:[#allocation21_spill] sm:$0xff] }
  0xd3   : > { %6663 = vmatmul.mubr.msk.bf16.gmra.mrb[12].mxu1 %vm782_vm3, %v8585_v57  ;;  %6531 = vmatmul.mubr.msk.bf16.gmra.mrb[16].mxu0 %vm782_vm3, %v10476_v60  ;;  %v5767_v1 = vcombine.low %v1269_v50, %v1279_v18  ;;  %v3384_v4 = vsel %vm831_vm0, %v3379_v26, 0  ;;  %v10490_v50 = vld [vmem:[#allocation22_spill] sm:$0xff]  ;;  %v10491_v18 = vld [vmem:[#allocation24_spill] sm:$0xff]  ;;  %v3554_v20 = vsel %vm831_vm0, %v8727_v58, 0  ;;  %v4472_v49 = vsel %vm831_vm0, %v8733_v2, 0 }
  0xd4   : > { %6666 = vmatprep.mubr.msk.bf16.mxu1 %vm782_vm3, %v8591_v42  ;;  %6534 = vmatprep.mubr.msk.bf16.mxu0 %vm782_vm3, %v10477_v53  ;;  %v4302_v15 = vsel %vm831_vm0, %v4300_v55, 0  ;;  %v3346_v29 = vld [vmem:[#allocation5 + $0x14] sm:$0xf] }
  0xd5   : > { %v271_v25 = vld [vmem:[%s8055_s9 + $0xcc] sm:$0xf] }
  0xdb   : > { %6667 = vmatmul.mubr.msk.bf16.gmra.mrb[16].mxu1 %vm782_vm3, %v8600_v45  ;;  %6535 = vmatmul.mubr.msk.bf16.gmra.mrb[20].mxu0 %vm782_vm3, %v10480_v59 }
  0xdc   : > { %6670 = vmatprep.mubr.msk.bf16.mxu1 %vm782_vm3, %v8618_v8  ;;  %6538 = vmatprep.mubr.msk.bf16.mxu0 %vm782_vm3, %v10481_v46 }
  0xe3   : > { %6671 = vmatmul.mubr.msk.bf16.gmra.mrb[20].mxu1 %vm782_vm3, %v8624_v24  ;;  %6539 = vmatmul.mubr.msk.bf16.gmra.mrb[24].mxu0 %vm782_vm3, %v8439_v10 }
  0xe4   : > { %6674 = vmatprep.mubr.msk.bf16.mxu1 %vm782_vm3, %v8700_v34  ;;  %6542 = vmatprep.mubr.msk.bf16.mxu0 %vm782_vm3, %v8461_v63 }
  0xeb   : > { %6675 = vmatmul.mubr.msk.bf16.gmra.mrb[24].mxu1 %vm782_vm3, %v8636_v62  ;;  %6543 = vmatmul.mubr.msk.bf16.gmra.mrb[28].mxu0 %vm782_vm3, %v8500_v30 }
  0xec   : > { %6678 = vmatprep.mubr.msk.bf16.mxu1 %vm782_vm3, %v8652_v39  ;;  %6548 = vmatprep.mubr.msk.bf16.mxu0 %vm782_vm3, %v5767_v1 }
  0xf3   : > { %6679 = vmatmul.mubr.msk.bf16.gmra.mrb[28].mxu1 %vm782_vm3, %v8660_v56  ;;  %6549 = vmatmul.mubr.msk.bf16.vlgmr.msra.gmra.mrb[0].mxu0 %vm782_vm3, %v8125_v51 }
  0xf4   : > { %6684 = vmatprep.mubr.msk.bf16.mxu1 %vm782_vm3, %v5868_v5  ;;  %6552 = vmatprep.mubr.msk.bf16.mxu0 %vm782_vm3, %v8151_v9  ;;  %v8926_v5 = vld [vmem:[%s8055_s9 + $0xd0] sm:$0xf] }
  0xf5   : > { %6581 = vmatpush3.bf16.msra.mxu0 %v1495_v32  ;;  %v3348_v32 = vshrl.u32 %v271_v25, 16  ;;  %v3357_v44 = vshll.u32 %v8926_v5, 16 }
  0xf6   : > { %7414 = vmatprep.subr.msk.bf16.mxu0 %vm831_vm0, %v3379_v26  ;;  %v3361_v26 = vshrl.u32 %v8926_v5, 16 }
  0xfb   : > { %6685 = vmatmul.mubr.msk.bf16.vlgmr.msra.gmra.mrb[0].mxu1 %vm782_vm3, %v8493_v41  ;;  %6553 = vmatmul.mubr.msk.bf16.gmra.mrb[4].mxu0 %vm782_vm3, %v8178_v43 }
  0xfc   : > { %6717 = vmatpush3.bf16.msra.mxu1 %v2656_v33  ;;  %6688 = vmatprep.mubr.msk.bf16.mxu1 %vm782_vm3, %v8508_v40  ;;  %v3350_v33 = vrot.slane %v3348_v32, 4 }
  0xfd   : > { %6556 = vmatprep.mubr.msk.bf16.mxu0 %vm782_vm3, %v8198_v12  ;;  %7418 = vmatprep.subr.msk.bf16.mxu1 %vm831_vm0, %v4300_v55 }
 0x103   : > { %6689 = vmatmul.mubr.msk.bf16.gmra.mrb[4].mxu1 %vm782_vm3, %v8533_v14  ;;  %6557 = vmatmul.mubr.msk.bf16.gmra.mrb[8].mxu0 %vm782_vm3, %v8229_v52 }
 0x104   : > { %6692 = vmatprep.mubr.msk.bf16.mxu1 %vm782_vm3, %v8539_v47  ;;  %6560 = vmatprep.mubr.msk.bf16.mxu0 %vm782_vm3, %v8249_v23 }
 0x10b   : > { %6693 = vmatmul.mubr.msk.bf16.gmra.mrb[8].mxu1 %vm782_vm3, %v8545_v61  ;;  %6561 = vmatmul.mubr.msk.bf16.gmra.mrb[12].mxu0 %vm782_vm3, %v8268_v54 }
 0x10c   : > { %6696 = vmatprep.mubr.msk.bf16.mxu1 %vm782_vm3, %v8554_v17  ;;  %6564 = vmatprep.mubr.msk.bf16.mxu0 %vm782_vm3, %v10474_v11 }
 0x113   : > { %6697 = vmatmul.mubr.msk.bf16.gmra.mrb[12].mxu1 %vm782_vm3, %v8578_v38  ;;  %6565 = vmatmul.mubr.msk.bf16.gmra.mrb[16].mxu0 %vm782_vm3, %v10475_v16 }
 0x114   : > { %6700 = vmatprep.mubr.msk.bf16.mxu1 %vm782_vm3, %v8585_v57  ;;  %6568 = vmatprep.mubr.msk.bf16.mxu0 %vm782_vm3, %v10476_v60 }
 0x11b   : > { %6701 = vmatmul.mubr.msk.bf16.gmra.mrb[16].mxu1 %vm782_vm3, %v8591_v42  ;;  %6569 = vmatmul.mubr.msk.bf16.gmra.mrb[20].mxu0 %vm782_vm3, %v10477_v53 }
 0x11c   : > { %6704 = vmatprep.mubr.msk.bf16.mxu1 %vm782_vm3, %v8600_v45  ;;  %6572 = vmatprep.mubr.msk.bf16.mxu0 %vm782_vm3, %v10480_v59 }
 0x123   : > { %6705 = vmatmul.mubr.msk.bf16.gmra.mrb[20].mxu1 %vm782_vm3, %v8618_v8  ;;  %6573 = vmatmul.mubr.msk.bf16.gmra.mrb[24].mxu0 %vm782_vm3, %v10481_v46 }
 0x124   : > { %6708 = vmatprep.mubr.msk.bf16.mxu1 %vm782_vm3, %v8624_v24  ;;  %6576 = vmatprep.mubr.msk.bf16.mxu0 %vm782_vm3, %v8439_v10 }
 0x12b   : > { %6709 = vmatmul.mubr.msk.bf16.gmra.mrb[24].mxu1 %vm782_vm3, %v8700_v34  ;;  %6577 = vmatmul.mubr.msk.bf16.gmra.mrb[28].mxu0 %vm782_vm3, %v8461_v63 }
 0x12c   : > { %6712 = vmatprep.mubr.msk.bf16.mxu1 %vm782_vm3, %v8636_v62  ;;  %6582 = vmatprep.mubr.msk.bf16.mxu0 %vm782_vm3, %v5784_v35  ;;  %v10485_v35 = vld [vmem:[#allocation17_spill] sm:$0xff] }
 0x133   : > { %6713 = vmatmul.mubr.msk.bf16.gmra.mrb[28].mxu1 %vm782_vm3, %v8652_v39  ;;  %6583 = vmatmul.mubr.msk.bf16.vlgmr.msra.gmra.mrb[0].mxu0 %vm782_vm3, %v10482_v22 }
 0x134   : > { %6718 = vmatprep.mubr.msk.bf16.mxu1 %vm782_vm3, %v5767_v1  ;;  %6586 = vmatprep.mubr.msk.bf16.mxu0 %vm782_vm3, %v10483_v13  ;;  %v10494_v1 = vld [vmem:[#allocation32_spill] sm:$0xff] }
 0x135   : > { %6751 = vmatpush3.bf16.msra.mxu0 %v3384_v4  ;;  %v3359_v4 = vrot.slane %v3357_v44, 5 }
 0x136   : > { %7415 = vmatprep.subr.msk.bf16.mxu0 %vm831_vm0, %v8727_v58  ;;  %v8888_v58 = vld [vmem:[#allocation5 + $0x1c] sm:$0xf] }
 0x137   : > { %v6053_v27 = vcombine.low %v8888_v58, %v8888_v58 }
 0x13b   : > { %6719 = vmatmul.mubr.msk.bf16.vlgmr.msra.gmra.mrb[0].mxu1 %vm782_vm3, %v8125_v51  ;;  %6587 = vmatmul.mubr.msk.bf16.gmra.mrb[4].mxu0 %vm782_vm3, %v10484_v21 }
 0x13c   : > { %6887 = vmatpush3.bf16.msra.mxu1 %v4302_v15  ;;  %6722 = vmatprep.mubr.msk.bf16.mxu1 %vm782_vm3, %v8151_v9  ;;  %v3363_v15 = vrot.slane %v3361_v26, 4 }
 0x13d   : > { %6590 = vmatprep.mubr.msk.bf16.mxu0 %vm782_vm3, %v10485_v35  ;;  %7419 = vmatprep.subr.msk.bf16.mxu1 %vm831_vm0, %v8733_v2  ;;  %v3351_v2 = vshll.u32 %v271_v25, 16 }
 0x13f   : > { %v3353_v55 = vrot.slane %v3351_v2, 5  ;;  %v5934_v2 = vcombine.low %v271_v25, %v8926_v5  ;;  %v5985_v25 = vcombine.low %v3346_v29, %v3346_v29 }
 0x143   : > { %6723 = vmatmul.mubr.msk.bf16.gmra.mrb[4].mxu1 %vm782_vm3, %v8178_v43  ;;  %6591 = vmatmul.mubr.msk.bf16.gmra.mrb[8].mxu0 %vm782_vm3, %v10486_v7 }
 0x144   : > { %6726 = vmatprep.mubr.msk.bf16.mxu1 %vm782_vm3, %v8198_v12  ;;  %6594 = vmatprep.mubr.msk.bf16.mxu0 %vm782_vm3, %v10487_v0 }
 0x14b   : > { %6727 = vmatmul.mubr.msk.bf16.gmra.mrb[8].mxu1 %vm782_vm3, %v8229_v52  ;;  %6595 = vmatmul.mubr.msk.bf16.gmra.mrb[12].mxu0 %vm782_vm3, %v10488_v36 }
 0x14c   : > { %6730 = vmatprep.mubr.msk.bf16.mxu1 %vm782_vm3, %v8249_v23  ;;  %6598 = vmatprep.mubr.msk.bf16.mxu0 %vm782_vm3, %v10489_v31 }
 0x153   : > { %6731 = vmatmul.mubr.msk.bf16.gmra.mrb[12].mxu1 %vm782_vm3, %v8268_v54  ;;  %6599 = vmatmul.mubr.msk.bf16.gmra.mrb[16].mxu0 %vm782_vm3, %v10490_v50 }
 0x154   : > { %6734 = vmatprep.mubr.msk.bf16.mxu1 %vm782_vm3, %v10474_v11  ;;  %6602 = vmatprep.mubr.msk.bf16.mxu0 %vm782_vm3, %v10491_v18 }
 0x15b   : > { %6735 = vmatmul.mubr.msk.bf16.gmra.mrb[16].mxu1 %vm782_vm3, %v10475_v16  ;;  %6603 = vmatmul.mubr.msk.bf16.gmra.mrb[20].mxu0 %vm782_vm3, %v10492_v37 }
 0x15c   : > { %6738 = vmatprep.mubr.msk.bf16.mxu1 %vm782_vm3, %v10476_v60  ;;  %6606 = vmatprep.mubr.msk.bf16.mxu0 %vm782_vm3, %v10493_v19 }
 0x163   : > { %6739 = vmatmul.mubr.msk.bf16.gmra.mrb[20].mxu1 %vm782_vm3, %v10477_v53  ;;  %6607 = vmatmul.mubr.msk.bf16.gmra.mrb[24].mxu0 %vm782_vm3, %v10494_v1 }
 0x164   : > { %6742 = vmatprep.mubr.msk.bf16.mxu1 %vm782_vm3, %v10480_v59  ;;  %6610 = vmatprep.mubr.msk.bf16.mxu0 %vm782_vm3, %v10495_v3 }
 0x16b   : > { %6743 = vmatmul.mubr.msk.bf16.gmra.mrb[24].mxu1 %vm782_vm3, %v10481_v46  ;;  %6611 = vmatmul.mubr.msk.bf16.gmra.mrb[28].mxu0 %vm782_vm3, %v10496_v48 }
 0x16c   : > { %6746 = vmatprep.mubr.msk.bf16.mxu1 %vm782_vm3, %v8439_v10  ;;  %6752 = vmatprep.mubr.msk.bf16.mxu0 %vm782_vm3, %v10483_v13 }
 0x173   : > { %6747 = vmatmul.mubr.msk.bf16.gmra.mrb[28].mxu1 %vm782_vm3, %v8461_v63  ;;  %6753 = vmatmul.mubr.msk.bf16.vlgmr.msra.gmra.mrb[32].mxu0 %vm782_vm3, %v10484_v21 }
 0x174   : > { %6888 = vmatprep.mubr.msk.bf16.mxu1 %vm782_vm3, %v8151_v9  ;;  %6756 = vmatprep.mubr.msk.bf16.mxu0 %vm782_vm3, %v10485_v35 }
 0x175   : > { %6785 = vmatpush3.bf16.msra.mxu0 %v3554_v20  ;;  %v8939_v20 = vld [vmem:[%s8055_s9 + $0xd4] sm:$0x1] }
 0x176   : > { %7416 = vmatprep.subr.msk.bf16.mxu0 %vm831_vm0, %v3346_v29  ;;  %v3367_v32 = vshll.u32 %v8939_v20, 16 }
 0x17b   : > { %6889 = vmatmul.mubr.msk.bf16.vlgmr.msra.gmra.mrb[32].mxu1 %vm782_vm3, %v8178_v43  ;;  %6757 = vmatmul.mubr.msk.bf16.gmra.mrb[36].mxu0 %vm782_vm3, %v10486_v7 }
 0x17c   : > { %6921 = vmatpush3.bf16.msra.mxu1 %v4472_v49  ;;  %6892 = vmatprep.mubr.msk.bf16.mxu1 %vm782_vm3, %v8198_v12  ;;  %v3354_v49 = vor.u32 %v3353_v55, %v3350_v33  ;;  %v3916_v55 = vrot.slane %v5985_v25, 2 }
 0x17d   : > { %6760 = vmatprep.mubr.msk.bf16.mxu0 %vm782_vm3, %v10487_v0  ;;  %7420 = vmatprep.subr.msk.bf16.mxu1 %vm831_vm0, %v8888_v58 }
 0x17e   : > { %v3355_v26 = vrot.slane %v3354_v49, 4 }
 0x183   : > { %6893 = vmatmul.mubr.msk.bf16.gmra.mrb[36].mxu1 %vm782_vm3, %v8229_v52  ;;  %6761 = vmatmul.mubr.msk.bf16.gmra.mrb[40].mxu0 %vm782_vm3, %v10488_v36 }
 0x184   : > { %6896 = vmatprep.mubr.msk.bf16.mxu1 %vm782_vm3, %v8249_v23  ;;  %6764 = vmatprep.mubr.msk.bf16.mxu0 %vm782_vm3, %v10489_v31 }
 0x18b   : > { %6897 = vmatmul.mubr.msk.bf16.gmra.mrb[40].mxu1 %vm782_vm3, %v8268_v54  ;;  %6765 = vmatmul.mubr.msk.bf16.gmra.mrb[44].mxu0 %vm782_vm3, %v10490_v50 }
 0x18c   : > { %6900 = vmatprep.mubr.msk.bf16.mxu1 %vm782_vm3, %v10474_v11  ;;  %6768 = vmatprep.mubr.msk.bf16.mxu0 %vm782_vm3, %v10491_v18 }
 0x193   : > { %6901 = vmatmul.mubr.msk.bf16.gmra.mrb[44].mxu1 %vm782_vm3, %v10475_v16  ;;  %6769 = vmatmul.mubr.msk.bf16.gmra.mrb[48].mxu0 %vm782_vm3, %v10492_v37 }
 0x194   : > { %6904 = vmatprep.mubr.msk.bf16.mxu1 %vm782_vm3, %v10476_v60  ;;  %6772 = vmatprep.mubr.msk.bf16.mxu0 %vm782_vm3, %v10493_v19 }
 0x19b   : > { %6905 = vmatmul.mubr.msk.bf16.gmra.mrb[48].mxu1 %vm782_vm3, %v10477_v53  ;;  %6773 = vmatmul.mubr.msk.bf16.gmra.mrb[52].mxu0 %vm782_vm3, %v10494_v1  ;;  %v3369_v1 = vrot.slane %v3367_v32, 5  ;;  %v4295_v32 = vrot.slane %v8939_v20, 5  ;;  %v3918_v20 = vsel %vm831_vm0, %v3916_v55, 0 }
 0x19c   : > { %6908 = vmatprep.mubr.msk.bf16.mxu1 %vm782_vm3, %v10480_v59  ;;  %6776 = vmatprep.mubr.msk.bf16.mxu0 %vm782_vm3, %v10495_v3  ;;  %v3364_v3 = vor.u32 %v3363_v15, %v3359_v4  ;;  %v3718_v15 = vsel %vm831_vm0, %v3346_v29, 0  ;;  %v4292_v29 = vrot.slane %v8926_v5, 5 }
 0x19e   : > { %v3365_v44 = vrot.slane %v3364_v3, 4  ;;  %v4294_v49 = vrot.slane %v4292_v29, 4 }
 0x1a0   : > { %v3370_v33 = vsel %vm8096_vm4, %v3365_v44, %v3369_v1  ;;  %v4636_v1 = vsel %vm831_vm0, %v8888_v58, 0  ;;  %v308_v58 = vld [vmem:[%s8055_s9 + $0xcc] sm:$0xe] }
 0x1a3   : > { %6909 = vmatmul.mubr.msk.bf16.gmra.mrb[52].mxu1 %vm782_vm3, %v10481_v46  ;;  %6777 = vmatmul.mubr.msk.bf16.gmra.mrb[56].mxu0 %vm782_vm3, %v10496_v48 }
 0x1a4   : > { %6912 = vmatprep.mubr.msk.bf16.mxu1 %vm782_vm3, %v8439_v10  ;;  %6780 = vmatprep.mubr.msk.bf16.mxu0 %vm782_vm3, %v8436_v28  ;;  %v3360_v28 = vsel %vm8096_vm4, %v3355_v26, %v3359_v4  ;;  %v6002_v4 = vrot.slane %v308_v58, 9  ;;  %v4296_v26 = vsel %vm8444_vm7, %v4294_v49, %v4295_v32 }
 0x1a5   : > { %v5952_v3 = vcombine.low %v3360_v28, %v3370_v33  ;;  %v4834_v28 = vrot.slane %v6053_v27, 2 }
 0x1a7   : > { %v4836_v6 = vsel %vm831_vm0, %v4834_v28, 0 }
 0x1ab   : > { %6913 = vmatmul.mubr.msk.bf16.gmra.mrb[56].mxu1 %vm782_vm3, %v8461_v63  ;;  %6781 = vmatmul.mubr.msk.bf16.gmra.mrb[60].mxu0 %vm782_vm3, %v5934_v2  ;;  %v4293_v2 = vsel %vm8444_vm7, %v6002_v4, %v4292_v29 }
 0x1ac   : > { %6916 = vmatprep.mubr.msk.bf16.mxu1 %vm782_vm3, %v8500_v30  ;;  %6786 = vmatprep.mubr.msk.bf16.mxu0 %vm782_vm3, %v8151_v9  ;;  %v6020_v5 = vcombine.low %v4293_v2, %v4296_v26 }
 0x1b3   : > { %6917 = vmatmul.mubr.msk.bf16.gmra.mrb[60].mxu1 %vm782_vm3, %v5952_v3  ;;  %6787 = vmatmul.mubr.msk.bf16.vlgmr.msra.gmra.mrb[32].mxu0 %vm782_vm3, %v8178_v43 }
 0x1b4   : > { %6922 = vmatprep.mubr.msk.bf16.mxu1 %vm782_vm3, %v8508_v40  ;;  %6790 = vmatprep.mubr.msk.bf16.mxu0 %vm782_vm3, %v8198_v12 }
 0x1b5   : > { %6819 = vmatpush3.bf16.msra.mxu0 %v3718_v15 }
 0x1b6   : > { %7417 = vmatprep.subr.msk.bf16.mxu0 %vm831_vm0, %v3916_v55 }
 0x1bb   : > { %6923 = vmatmul.mubr.msk.bf16.vlgmr.msra.gmra.mrb[32].mxu1 %vm782_vm3, %v8533_v14  ;;  %6791 = vmatmul.mubr.msk.bf16.gmra.mrb[36].mxu0 %vm782_vm3, %v8229_v52 }
 0x1bc   : > { %6955 = vmatpush3.bf16.msra.mxu1 %v4636_v1  ;;  %6926 = vmatprep.mubr.msk.bf16.mxu1 %vm782_vm3, %v8539_v47 }
 0x1bd   : > { %6794 = vmatprep.mubr.msk.bf16.mxu0 %vm782_vm3, %v8249_v23  ;;  %7421 = vmatprep.subr.msk.bf16.mxu1 %vm831_vm0, %v4834_v28 }
 0x1c3   : > { %6927 = vmatmul.mubr.msk.bf16.gmra.mrb[36].mxu1 %vm782_vm3, %v8545_v61  ;;  %6795 = vmatmul.mubr.msk.bf16.gmra.mrb[40].mxu0 %vm782_vm3, %v8268_v54 }
 0x1c4   : > { %6930 = vmatprep.mubr.msk.bf16.mxu1 %vm782_vm3, %v8554_v17  ;;  %6798 = vmatprep.mubr.msk.bf16.mxu0 %vm782_vm3, %v10474_v11 }
 0x1cb   : > { %6931 = vmatmul.mubr.msk.bf16.gmra.mrb[40].mxu1 %vm782_vm3, %v8578_v38  ;;  %6799 = vmatmul.mubr.msk.bf16.gmra.mrb[44].mxu0 %vm782_vm3, %v10475_v16 }
 0x1cc   : > { %6934 = vmatprep.mubr.msk.bf16.mxu1 %vm782_vm3, %v8585_v57  ;;  %6802 = vmatprep.mubr.msk.bf16.mxu0 %vm782_vm3, %v10476_v60 }
 0x1d3   : > { %6935 = vmatmul.mubr.msk.bf16.gmra.mrb[44].mxu1 %vm782_vm3, %v8591_v42  ;;  %6803 = vmatmul.mubr.msk.bf16.gmra.mrb[48].mxu0 %vm782_vm3, %v10477_v53 }
 0x1d4   : > { %6938 = vmatprep.mubr.msk.bf16.mxu1 %vm782_vm3, %v8600_v45  ;;  %6806 = vmatprep.mubr.msk.bf16.mxu0 %vm782_vm3, %v10480_v59 }
 0x1db   : > { %6939 = vmatmul.mubr.msk.bf16.gmra.mrb[48].mxu1 %vm782_vm3, %v8618_v8  ;;  %6807 = vmatmul.mubr.msk.bf16.gmra.mrb[52].mxu0 %vm782_vm3, %v10481_v46 }
 0x1dc   : > { %6942 = vmatprep.mubr.msk.bf16.mxu1 %vm782_vm3, %v8624_v24  ;;  %6810 = vmatprep.mubr.msk.bf16.mxu0 %vm782_vm3, %v8439_v10 }
 0x1e3   : > { %6943 = vmatmul.mubr.msk.bf16.gmra.mrb[52].mxu1 %vm782_vm3, %v8700_v34  ;;  %6811 = vmatmul.mubr.msk.bf16.gmra.mrb[56].mxu0 %vm782_vm3, %v8461_v63 }
 0x1e4   : > { %6946 = vmatprep.mubr.msk.bf16.mxu1 %vm782_vm3, %v8636_v62  ;;  %6814 = vmatprep.mubr.msk.bf16.mxu0 %vm782_vm3, %v8500_v30 }
 0x1eb   : > { %6947 = vmatmul.mubr.msk.bf16.gmra.mrb[56].mxu1 %vm782_vm3, %v8652_v39  ;;  %6815 = vmatmul.mubr.msk.bf16.gmra.mrb[60].mxu0 %vm782_vm3, %v5952_v3 }
 0x1ec   : > { %6950 = vmatprep.mubr.msk.bf16.mxu1 %vm782_vm3, %v8660_v56  ;;  %6820 = vmatprep.mubr.msk.bf16.mxu0 %vm782_vm3, %v8125_v51 }
 0x1f3   : > { %6951 = vmatmul.mubr.msk.bf16.gmra.mrb[60].mxu1 %vm782_vm3, %v6020_v5  ;;  %6821 = vmatmul.mubr.msk.bf16.vlgmr.msra.gmra.mrb[32].mxu0 %vm782_vm3, %v8151_v9 }
 0x1f4   : > { %6956 = vmatprep.mubr.msk.bf16.mxu1 %vm782_vm3, %v8493_v41  ;;  %6824 = vmatprep.mubr.msk.bf16.mxu0 %vm782_vm3, %v8178_v43 }
 0x1f5   : > { %6853 = vmatpush3.bf16.msra.mxu0 %v3918_v20 }
 0x1fb   : > { %6957 = vmatmul.mubr.msk.bf16.vlgmr.msra.gmra.mrb[32].mxu1 %vm782_vm3, %v8508_v40  ;;  %6825 = vmatmul.mubr.msk.bf16.gmra.mrb[36].mxu0 %vm782_vm3, %v8198_v12 }
 0x1fc   : > { %6989 = vmatpush3.bf16.msra.mxu1 %v4836_v6  ;;  %6960 = vmatprep.mubr.msk.bf16.mxu1 %vm782_vm3, %v8533_v14 }
 0x1fd   : > { %6828 = vmatprep.mubr.msk.bf16.mxu0 %vm782_vm3, %v8229_v52 }
 0x203   : > { %6961 = vmatmul.mubr.msk.bf16.gmra.mrb[36].mxu1 %vm782_vm3, %v8539_v47  ;;  %6829 = vmatmul.mubr.msk.bf16.gmra.mrb[40].mxu0 %vm782_vm3, %v8249_v23 }
 0x204   : > { %6964 = vmatprep.mubr.msk.bf16.mxu1 %vm782_vm3, %v8545_v61  ;;  %6832 = vmatprep.mubr.msk.bf16.mxu0 %vm782_vm3, %v8268_v54 }
 0x206   : > { %v9063_v41 = vpop.f32.mrb[0].mxu0 }
 0x207   : > { %10497 = vst [vmem:[#allocation23_spill] sm:$0xff] %v9063_v41  ;;  %v9065_v40 = vpop.f32.mrb[1].mxu0  ;;  %v1762_v47 = vmul.f32 %v9063_v41, %v9063_v41  ;;  %v1693_v15 = vsel %vm782_vm3, %v9063_v41, 0.0 }
 0x208   : > { %10498 = vst [vmem:[#allocation25_spill] sm:$0xff] %v9065_v40  ;;  %v1760_v14 = vmul.f32 %v9065_v40, %v9065_v40  ;;  %v9069_v44 = vpop.f32.mrb[2].mxu0  ;;  %v1690_v61 = vsel %vm782_vm3, %v9065_v40, 0.0 }
 0x209   : > { %10499 = vst [vmem:[#allocation27_spill] sm:$0xff] %v9069_v44  ;;  %v9071_v33 = vpop.f32.mrb[3].mxu0  ;;  %v1763_v28 = vmul.f32 %v9069_v44, %v9069_v44  ;;  %v1795_v58 = vsel %vm782_vm3, %v1762_v47, 0.0  ;;  %v1695_v32 = vsel %vm782_vm3, %v9069_v44, 0.0 }
 0x20a   : > { %10500 = vst [vmem:[#allocation28_spill] sm:$0xff] %v9071_v33  ;;  %v1691_v25 = vsel %vm782_vm3, %v9071_v33, 0.0  ;;  %v1761_v3 = vmul.f32 %v9071_v33, %v9071_v33  ;;  %v1792_v27 = vsel %vm782_vm3, %v1760_v14, 0.0 }
 0x20b   : > { %6965 = vmatmul.mubr.msk.bf16.gmra.mrb[40].mxu1 %vm782_vm3, %v8554_v17  ;;  %v1692_v55 = vadd.f32 %v1691_v25, %v1690_v61  ;;  %6833 = vmatmul.mubr.msk.bf16.gmra.mrb[44].mxu0 %vm782_vm3, %v10474_v11  ;;  %v1797_v20 = vsel %vm782_vm3, %v1763_v28, 0.0 }
 0x20c   : > { %v1793_v1 = vsel %vm782_vm3, %v1761_v3, 0.0  ;;  %6968 = vmatprep.mubr.msk.bf16.mxu1 %vm782_vm3, %v8578_v38  ;;  %6836 = vmatprep.mubr.msk.bf16.mxu0 %vm782_vm3, %v10475_v16 }
 0x20d   : > { %v1694_v17 = vadd.f32 %v1693_v15, %v1692_v55  ;;  %v1794_v29 = vadd.f32 %v1793_v1, %v1792_v27 }
 0x20e   : > { %v6720_v4 = vpop.f32.mrb[0].mxu1  ;;  %v9096_v49 = vpop.f32.mrb[4].mxu0 }
 0x20f   : > { %10501 = vst [vmem:[#allocation30_spill] sm:$0xff] %v9096_v49  ;;  %v1796_v2 = vadd.f32 %v1795_v58, %v1794_v29  ;;  %v2692_v26 = vpop.f32.mrb[1].mxu1  ;;  %v9100_v5 = vpop.f32.mrb[5].mxu0  ;;  %v1696_v14 = vadd.f32 %v1695_v32, %v1694_v17  ;;  %v2854_v25 = vsel %vm782_vm3, %v6720_v4, 0.0  ;;  %v2923_v47 = vmul.f32 %v6720_v4, %v6720_v4 }
 0x210   : > { %10502 = vst [vmem:[#allocation33_spill] sm:$0xff] %v9100_v5  ;;  %v2921_v38 = vmul.f32 %v2692_v26, %v2692_v26  ;;  %v6721_v6 = vpop.f32.mrb[2].mxu1  ;;  %v9103_v61 = vpop.f32.mrb[6].mxu0  ;;  %v1701_v55 = vsel %vm782_vm3, %v9096_v49, 0.0  ;;  %v2851_v1 = vsel %vm782_vm3, %v2692_v26, 0.0 }
 0x211   : > { %v2695_v3 = vpop.f32.mrb[3].mxu1  ;;  %v7507_v15 = vpack.i.bf16 %v6721_v6, %v6720_v4  ;;  %v9108_v27 = vpop.f32.mrb[7].mxu0  ;;  %v2924_v32 = vmul.f32 %v6721_v6, %v6721_v6  ;;  %v1697_v4 = vsel %vm782_vm3, %v9100_v5, 0.0 }
 0x212   : > { %10503 = vst [vmem:[#allocation35_spill] sm:$0xff] %v9108_v27  ;;  %v7512_v29 = vpack.i.bf16 %v2695_v3, %v2692_v26  ;;  %v2852_v28 = vsel %vm782_vm3, %v2695_v3, 0.0  ;;  %v2922_v58 = vmul.f32 %v2695_v3, %v2695_v3  ;;  %v2953_v17 = vsel %vm782_vm3, %v2921_v38, 0.0 }
 0x213   : > { %v2853_v33 = vadd.f32 %v2852_v28, %v2851_v1  ;;  %6969 = vmatmul.mubr.msk.bf16.gmra.mrb[44].mxu1 %vm782_vm3, %v8585_v57  ;;  %7508 = vrot.lane.b32.xlu0 %v7507_v15, %s7875_s20  ;;  %v1698_v44 = vadd.f32 %v1697_v4, %v1696_v14  ;;  %v1764_v26 = vmul.f32 %v9100_v5, %v9100_v5  ;;  %v2956_v57 = vsel %vm782_vm3, %v2923_v47, 0.0 }
 0x214   : > { %v2954_v40 = vsel %vm782_vm3, %v2922_v58, 0.0  ;;  %v1798_v3 = vadd.f32 %v1797_v20, %v1796_v2  ;;  %6837 = vmatmul.mubr.msk.bf16.gmra.mrb[48].mxu0 %vm782_vm3, %v10476_v60  ;;  %6972 = vmatprep.mubr.msk.bf16.mxu1 %vm782_vm3, %v8591_v42  ;;  %v1766_v1 = vmul.f32 %v9096_v49, %v9096_v49  ;;  %v2856_v14 = vsel %vm782_vm3, %v6721_v6, 0.0 }
 0x215   : > { %v2855_v38 = vadd.f32 %v2854_v25, %v2853_v33  ;;  %v2955_v15 = vadd.f32 %v2954_v40, %v2953_v17  ;;  %6840 = vmatprep.mubr.msk.bf16.mxu0 %vm782_vm3, %v10477_v53  ;;  %v1799_v2 = vsel %vm782_vm3, %v1764_v26, 0.0  ;;  %v1699_v20 = vsel %vm782_vm3, %v9108_v27, 0.0 }
 0x216   : > { %v1765_v42 = vmul.f32 %v9108_v27, %v9108_v27  ;;  %v6724_v28 = vpop.f32.mrb[4].mxu1  ;;  %v9136_v47 = vpop.f32.mrb[8].mxu0  ;;  %v1800_v33 = vadd.f32 %v1799_v2, %v1798_v3  ;;  %v1767_v25 = vmul.f32 %v9103_v61, %v9103_v61  ;;  %v1700_v58 = vadd.f32 %v1699_v20, %v1698_v44 }
 0x217   : > { %10504 = vst [vmem:[#allocation14_spill] sm:$0xff] %v9136_v47  ;;  %v2957_v40 = vadd.f32 %v2956_v57, %v2955_v15  ;;  %7513 = vrot.lane.b32.xlu0 %v7512_v29, %s7875_s20  ;;  %v9141_v6 = vpop.f32.mrb[5].mxu1  ;;  %v9143_v17 = vpop.f32.mrb[9].mxu0  ;;  %v2958_v4 = vsel %vm782_vm3, %v2924_v32, 0.0  ;;  %v2927_v27 = vmul.f32 %v6724_v28, %v6724_v28  ;;  %v2857_v5 = vadd.f32 %v2856_v14, %v2855_v38 }
 0x218   : > { %10505 = vst [vmem:[#allocation15_spill] sm:$0xff] %v9143_v17  ;;  %v1801_v26 = vsel %vm782_vm3, %v1765_v42, 0.0  ;;  %v6725_v49 = vpop.f32.mrb[6].mxu1  ;;  %v9147_v41 = vpop.f32.mrb[10].mxu0  ;;  %v1702_v3 = vadd.f32 %v1701_v55, %v1700_v58  ;;  %v2858_v44 = vsel %vm782_vm3, %v9141_v6, 0.0  ;;  %v2925_v29 = vmul.f32 %v9141_v6, %v9141_v6 }
 0x219   : > { %v1802_v57 = vadd.f32 %v1801_v26, %v1800_v33  ;;  %v2711_v15 = vpop.f32.mrb[7].mxu1  ;;  %v9153_v2 = vpop.f32.mrb[11].mxu0  ;;  %v1803_v32 = vsel %vm782_vm3, %v1766_v1, 0.0  ;;  %v1703_v20 = vsel %vm782_vm3, %v9103_v61, 0.0  ;;  %v2859_v38 = vadd.f32 %v2858_v44, %v2857_v5 }
 0x21a   : > { %10506 = vst [vmem:[#allocation16_spill] sm:$0xff] %v9153_v2  ;;  %v2959_v14 = vadd.f32 %v2958_v4, %v2957_v40  ;;  %v1805_v42 = vsel %vm782_vm3, %v1767_v25, 0.0  ;;  %v2960_v33 = vsel %vm782_vm3, %v2925_v29, 0.0  ;;  %v7522_v58 = vpack.i.bf16 %v2711_v15, %v9141_v6 }
 0x21b   : > { %v1804_v55 = vadd.f32 %v1803_v32, %v1802_v57  ;;  %6973 = vmatmul.mubr.msk.bf16.gmra.mrb[48].mxu1 %vm782_vm3, %v8600_v45  ;;  %v2862_v26 = vsel %vm782_vm3, %v6724_v28, 0.0  ;;  %v2860_v1 = vsel %vm782_vm3, %v2711_v15, 0.0  ;;  %v2926_v53 = vmul.f32 %v2711_v15, %v2711_v15 }
 0x21c   : > { %v2961_v48 = vadd.f32 %v2960_v33, %v2959_v14  ;;  %6841 = vmatmul.mubr.msk.bf16.gmra.mrb[52].mxu0 %vm782_vm3, %v10480_v59  ;;  %6976 = vmatprep.mubr.msk.bf16.mxu1 %vm782_vm3, %v8618_v8  ;;  %v2964_v5 = vsel %vm782_vm3, %v2927_v27, 0.0  ;;  %v2928_v40 = vmul.f32 %v6725_v49, %v6725_v49  ;;  %v2861_v25 = vadd.f32 %v2860_v1, %v2859_v38 }
 0x21d   : > { %v7517_v6 = vpack.i.bf16 %v6725_v49, %v6724_v28  ;;  %6844 = vmatprep.mubr.msk.bf16.mxu0 %vm782_vm3, %v10481_v46  ;;  %v2962_v45 = vsel %vm782_vm3, %v2926_v53, 0.0  ;;  %v1704_v4 = vadd.f32 %v1703_v20, %v1702_v3  ;;  %v1705_v57 = vsel %vm782_vm3, %v9143_v17, 0.0 }
 0x21e   : > { %v1768_v44 = vmul.f32 %v9143_v17, %v9143_v17  ;;  %v6728_v29 = vpop.f32.mrb[8].mxu1  ;;  %v9177_v15 = vpop.f32.mrb[12].mxu0  ;;  %v2864_v8 = vsel %vm782_vm3, %v6725_v49, 0.0  ;;  %v2863_v27 = vadd.f32 %v2862_v26, %v2861_v25  ;;  %v2963_v32 = vadd.f32 %v2962_v45, %v2961_v48 }
 0x21f   : > { %10507 = vst [vmem:[#allocation17_spill] sm:$0xff] %v9177_v15  ;;  %7518 = vrot.lane.b32.xlu1 %v7517_v6, %s7875_s20  ;;  %v1806_v28 = vadd.f32 %v1805_v42, %v1804_v55  ;;  %v2724_v38 = vpop.f32.mrb[9].mxu1  ;;  %v9181_v14 = vpop.f32.mrb[13].mxu0  ;;  %v1709_v53 = vsel %vm782_vm3, %v9136_v47, 0.0  ;;  %v1770_v3 = vmul.f32 %v9136_v47, %v9136_v47  ;;  %v1706_v20 = vadd.f32 %v1705_v57, %v1704_v4 }
 0x220   : > { %10508 = vst [vmem:[#allocation18_spill] sm:$0xff] %v9181_v14  ;;  %v1807_v33 = vsel %vm782_vm3, %v1768_v44, 0.0  ;;  %v6729_v1 = vpop.f32.mrb[10].mxu1  ;;  %v9188_v17 = vpop.f32.mrb[14].mxu0  ;;  %v2965_v49 = vadd.f32 %v2964_v5, %v2963_v32  ;;  %v1707_v42 = vsel %vm782_vm3, %v9153_v2, 0.0  ;;  %v1769_v55 = vmul.f32 %v9153_v2, %v9153_v2 }
 0x221   : > { %10509 = vst [vmem:[#allocation19_spill] sm:$0xff] %v9188_v17  ;;  %v1808_v48 = vadd.f32 %v1807_v33, %v1806_v28  ;;  %v2727_v26 = vpop.f32.mrb[11].mxu1  ;;  %v9194_v25 = vpop.f32.mrb[15].mxu0  ;;  %v2966_v6 = vsel %vm782_vm3, %v2928_v40, 0.0  ;;  %v1771_v45 = vmul.f32 %v9147_v41, %v9147_v41  ;;  %v1708_v4 = vadd.f32 %v1707_v42, %v1706_v20 }
 0x222   : > { %10510 = vst [vmem:[#allocation20_spill] sm:$0xff] %v9194_v25  ;;  %v2931_v57 = vmul.f32 %v6728_v29, %v6728_v29  ;;  %v1809_v44 = vsel %vm782_vm3, %v1769_v55, 0.0  ;;  %v2865_v5 = vadd.f32 %v2864_v8, %v2863_v27  ;;  %v2866_v32 = vsel %vm782_vm3, %v2724_v38, 0.0 }
 0x223   : > { %7523 = vrot.lane.b32.xlu1 %v7522_v58, %s7875_s20  ;;  %v2929_v28 = vmul.f32 %v2724_v38, %v2724_v38  ;;  %6977 = vmatmul.mubr.msk.bf16.gmra.mrb[52].mxu1 %vm782_vm3, %v8624_v24  ;;  %v1811_v33 = vsel %vm782_vm3, %v1770_v3, 0.0  ;;  %v1710_v2 = vadd.f32 %v1709_v53, %v1708_v4  ;;  %v1810_v40 = vadd.f32 %v1809_v44, %v1808_v48 }
 0x224   : > { %v2967_v47 = vadd.f32 %v2966_v6, %v2965_v49  ;;  %6845 = vmatmul.mubr.msk.bf16.gmra.mrb[56].mxu0 %vm782_vm3, %v8439_v10  ;;  %6980 = vmatprep.mubr.msk.bf16.mxu1 %vm782_vm3, %v8700_v34  ;;  %v1711_v58 = vsel %vm782_vm3, %v9147_v41, 0.0  ;;  %v2867_v8 = vadd.f32 %v2866_v32, %v2865_v5  ;;  %v7527_v20 = vpack.i.bf16 %v6729_v1, %v6728_v29 }
 0x225   : > { %v2968_v27 = vsel %vm782_vm3, %v2929_v28, 0.0  ;;  %6848 = vmatprep.mubr.msk.bf16.mxu0 %vm782_vm3, %v8461_v63  ;;  %v1813_v24 = vsel %vm782_vm3, %v1771_v45, 0.0  ;;  %v1812_v53 = vadd.f32 %v1811_v33, %v1810_v40  ;;  %v7532_v49 = vpack.i.bf16 %v2727_v26, %v2724_v38 }
 0x226   : > { %v2969_v3 = vadd.f32 %v2968_v27, %v2967_v47  ;;  %v9215_v48 = vpop.f32.mrb[12].mxu1  ;;  %v9217_v42 = vpop.f32.mrb[16].mxu0  ;;  %v2870_v34 = vsel %vm782_vm3, %v6728_v29, 0.0  ;;  %v2972_v55 = vsel %vm782_vm3, %v2931_v57, 0.0  ;;  %v2868_v6 = vsel %vm782_vm3, %v2727_v26, 0.0 }
 0x227   : > { %10511 = vst [vmem:[#allocation21_spill] sm:$0xff] %v9217_v42  ;;  %v2930_v4 = vmul.f32 %v2727_v26, %v2727_v26  ;;  %7528 = vrot.lane.b32.xlu1 %v7527_v20, %s7875_s20  ;;  %v9223_v44 = vpop.f32.mrb[13].mxu1  ;;  %v9225_v5 = vpop.f32.mrb[17].mxu0  ;;  %v2932_v45 = vmul.f32 %v6729_v1, %v6729_v1  ;;  %v2869_v47 = vadd.f32 %v2868_v6, %v2867_v8  ;;  %v1713_v32 = vsel %vm782_vm3, %v9181_v14, 0.0 }
 0x228   : > { %10512 = vst [vmem:[#allocation22_spill] sm:$0xff] %v9225_v5  ;;  %v1712_v38 = vadd.f32 %v1711_v58, %v1710_v2  ;;  %7533 = vrot.lane.b32.xlu0 %v7532_v49, %s7875_s20  ;;  %v9230_v29 = vpop.f32.mrb[14].mxu1  ;;  %v9232_v57 = vpop.f32.mrb[18].mxu0  ;;  %v2872_v26 = vsel %vm782_vm3, %v6729_v1, 0.0  ;;  %v1772_v33 = vmul.f32 %v9181_v14, %v9181_v14  ;;  %v1814_v40 = vadd.f32 %v1813_v24, %v1812_v53 }
 0x229   : > { %v2970_v28 = vsel %vm782_vm3, %v2930_v4, 0.0  ;;  %v2743_v27 = vpop.f32.mrb[15].mxu1  ;;  %v9238_v8 = vpop.f32.mrb[19].mxu0  ;;  %v2871_v2 = vadd.f32 %v2870_v34, %v2869_v47  ;;  %v1717_v20 = vsel %vm782_vm3, %v9177_v15, 0.0  ;;  %v1774_v6 = vmul.f32 %v9177_v15, %v9177_v15 }
 0x22a   : > { %10513 = vst [vmem:[#allocation24_spill] sm:$0xff] %v9238_v8  ;;  %v2971_v58 = vadd.f32 %v2970_v28, %v2969_v3  ;;  %v1714_v49 = vadd.f32 %v1713_v32, %v1712_v38  ;;  %v1815_v1 = vsel %vm782_vm3, %v1772_v33, 0.0  ;;  %v1715_v4 = vsel %vm782_vm3, %v9194_v25, 0.0 }
 0x22b   : > { %v1773_v24 = vmul.f32 %v9194_v25, %v9194_v25  ;;  %6981 = vmatmul.mubr.msk.bf16.gmra.mrb[56].mxu1 %vm782_vm3, %v8636_v62  ;;  %v2974_v53 = vsel %vm782_vm3, %v2932_v45, 0.0  ;;  %v1816_v34 = vadd.f32 %v1815_v1, %v1814_v40  ;;  %v1775_v38 = vmul.f32 %v9188_v17, %v9188_v17 }
 0x22c   : > { %v2973_v3 = vadd.f32 %v2972_v55, %v2971_v58  ;;  %v1716_v47 = vadd.f32 %v1715_v4, %v1714_v49  ;;  %6849 = vmatmul.mubr.msk.bf16.gmra.mrb[60].mxu0 %vm782_vm3, %v8500_v30  ;;  %6984 = vmatprep.mubr.msk.bf16.mxu1 %vm782_vm3, %v8652_v39  ;;  %v2935_v28 = vmul.f32 %v9215_v48, %v9215_v48  ;;  %v2874_v33 = vsel %vm782_vm3, %v9223_v44, 0.0 }
 0x22d   : > { %v1817_v32 = vsel %vm782_vm3, %v1773_v24, 0.0  ;;  %v2873_v62 = vadd.f32 %v2872_v26, %v2871_v2  ;;  %6854 = vmatprep.mubr.msk.bf16.mxu0 %vm782_vm3, %v10482_v22  ;;  %v2933_v39 = vmul.f32 %v9223_v44, %v9223_v44  ;;  %v1819_v49 = vsel %vm782_vm3, %v1774_v6, 0.0 }
 0x22e   : > { %v1718_v55 = vadd.f32 %v1717_v20, %v1716_v47  ;;  %v1818_v45 = vadd.f32 %v1817_v32, %v1816_v34  ;;  %v9267_v40 = vpop.f32.mrb[16].mxu1  ;;  %v9269_v58 = vpop.f32.mrb[20].mxu0  ;;  %v2975_v4 = vadd.f32 %v2974_v53, %v2973_v3  ;;  %v7537_v26 = vpack.i.bf16 %v9230_v29, %v9215_v48 }
 0x22f   : > { %v2875_v1 = vadd.f32 %v2874_v33, %v2873_v62  ;;  %v9274_v22 = vpop.f32.mrb[17].mxu1  ;;  %v9276_v2 = vpop.f32.mrb[21].mxu0  ;;  %v1719_v20 = vsel %vm782_vm3, %v9188_v17, 0.0  ;;  %v2976_v34 = vsel %vm782_vm3, %v2933_v39, 0.0  ;;  %v2936_v47 = vmul.f32 %v9230_v29, %v9230_v29 }
 0x230   : > { %v1820_v24 = vadd.f32 %v1819_v49, %v1818_v45  ;;  %v9283_v32 = vpop.f32.mrb[18].mxu1  ;;  %v9285_v6 = vpop.f32.mrb[22].mxu0  ;;  %v2977_v53 = vadd.f32 %v2976_v34, %v2975_v4  ;;  %v7542_v3 = vpack.i.bf16 %v2743_v27, %v9223_v44  ;;  %v2876_v62 = vsel %vm782_vm3, %v2743_v27, 0.0  ;;  %7538 = vrot.lane.b32.xlu1 %v7537_v26, %s7875_s20 }
 0x231   : > { %v2934_v33 = vmul.f32 %v2743_v27, %v2743_v27  ;;  %v9290_v25 = vpop.f32.mrb[19].mxu1  ;;  %v9292_v45 = vpop.f32.mrb[23].mxu0  ;;  %v1821_v39 = vsel %vm782_vm3, %v1775_v38, 0.0  ;;  %v2878_v49 = vsel %vm782_vm3, %v9215_v48, 0.0  ;;  %v2980_v14 = vsel %vm782_vm3, %v2935_v28, 0.0 }
 0x232   : > { %v2877_v17 = vadd.f32 %v2876_v62, %v2875_v1  ;;  %v1720_v44 = vadd.f32 %v1719_v20, %v1718_v55  ;;  %v1721_v27 = vsel %vm782_vm3, %v9225_v5, 0.0  ;;  %v1776_v26 = vmul.f32 %v9225_v5, %v9225_v5  ;;  %7543 = vrot.lane.b32.xlu0 %v7542_v3, %s7875_s20 }
 0x233   : > { %v2978_v4 = vsel %vm782_vm3, %v2934_v33, 0.0  ;;  %6985 = vmatmul.mubr.msk.bf16.gmra.mrb[60].mxu1 %vm782_vm3, %v8660_v56  ;;  %v2880_v48 = vsel %vm782_vm3, %v9230_v29, 0.0  ;;  %v1822_v1 = vadd.f32 %v1821_v39, %v1820_v24  ;;  %v2982_v55 = vsel %vm782_vm3, %v2936_v47, 0.0 }
 0x234   : > { %v2879_v38 = vadd.f32 %v2878_v49, %v2877_v17  ;;  %v2979_v28 = vadd.f32 %v2978_v4, %v2977_v53  ;;  %6855 = vmatmul.mubr.msk.bf16.vlgmr.msra.gmra.mrb[32].mxu0 %vm782_vm3, %v10483_v13  ;;  %6990 = vmatprep.mubr.msk.bf16.mxu1 %vm782_vm3, %v8125_v51  ;;  %v1778_v20 = vmul.f32 %v9217_v42, %v9217_v42  ;;  %v1823_v56 = vsel %vm782_vm3, %v1776_v26, 0.0 }
 0x235   : > { %v1722_v34 = vadd.f32 %v1721_v27, %v1720_v44  ;;  %6858 = vmatprep.mubr.msk.bf16.mxu0 %vm782_vm3, %v10484_v21  ;;  %v1824_v29 = vadd.f32 %v1823_v56, %v1822_v1  ;;  %v1723_v24 = vsel %vm782_vm3, %v9238_v8, 0.0  ;;  %v1777_v13 = vmul.f32 %v9238_v8, %v9238_v8 }
 0x236   : > { %v2981_v17 = vadd.f32 %v2980_v14, %v2979_v28  ;;  %v9322_v51 = vpop.f32.mrb[20].mxu1  ;;  %v9324_v47 = vpop.f32.mrb[24].mxu0  ;;  %v1725_v53 = vsel %vm782_vm3, %v9217_v42, 0.0  ;;  %v1779_v3 = vmul.f32 %v9232_v57, %v9232_v57  ;;  %v2939_v21 = vmul.f32 %v9267_v40, %v9267_v40 }
 0x237   : > { %v1724_v62 = vadd.f32 %v1723_v24, %v1722_v34  ;;  %v9332_v14 = vpop.f32.mrb[21].mxu1  ;;  %v9334_v33 = vpop.f32.mrb[25].mxu0  ;;  %v1825_v39 = vsel %vm782_vm3, %v1777_v13, 0.0  ;;  %v2881_v49 = vadd.f32 %v2880_v48, %v2879_v38  ;;  %v2882_v4 = vsel %vm782_vm3, %v9274_v22, 0.0 }
 0x238   : > { %v2937_v44 = vmul.f32 %v9274_v22, %v9274_v22  ;;  %v9341_v27 = vpop.f32.mrb[22].mxu1  ;;  %v9343_v26 = vpop.f32.mrb[26].mxu0  ;;  %v1827_v28 = vsel %vm782_vm3, %v1778_v20, 0.0  ;;  %v1826_v34 = vadd.f32 %v1825_v39, %v1824_v29  ;;  %v2983_v56 = vadd.f32 %v2982_v55, %v2981_v17 }
 0x239   : > { %v1726_v1 = vadd.f32 %v1725_v53, %v1724_v62  ;;  %v9346_v24 = vpop.f32.mrb[23].mxu1  ;;  %v9348_v8 = vpop.f32.mrb[27].mxu0  ;;  %v1727_v48 = vsel %vm782_vm3, %v9232_v57, 0.0  ;;  %v2883_v38 = vadd.f32 %v2882_v4, %v2881_v49  ;;  %v7547_v5 = vpack.i.bf16 %v9283_v32, %v9267_v40 }
 0x23a   : > { %v2984_v13 = vsel %vm782_vm3, %v2937_v44, 0.0  ;;  %v1829_v42 = vsel %vm782_vm3, %v1779_v3, 0.0  ;;  %v1828_v15 = vadd.f32 %v1827_v28, %v1826_v34  ;;  %v7552_v55 = vpack.i.bf16 %v9290_v25, %v9274_v22 }
 0x23b   : > { %v2985_v20 = vadd.f32 %v2984_v13, %v2983_v56  ;;  %6991 = vmatmul.mubr.msk.bf16.vlgmr.msra.gmra.mrb[32].mxu1 %vm782_vm3, %v8151_v9  ;;  %v2886_v17 = vsel %vm782_vm3, %v9267_v40, 0.0  ;;  %v2988_v29 = vsel %vm782_vm3, %v2939_v21, 0.0  ;;  %v2884_v53 = vsel %vm782_vm3, %v9290_v25, 0.0  ;;  %7548 = vrot.lane.b32.xlu1 %v7547_v5, %s7875_s20 }
 0x23c   : > { %v2938_v62 = vmul.f32 %v9290_v25, %v9290_v25  ;;  %6859 = vmatmul.mubr.msk.bf16.gmra.mrb[36].mxu0 %vm782_vm3, %v10485_v35  ;;  %v2940_v22 = vmul.f32 %v9283_v32, %v9283_v32  ;;  %v2885_v9 = vadd.f32 %v2884_v53, %v2883_v38  ;;  %v1728_v3 = vadd.f32 %v1727_v48, %v1726_v1 }
 0x23d   : > { %v1729_v40 = vsel %vm782_vm3, %v9276_v2, 0.0  ;;  %7553 = vrot.lane.b32.xlu0 %v7552_v55, %s7875_s20  ;;  %6994 = vmatprep.mubr.msk.bf16.mxu1 %vm782_vm3, %v8178_v43  ;;  %v2888_v25 = vsel %vm782_vm3, %v9283_v32, 0.0  ;;  %v1780_v35 = vmul.f32 %v9276_v2, %v9276_v2  ;;  %v1830_v21 = vadd.f32 %v1829_v42, %v1828_v15 }
 0x23e   : > { %v2986_v5 = vsel %vm782_vm3, %v2938_v62, 0.0  ;;  %v9382_v39 = vpop.f32.mrb[24].mxu1  ;;  %v9384_v49 = vpop.f32.mrb[28].mxu0  ;;  %6862 = vmatprep.mubr.msk.bf16.mxu0 %vm782_vm3, %v10486_v7  ;;  %v2887_v4 = vadd.f32 %v2886_v17, %v2885_v9  ;;  %v1733_v43 = vsel %vm782_vm3, %v9269_v58, 0.0  ;;  %v1730_v28 = vadd.f32 %v1729_v40, %v1728_v3 }
 0x23f   : > { %v2987_v44 = vadd.f32 %v2986_v5, %v2985_v20  ;;  %v9390_v32 = vpop.f32.mrb[25].mxu1  ;;  %v9392_v1 = vpop.f32.mrb[29].mxu0  ;;  %v1782_v15 = vmul.f32 %v9269_v58, %v9269_v58  ;;  %v1831_v42 = vsel %vm782_vm3, %v1780_v35, 0.0  ;;  %v1731_v34 = vsel %vm782_vm3, %v9292_v45, 0.0 }
 0x240   : > { %v1781_v7 = vmul.f32 %v9292_v45, %v9292_v45  ;;  %v9401_v56 = vpop.f32.mrb[26].mxu1  ;;  %v9403_v48 = vpop.f32.mrb[30].mxu0  ;;  %v2990_v38 = vsel %vm782_vm3, %v2940_v22, 0.0  ;;  %v1832_v20 = vadd.f32 %v1831_v42, %v1830_v21  ;;  %v1732_v55 = vadd.f32 %v1731_v34, %v1730_v28 }
 0x241   : > { %v2989_v13 = vadd.f32 %v2988_v29, %v2987_v44  ;;  %v9406_v17 = vpop.f32.mrb[27].mxu1  ;;  %v9408_v53 = vpop.f32.mrb[31].mxu0  ;;  %v1783_v62 = vmul.f32 %v9285_v6, %v9285_v6  ;;  %v2943_v3 = vmul.f32 %v9322_v51, %v9322_v51  ;;  %v2889_v40 = vadd.f32 %v2888_v25, %v2887_v4 }
 0x242   : > { %v1833_v9 = vsel %vm782_vm3, %v1781_v7, 0.0  ;;  %v1734_v5 = vadd.f32 %v1733_v43, %v1732_v55  ;;  %v2890_v29 = vsel %vm782_vm3, %v9332_v14, 0.0  ;;  %v2941_v22 = vmul.f32 %v9332_v14, %v9332_v14 }
 0x243   : > { %v1834_v35 = vadd.f32 %v1833_v9, %v1832_v20  ;;  %6995 = vmatmul.mubr.msk.bf16.gmra.mrb[36].mxu1 %vm782_vm3, %v8198_v12  ;;  %v1835_v21 = vsel %vm782_vm3, %v1782_v15, 0.0  ;;  %v2891_v44 = vadd.f32 %v2890_v29, %v2889_v40  ;;  %v2991_v28 = vadd.f32 %v2990_v38, %v2989_v13 }
 0x244   : > { %v7557_v42 = vpack.i.bf16 %v9341_v27, %v9322_v51  ;;  %6863 = vmatmul.mubr.msk.bf16.gmra.mrb[40].mxu0 %vm782_vm3, %v10487_v0  ;;  %6998 = vmatprep.mubr.msk.bf16.mxu1 %vm782_vm3, %v8229_v52  ;;  %v1735_v25 = vsel %vm782_vm3, %v9285_v6, 0.0  ;;  %v2992_v43 = vsel %vm782_vm3, %v2941_v22, 0.0  ;;  %v2944_v12 = vmul.f32 %v9341_v27, %v9341_v27 }
 0x245   : > { %v1836_v4 = vadd.f32 %v1835_v21, %v1834_v35  ;;  %6866 = vmatprep.mubr.msk.bf16.mxu0 %vm782_vm3, %v10488_v36  ;;  %v2993_v15 = vadd.f32 %v2992_v43, %v2991_v28  ;;  %v7562_v34 = vpack.i.bf16 %v9346_v24, %v9332_v14  ;;  %v2892_v0 = vsel %vm782_vm3, %v9346_v24, 0.0 }
 0x246   : > { %v2942_v52 = vmul.f32 %v9346_v24, %v9346_v24  ;;  %7558 = vrot.lane.b32.xlu1 %v7557_v42, %s7875_s20  ;;  %v9442_v7 = vpop.f32.mrb[28].mxu1  ;;  %v1837_v38 = vsel %vm782_vm3, %v1783_v62, 0.0  ;;  %v2894_v13 = vsel %vm782_vm3, %v9322_v51, 0.0  ;;  %v2996_v36 = vsel %vm782_vm3, %v2943_v3, 0.0 }
 0x247   : > { %v2893_v20 = vadd.f32 %v2892_v0, %v2891_v44  ;;  %v9448_v55 = vpop.f32.mrb[29].mxu1  ;;  %v1736_v9 = vadd.f32 %v1735_v25, %v1734_v5  ;;  %v1737_v24 = vsel %vm782_vm3, %v9334_v33, 0.0  ;;  %v1784_v40 = vmul.f32 %v9334_v33, %v9334_v33  ;;  %7563 = vrot.lane.b32.xlu0 %v7562_v34, %s7875_s20 }
 0x248   : > { %v2994_v14 = vsel %vm782_vm3, %v2942_v52, 0.0  ;;  %v9456_v62 = vpop.f32.mrb[30].mxu1  ;;  %v2896_v51 = vsel %vm782_vm3, %v9341_v27, 0.0  ;;  %v1838_v29 = vadd.f32 %v1837_v38, %v1836_v4  ;;  %v2998_v5 = vsel %vm782_vm3, %v2944_v12, 0.0 }
 0x249   : > { %v2895_v3 = vadd.f32 %v2894_v13, %v2893_v20  ;;  %v2995_v35 = vadd.f32 %v2994_v14, %v2993_v15  ;;  %v9460_v22 = vpop.f32.mrb[31].mxu1  ;;  %v1786_v21 = vmul.f32 %v9324_v47, %v9324_v47  ;;  %v1738_v44 = vadd.f32 %v1737_v24, %v1736_v9 }
 0x24a   : > { %v1839_v28 = vsel %vm782_vm3, %v1784_v40, 0.0  ;;  %v1739_v43 = vsel %vm782_vm3, %v9348_v8, 0.0  ;;  %v1785_v27 = vmul.f32 %v9348_v8, %v9348_v8  ;;  %v1741_v4 = vsel %vm782_vm3, %v9324_v47, 0.0 }
 0x24b   : > { %v2997_v42 = vadd.f32 %v2996_v36, %v2995_v35  ;;  %v1840_v25 = vadd.f32 %v1839_v28, %v1838_v29  ;;  %6999 = vmatmul.mubr.msk.bf16.gmra.mrb[40].mxu1 %vm782_vm3, %v8249_v23  ;;  %v1787_v12 = vmul.f32 %v9343_v26, %v9343_v26  ;;  %v1740_v15 = vadd.f32 %v1739_v43, %v1738_v44 }
 0x24c   : > { %v2947_v34 = vmul.f32 %v9382_v39, %v9382_v39  ;;  %6867 = vmatmul.mubr.msk.bf16.gmra.mrb[44].mxu0 %vm782_vm3, %v10489_v31  ;;  %7002 = vmatprep.mubr.msk.bf16.mxu1 %vm782_vm3, %v8268_v54  ;;  %v1841_v0 = vsel %vm782_vm3, %v1785_v27, 0.0  ;;  %v2897_v52 = vadd.f32 %v2896_v51, %v2895_v3  ;;  %v2898_v23 = vsel %vm782_vm3, %v9390_v32, 0.0 }
 0x24d   : > { %v2945_v38 = vmul.f32 %v9390_v32, %v9390_v32  ;;  %6870 = vmatprep.mubr.msk.bf16.mxu0 %vm782_vm3, %v10490_v50  ;;  %v1843_v13 = vsel %vm782_vm3, %v1786_v21, 0.0  ;;  %v1742_v36 = vadd.f32 %v1741_v4, %v1740_v15  ;;  %v1842_v20 = vadd.f32 %v1841_v0, %v1840_v25 }
 0x24e   : > { %v2999_v31 = vadd.f32 %v2998_v5, %v2997_v42  ;;  %v1743_v54 = vsel %vm782_vm3, %v9343_v26, 0.0  ;;  %v2899_v14 = vadd.f32 %v2898_v23, %v2897_v52  ;;  %v7567_v24 = vpack.i.bf16 %v9401_v56, %v9382_v39 }
 0x24f   : > { %v3000_v9 = vsel %vm782_vm3, %v2945_v38, 0.0  ;;  %v1845_v40 = vsel %vm782_vm3, %v1787_v12, 0.0  ;;  %v1844_v51 = vadd.f32 %v1843_v13, %v1842_v20  ;;  %v7572_v50 = vpack.i.bf16 %v9406_v17, %v9390_v32 }
 0x250   : > { %v3001_v3 = vadd.f32 %v3000_v9, %v2999_v31  ;;  %v2902_v35 = vsel %vm782_vm3, %v9382_v39, 0.0  ;;  %v3004_v29 = vsel %vm782_vm3, %v2947_v34, 0.0  ;;  %v2900_v5 = vsel %vm782_vm3, %v9406_v17, 0.0  ;;  %7568 = vrot.lane.b32.xlu1 %v7567_v24, %s7875_s20 }
 0x251   : > { %v2946_v21 = vmul.f32 %v9406_v17, %v9406_v17  ;;  %v2948_v44 = vmul.f32 %v9401_v56, %v9401_v56  ;;  %v2901_v28 = vadd.f32 %v2900_v5, %v2899_v14  ;;  %v1744_v42 = vadd.f32 %v1743_v54, %v1742_v36  ;;  %7573 = vrot.lane.b32.xlu0 %v7572_v50, %s7875_s20 }
 0x252   : > { %v1745_v32 = vsel %vm782_vm3, %v9392_v1, 0.0  ;;  %v1790_v25 = vmul.f32 %v9384_v49, %v9384_v49  ;;  %v1788_v17 = vmul.f32 %v9392_v1, %v9392_v1  ;;  %v1846_v43 = vadd.f32 %v1845_v40, %v1844_v51 }
 0x253   : > { %v3002_v39 = vsel %vm782_vm3, %v2946_v21, 0.0  ;;  %7003 = vmatmul.mubr.msk.bf16.gmra.mrb[44].mxu1 %vm782_vm3, %v10474_v11  ;;  %v2904_v27 = vsel %vm782_vm3, %v9401_v56, 0.0  ;;  %v2903_v4 = vadd.f32 %v2902_v35, %v2901_v28  ;;  %v1746_v15 = vadd.f32 %v1745_v32, %v1744_v42 }
 0x254   : > { %v3003_v12 = vadd.f32 %v3002_v39, %v3001_v3  ;;  %6871 = vmatmul.mubr.msk.bf16.gmra.mrb[48].mxu0 %vm782_vm3, %v10491_v18  ;;  %7006 = vmatprep.mubr.msk.bf16.mxu1 %vm782_vm3, %v10475_v16  ;;  %v1749_v34 = vsel %vm782_vm3, %v9384_v49, 0.0  ;;  %v1847_v0 = vsel %vm782_vm3, %v1788_v17, 0.0  ;;  %v1747_v11 = vsel %vm782_vm3, %v9408_v53, 0.0  ;;  %v10514_v17 = vld [vmem:[#allocation31_spill] sm:$0xff] }
 0x255   : > { %v1789_v56 = vmul.f32 %v9408_v53, %v9408_v53  ;;  %6874 = vmatprep.mubr.msk.bf16.mxu0 %vm782_vm3, %v10492_v37  ;;  %v1848_v23 = vadd.f32 %v1847_v0, %v1846_v43  ;;  %v1791_v18 = vmul.f32 %v9403_v48, %v9403_v48  ;;  %v1748_v16 = vadd.f32 %v1747_v11, %v1746_v15 }
 0x256   : > { %v3005_v52 = vadd.f32 %v3004_v29, %v3003_v12  ;;  %v3006_v38 = vsel %vm782_vm3, %v2948_v44, 0.0  ;;  %v1851_v13 = vsel %vm782_vm3, %v1790_v25, 0.0  ;;  %v2905_v20 = vadd.f32 %v2904_v27, %v2903_v4 }
 0x257   : > { %v1849_v36 = vsel %vm782_vm3, %v1789_v56, 0.0  ;;  %v1750_v31 = vadd.f32 %v1749_v34, %v1748_v16  ;;  %v2906_v14 = vsel %vm782_vm3, %v9448_v55, 0.0  ;;  %v2949_v37 = vmul.f32 %v9448_v55, %v9448_v55 }
 0x258   : > { %v1850_v54 = vadd.f32 %v1849_v36, %v1848_v23  ;;  %v1751_v9 = vsel %vm782_vm3, %v9403_v48, 0.0  ;;  %v2907_v24 = vadd.f32 %v2906_v14, %v2905_v20  ;;  %v3007_v40 = vadd.f32 %v3006_v38, %v3005_v52  ;;  %v10516_v36 = vld [vmem:[#allocation34_spill] sm:$0xff]  ;;  %v10517_v20 = vld [vmem:[#allocation36_spill] sm:$0xff] }
 0x259   : > { %v7577_v51 = vpack.i.bf16 %v9456_v62, %v9442_v7  ;;  %v1853_v3 = vsel %vm782_vm3, %v1791_v18, 0.0  ;;  %v1752_v50 = vadd.f32 %v1751_v9, %v1750_v31  ;;  %v3008_v29 = vsel %vm782_vm3, %v2949_v37, 0.0 }
 0x25a   : > { %v1852_v35 = vadd.f32 %v1851_v13, %v1850_v54  ;;  %v2951_v5 = vmul.f32 %v9442_v7, %v9442_v7  ;;  %v3009_v21 = vadd.f32 %v3008_v29, %v3007_v40  ;;  %v7582_v44 = vpack.i.bf16 %v9460_v22, %v9448_v55 }
 0x25b   : > { %v2908_v28 = vsel %vm782_vm3, %v9460_v22, 0.0  ;;  %7578 = vrot.lane.b32.xlu1 %v7577_v51, %s7875_s20  ;;  %7007 = vmatmul.mubr.msk.bf16.gmra.mrb[48].mxu1 %vm782_vm3, %v10476_v60  ;;  %v1753_v42 = vrot.slane %v1752_v50, 4  ;;  %v2950_v25 = vmul.f32 %v9460_v22, %v9460_v22  ;;  %v2910_v55 = vsel %vm782_vm3, %v9442_v7, 0.0  ;;  %v10515_v60 = vld [vmem:[#allocation32_spill] sm:$0xff] }
 0x25c   : > { %v1854_v32 = vadd.f32 %v1853_v3, %v1852_v35  ;;  %v2909_v39 = vadd.f32 %v2908_v28, %v2907_v24  ;;  %6875 = vmatmul.mubr.msk.bf16.gmra.mrb[52].mxu0 %vm782_vm3, %v10493_v19  ;;  %7010 = vmatprep.mubr.msk.bf16.mxu1 %vm782_vm3, %v10514_v17  ;;  %v2952_v43 = vmul.f32 %v9456_v62, %v9456_v62  ;;  %v2912_v19 = vsel %vm782_vm3, %v9456_v62, 0.0 }
 0x25d   : > { %7583 = vrot.lane.b32.xlu0 %v7582_v44, %s7875_s20  ;;  %6878 = vmatprep.mubr.msk.bf16.mxu0 %vm782_vm3, %v10515_v60  ;;  %v1754_v27 = vadd.f32 %v1753_v42, %v1752_v50  ;;  %v3010_v12 = vsel %vm782_vm3, %v2950_v25, 0.0  ;;  %v3012_v7 = vsel %vm782_vm3, %v2951_v5, 0.0  ;;  %v10520_v25 = vld [vmem:[#allocation27_spill] sm:$0xff] }
 0x25e   : > { %v1855_v4 = vrot.slane %v1854_v32, 4  ;;  %v2911_v22 = vadd.f32 %v2910_v55, %v2909_v39  ;;  %v3011_v15 = vadd.f32 %v3010_v12, %v3009_v21  ;;  %v3014_v52 = vsel %vm782_vm3, %v2952_v43, 0.0 }
 0x25f   : > { %v1755_v34 = vrot.slane %v1754_v27, 2 }
 0x260   : > { %v1856_v0 = vadd.f32 %v1855_v4, %v1854_v32  ;;  %v2913_v11 = vadd.f32 %v2912_v19, %v2911_v22  ;;  %v3013_v56 = vadd.f32 %v3012_v7, %v3011_v15  ;;  %v10519_v32 = vld [vmem:[#allocation23_spill] sm:$0xff]  ;;  %v10522_v22 = vld [vmem:[#allocation28_spill] sm:$0xff] }
 0x261   : > { %v1756_v38 = vadd.f32 %v1755_v34, %v1754_v27 }
 0x262   : > { %v2914_v23 = vrot.slane %v2913_v11, 4  ;;  %v1857_v18 = vrot.slane %v1856_v0, 2  ;;  %v3015_v16 = vadd.f32 %v3014_v52, %v3013_v56 }
 0x263   : > { %7011 = vmatmul.mubr.msk.bf16.gmra.mrb[52].mxu1 %vm782_vm3, %v10480_v59  ;;  %v1757_v37 = vrot.slane %v1756_v38, 1 }
 0x264   : > { %v2915_v13 = vadd.f32 %v2914_v23, %v2913_v11  ;;  %6879 = vmatmul.mubr.msk.bf16.gmra.mrb[56].mxu0 %vm782_vm3, %v10516_v36  ;;  %7014 = vmatprep.mubr.msk.bf16.mxu1 %vm782_vm3, %v10481_v46  ;;  %v3016_v62 = vrot.slane %v3015_v16, 4  ;;  %v1858_v54 = vadd.f32 %v1857_v18, %v1856_v0  ;;  %v10518_v46 = vld [vmem:[#allocation37_spill] sm:$0xff]  ;;  %v10523_v11 = vld [vmem:[#allocation30_spill] sm:$0xff] }
 0x265   : > { %6882 = vmatprep.mubr.msk.bf16.mxu0 %vm782_vm3, %v10517_v20  ;;  %v1758_v3 = vadd.f32 %v1757_v37, %v1756_v38  ;;  %v10524_v36 = vld [vmem:[#allocation33_spill] sm:$0xff]  ;;  %v10525_v20 = vld [vmem:[#allocation35_spill] sm:$0xff] }
 0x266   : > { %v2916_v31 = vrot.slane %v2915_v13, 2  ;;  %v3017_v14 = vadd.f32 %v3016_v62, %v3015_v16  ;;  %v1859_v40 = vrot.slane %v1858_v54, 1 }
 0x268   : > { %v2917_v9 = vadd.f32 %v2916_v31, %v2915_v13  ;;  %v3018_v24 = vrot.slane %v3017_v14, 2  ;;  %v1860_v5 = vadd.f32 %v1859_v40, %v1858_v54 }
 0x26a   : > { %v2918_v59 = vrot.slane %v2917_v9, 1  ;;  %v3019_v51 = vadd.f32 %v3018_v24, %v3017_v14 }
 0x26b   : > { %7015 = vmatmul.mubr.msk.bf16.gmra.mrb[56].mxu1 %vm782_vm3, %v8439_v10 }
 0x26c   : > { %v2919_v50 = vadd.f32 %v2918_v59, %v2917_v9  ;;  %6883 = vmatmul.mubr.msk.bf16.gmra.mrb[60].mxu0 %vm782_vm3, %v10518_v46  ;;  %7018 = vmatprep.mubr.msk.bf16.mxu1 %vm782_vm3, %v8461_v63  ;;  %v3020_v35 = vrot.slane %v3019_v51, 1 }
 0x26e   : > { %v9589_v29 = vadd.f32 %v2919_v50, %v1758_v3  ;;  %v3021_v21 = vadd.f32 %v3020_v35, %v3019_v51  ;;  %v10526_v51 = vld [vmem:[#allocation14_spill] sm:$0xff] }
 0x270   : > { %v9591_v44 = vadd.f32 %v3021_v21, %v1860_v5  ;;  %v10527_v5 = vld [vmem:[#allocation15_spill] sm:$0xff] }
 0x273   : > { %7019 = vmatmul.mubr.msk.bf16.gmra.mrb[60].mxu1 %vm782_vm3, %v8500_v30  ;;  %v10521_v30 = vld [vmem:[#allocation25_spill] sm:$0xff] }
 0x285   : > { %v7509_v10 = vpop.permute.xlu0 %7508 }
 0x286   : > { %v7511_v28 = vunpack.i.h.bf16 %v7509_v10  ;;  %v7510_v42 = vunpack.i.l.bf16 %v7509_v10  ;;  %v10528_v10 = vld [vmem:[#allocation16_spill] sm:$0xff] }
 0x288   : > { %v3153_v39 = vsel %vm782_vm3, %v10519_v32, %v7510_v42  ;;  %v3154_v63 = vsel %vm782_vm3, %v10520_v25, %v7511_v28 }
 0x289   : > { %v6143_v17 = vpack.c.bf16 %v3153_v39, %v3153_v39  ;;  %v6144_v55 = vpack.c.bf16 %v3154_v63, %v3154_v63  ;;  %v7514_v43 = vpop.permute.xlu0 %7513 }
 0x28a   : > { %v7516_v60 = vunpack.i.h.bf16 %v7514_v43  ;;  %v7515_v27 = vunpack.i.l.bf16 %v7514_v43  ;;  %v10530_v43 = vld [vmem:[#allocation19_spill] sm:$0xff] }
 0x28b   : > { %3314 = vst.msk [vmem:[%s9600_s24 + $0x10] sm:$0xf] %vm3311_vm8, %v6143_v17  ;;  %3315 = vst.msk [vmem:[%s9600_s24 + $0x14] sm:$0xf] %vm3311_vm8, %v6144_v55  ;;  %v10529_v17 = vld [vmem:[#allocation17_spill] sm:$0xff] }
 0x28c   : > { %v3151_v4 = vsel %vm782_vm3, %v10521_v30, %v7515_v27  ;;  %v3152_v12 = vsel %vm782_vm3, %v10522_v22, %v7516_v60 }
 0x28d   : > { %v6141_v19 = vpack.c.bf16 %v3151_v4, %v3151_v4  ;;  %v6142_v15 = vpack.c.bf16 %v3152_v12, %v3152_v12  ;;  %v10531_v12 = vld [vmem:[#allocation18_spill] sm:$0xff] }
 0x28f   : > { %3312 = vst.msk [vmem:[%s9600_s24] sm:$0xf] %vm3311_vm8, %v6141_v19  ;;  %3313 = vst.msk [vmem:[%s9600_s24 + $0x4] sm:$0xf] %vm3311_vm8, %v6142_v15  ;;  %v10532_v15 = vld [vmem:[#allocation20_spill] sm:$0xff] }
 0x291   : > { %v7519_v34 = vpop.permute.xlu1 %7518 }
 0x292   : > { %v7521_v0 = vunpack.i.h.bf16 %v7519_v34  ;;  %v7520_v7 = vunpack.i.l.bf16 %v7519_v34 }
 0x294   : > { %v3157_v56 = vsel %vm782_vm3, %v10523_v11, %v7520_v7  ;;  %v3158_v52 = vsel %vm782_vm3, %v9103_v61, %v7521_v0 }
 0x295   : > { %v6147_v23 = vpack.c.bf16 %v3157_v56, %v3157_v56  ;;  %v6148_v18 = vpack.c.bf16 %v3158_v52, %v3158_v52  ;;  %v7524_v16 = vpop.permute.xlu1 %7523 }
 0x296   : > { %v7526_v38 = vunpack.i.h.bf16 %v7524_v16  ;;  %v7525_v13 = vunpack.i.l.bf16 %v7524_v16 }
 0x297   : > { %3318 = vst.msk [vmem:[%s9600_s24 + $0x30] sm:$0xf] %vm3311_vm8, %v6147_v23  ;;  %3319 = vst.msk [vmem:[%s9600_s24 + $0x34] sm:$0xf] %vm3311_vm8, %v6148_v18 }
 0x298   : > { %v3155_v62 = vsel %vm782_vm3, %v10524_v36, %v7525_v13  ;;  %v3156_v31 = vsel %vm782_vm3, %v10525_v20, %v7526_v38  ;;  %v10533_v38 = vld [vmem:[#allocation21_spill] sm:$0xff] }
 0x299   : > { %v6145_v54 = vpack.c.bf16 %v3155_v62, %v3155_v62  ;;  %v6146_v14 = vpack.c.bf16 %v3156_v31, %v3156_v31  ;;  %v7529_v61 = vpop.permute.xlu1 %7528  ;;  %v10534_v31 = vld [vmem:[#allocation22_spill] sm:$0xff] }
 0x29a   : > { %v7531_v37 = vunpack.i.h.bf16 %v7529_v61  ;;  %v7530_v9 = vunpack.i.l.bf16 %v7529_v61  ;;  %v7534_v24 = vpop.permute.xlu0 %7533 }
 0x29b   : > { %3316 = vst.msk [vmem:[%s9600_s24 + $0x20] sm:$0xf] %vm3311_vm8, %v6145_v54  ;;  %3317 = vst.msk [vmem:[%s9600_s24 + $0x24] sm:$0xf] %vm3311_vm8, %v6146_v14  ;;  %v7536_v59 = vunpack.i.h.bf16 %v7534_v24  ;;  %v7535_v40 = vunpack.i.l.bf16 %v7534_v24  ;;  %v10535_v14 = vld [vmem:[#allocation24_spill] sm:$0xff] }
 0x29c   : > { %v3161_v3 = vsel %vm782_vm3, %v10526_v51, %v7530_v9  ;;  %v3162_v50 = vsel %vm782_vm3, %v9147_v41, %v7531_v37 }
 0x29d   : > { %v6151_v46 = vpack.c.bf16 %v3161_v3, %v3161_v3  ;;  %v6152_v35 = vpack.c.bf16 %v3162_v50, %v3162_v50  ;;  %v3159_v21 = vsel %vm782_vm3, %v10527_v5, %v7535_v40  ;;  %v3160_v28 = vsel %vm782_vm3, %v10528_v10, %v7536_v59 }
 0x29e   : > { %v6149_v42 = vpack.c.bf16 %v3159_v21, %v3159_v21  ;;  %v6150_v32 = vpack.c.bf16 %v3160_v28, %v3160_v28 }
 0x29f   : > { %3322 = vst.msk [vmem:[%s9600_s24 + $0x50] sm:$0xf] %vm3311_vm8, %v6151_v46  ;;  %3323 = vst.msk [vmem:[%s9600_s24 + $0x54] sm:$0xf] %vm3311_vm8, %v6152_v35 }
 0x2a0   : > { %3320 = vst.msk [vmem:[%s9600_s24 + $0x40] sm:$0xf] %vm3311_vm8, %v6149_v42  ;;  %3321 = vst.msk [vmem:[%s9600_s24 + $0x44] sm:$0xf] %vm3311_vm8, %v6150_v32 }
 0x2a2   : > { %v7539_v41 = vpop.permute.xlu1 %7538 }
 0x2a3   : > { %v7541_v39 = vunpack.i.h.bf16 %v7539_v41  ;;  %v7540_v25 = vunpack.i.l.bf16 %v7539_v41 }
 0x2a4   : > { %v7544_v63 = vpop.permute.xlu0 %7543 }
 0x2a5   : > { %v3165_v55 = vsel %vm782_vm3, %v10529_v17, %v7540_v25  ;;  %v3166_v60 = vsel %vm782_vm3, %v10530_v43, %v7541_v39  ;;  %v7546_v27 = vunpack.i.h.bf16 %v7544_v63  ;;  %v7545_v30 = vunpack.i.l.bf16 %v7544_v63 }
 0x2a6   : > { %v6155_v4 = vpack.c.bf16 %v3165_v55, %v3165_v55  ;;  %v6156_v22 = vpack.c.bf16 %v3166_v60, %v3166_v60 }
 0x2a7   : > { %v3163_v19 = vsel %vm782_vm3, %v10531_v12, %v7545_v30  ;;  %v3164_v34 = vsel %vm782_vm3, %v10532_v15, %v7546_v27 }
 0x2a8   : > { %3326 = vst.msk [vmem:[%s9600_s24 + $0x70] sm:$0xf] %vm3311_vm8, %v6155_v4  ;;  %3327 = vst.msk [vmem:[%s9600_s24 + $0x74] sm:$0xf] %vm3311_vm8, %v6156_v22  ;;  %v6153_v0 = vpack.c.bf16 %v3163_v19, %v3163_v19  ;;  %v6154_v7 = vpack.c.bf16 %v3164_v34, %v3164_v34 }
 0x2aa   : > { %3324 = vst.msk [vmem:[%s9600_s24 + $0x60] sm:$0xf] %vm3311_vm8, %v6153_v0  ;;  %3325 = vst.msk [vmem:[%s9600_s24 + $0x64] sm:$0xf] %vm3311_vm8, %v6154_v7 }
 0x2ad   : > { %v7549_v11 = vpop.permute.xlu1 %7548 }
 0x2ae   : > { %v7551_v56 = vunpack.i.h.bf16 %v7549_v11  ;;  %v7550_v52 = vunpack.i.l.bf16 %v7549_v11 }
 0x2af   : > { %v7554_v23 = vpop.permute.xlu0 %7553 }
 0x2b0   : > { %v7556_v18 = vunpack.i.h.bf16 %v7554_v23  ;;  %v7555_v16 = vunpack.i.l.bf16 %v7554_v23  ;;  %v3169_v13 = vsel %vm782_vm3, %v10533_v38, %v7550_v52  ;;  %v3170_v36 = vsel %vm782_vm3, %v9232_v57, %v7551_v56 }
 0x2b1   : > { %v6159_v62 = vpack.c.bf16 %v3169_v13, %v3169_v13  ;;  %v6160_v20 = vpack.c.bf16 %v3170_v36, %v3170_v36 }
 0x2b2   : > { %v3167_v54 = vsel %vm782_vm3, %v10534_v31, %v7555_v16  ;;  %v3168_v61 = vsel %vm782_vm3, %v10535_v14, %v7556_v18 }
 0x2b3   : > { %v6157_v37 = vpack.c.bf16 %v3167_v54, %v3167_v54  ;;  %v6158_v9 = vpack.c.bf16 %v3168_v61, %v3168_v61  ;;  %3330 = vst.msk [vmem:[%s9600_s24 + $0x90] sm:$0xf] %vm3311_vm8, %v6159_v62  ;;  %3331 = vst.msk [vmem:[%s9600_s24 + $0x94] sm:$0xf] %vm3311_vm8, %v6160_v20 }
 0x2b5   : > { %3328 = vst.msk [vmem:[%s9600_s24 + $0x80] sm:$0xf] %vm3311_vm8, %v6157_v37  ;;  %3329 = vst.msk [vmem:[%s9600_s24 + $0x84] sm:$0xf] %vm3311_vm8, %v6158_v9 }
 0x2b8   : > { %v7559_v57 = vpop.permute.xlu1 %7558 }
 0x2b9   : > { %v7561_v24 = vunpack.i.h.bf16 %v7559_v57  ;;  %v7560_v59 = vunpack.i.l.bf16 %v7559_v57  ;;  %v7564_v40 = vpop.permute.xlu0 %7563 }
 0x2ba   : > { %v7566_v50 = vunpack.i.h.bf16 %v7564_v40  ;;  %v7565_v46 = vunpack.i.l.bf16 %v7564_v40 }
 0x2bb   : > { %v3173_v51 = vsel %vm782_vm3, %v9269_v58, %v7560_v59  ;;  %v3174_v3 = vsel %vm782_vm3, %v9285_v6, %v7561_v24 }
 0x2bc   : > { %v6163_v35 = vpack.c.bf16 %v3173_v51, %v3173_v51  ;;  %v6164_v5 = vpack.c.bf16 %v3174_v3, %v3174_v3  ;;  %v3171_v21 = vsel %vm782_vm3, %v9276_v2, %v7565_v46  ;;  %v3172_v10 = vsel %vm782_vm3, %v9292_v45, %v7566_v50 }
 0x2bd   : > { %v6161_v28 = vpack.c.bf16 %v3171_v21, %v3171_v21  ;;  %v6162_v42 = vpack.c.bf16 %v3172_v10, %v3172_v10 }
 0x2be   : > { %3334 = vst.msk [vmem:[%s9600_s24 + $0xb0] sm:$0xf] %vm3311_vm8, %v6163_v35  ;;  %3335 = vst.msk [vmem:[%s9600_s24 + $0xb4] sm:$0xf] %vm3311_vm8, %v6164_v5 }
 0x2bf   : > { %3332 = vst.msk [vmem:[%s9600_s24 + $0xa0] sm:$0xf] %vm3311_vm8, %v6161_v28  ;;  %3333 = vst.msk [vmem:[%s9600_s24 + $0xa4] sm:$0xf] %vm3311_vm8, %v6162_v42 }
 0x2c2   : > { %v7569_v58 = vpop.permute.xlu1 %7568 }
 0x2c3   : > { %v7571_v6 = vunpack.i.h.bf16 %v7569_v58  ;;  %v7570_v2 = vunpack.i.l.bf16 %v7569_v58  ;;  %v7574_v32 = vpop.permute.xlu0 %7573 }
 0x2c4   : > { %v7576_v41 = vunpack.i.h.bf16 %v7574_v32  ;;  %v7575_v45 = vunpack.i.l.bf16 %v7574_v32 }
 0x2c5   : > { %v3177_v39 = vsel %vm782_vm3, %v9324_v47, %v7570_v2  ;;  %v3178_v25 = vsel %vm782_vm3, %v9343_v26, %v7571_v6 }
 0x2c6   : > { %v6167_v63 = vpack.c.bf16 %v3177_v39, %v3177_v39  ;;  %v6168_v17 = vpack.c.bf16 %v3178_v25, %v3178_v25  ;;  %v3175_v55 = vsel %vm782_vm3, %v9334_v33, %v7575_v45  ;;  %v3176_v43 = vsel %vm782_vm3, %v9348_v8, %v7576_v41 }
 0x2c7   : > { %v6165_v60 = vpack.c.bf16 %v3175_v55, %v3175_v55  ;;  %v6166_v27 = vpack.c.bf16 %v3176_v43, %v3176_v43 }
 0x2c8   : > { %3338 = vst.msk [vmem:[%s9600_s24 + $0xd0] sm:$0xf] %vm3311_vm8, %v6167_v63  ;;  %3339 = vst.msk [vmem:[%s9600_s24 + $0xd4] sm:$0xf] %vm3311_vm8, %v6168_v17 }
 0x2c9   : > { %3336 = vst.msk [vmem:[%s9600_s24 + $0xc0] sm:$0xf] %vm3311_vm8, %v6165_v60  ;;  %3337 = vst.msk [vmem:[%s9600_s24 + $0xc4] sm:$0xf] %vm3311_vm8, %v6166_v27 }
 0x2cd   : > { %v7579_v47 = vpop.permute.xlu1 %7578 }
 0x2ce   : > { %v7581_v26 = vunpack.i.h.bf16 %v7579_v47  ;;  %v7580_v33 = vunpack.i.l.bf16 %v7579_v47 }
 0x2cf   : > { %v7584_v30 = vpop.permute.xlu0 %7583 }
 0x2d0   : > { %v3181_v8 = vsel %vm782_vm3, %v9384_v49, %v7580_v33  ;;  %v3182_v4 = vsel %vm782_vm3, %v9403_v48, %v7581_v26  ;;  %v7586_v22 = vunpack.i.h.bf16 %v7584_v30  ;;  %v7585_v12 = vunpack.i.l.bf16 %v7584_v30 }
 0x2d1   : > { %v6171_v19 = vpack.c.bf16 %v3181_v8, %v3181_v8  ;;  %v6172_v15 = vpack.c.bf16 %v3182_v4, %v3182_v4 }
 0x2d2   : > { %v3179_v34 = vsel %vm782_vm3, %v9392_v1, %v7585_v12  ;;  %v3180_v0 = vsel %vm782_vm3, %v9408_v53, %v7586_v22 }
 0x2d3   : > { %3342 = vst.msk [vmem:[%s9600_s24 + $0xf0] sm:$0xf] %vm3311_vm8, %v6171_v19  ;;  %3343 = vst.msk [vmem:[%s9600_s24 + $0xf4] sm:$0xf] %vm3311_vm8, %v6172_v15  ;;  %v6169_v7 = vpack.c.bf16 %v3179_v34, %v3179_v34  ;;  %v6170_v11 = vpack.c.bf16 %v3180_v0, %v3180_v0 }
 0x2d5   : > { %3340 = vst.msk [vmem:[%s9600_s24 + $0xe0] sm:$0xf] %vm3311_vm8, %v6169_v7  ;;  %3341 = vst.msk [vmem:[%s9600_s24 + $0xe4] sm:$0xf] %vm3311_vm8, %v6170_v11 }
 0x307   : > { %v9726_v49 = vpop.f32.mrb[32].mxu0 }
 0x308   : > { %v9728_v48 = vpop.f32.mrb[33].mxu0  ;;  %v4185_v52 = vmul.f32 %v9726_v49, %v9726_v49  ;;  %v4116_v13 = vsel %vm782_vm3, %v9726_v49, 0.0 }
 0x309   : > { %v4183_v1 = vmul.f32 %v9728_v48, %v9728_v48  ;;  %v9732_v56 = vpop.f32.mrb[34].mxu0  ;;  %v4113_v23 = vsel %vm782_vm3, %v9728_v48, 0.0 }
 0x30a   : > { %v9734_v53 = vpop.f32.mrb[35].mxu0  ;;  %v4186_v62 = vmul.f32 %v9732_v56, %v9732_v56  ;;  %v4218_v61 = vsel %vm782_vm3, %v4185_v52, 0.0  ;;  %v4118_v57 = vsel %vm782_vm3, %v9732_v56, 0.0 }
 0x30b   : > { %v4114_v18 = vsel %vm782_vm3, %v9734_v53, 0.0  ;;  %v4184_v16 = vmul.f32 %v9734_v53, %v9734_v53  ;;  %v4215_v36 = vsel %vm782_vm3, %v4183_v1, 0.0 }
 0x30c   : > { %v4115_v38 = vadd.f32 %v4114_v18, %v4113_v23  ;;  %v4220_v3 = vsel %vm782_vm3, %v4186_v62, 0.0 }
 0x30d   : > { %v4216_v20 = vsel %vm782_vm3, %v4184_v16, 0.0 }
 0x30e   : > { %v4117_v31 = vadd.f32 %v4116_v13, %v4115_v38  ;;  %v4217_v54 = vadd.f32 %v4216_v20, %v4215_v36  ;;  %v6992_v14 = vpop.f32.mrb[32].mxu1 }
 0x30f   : > { %v4872_v37 = vpop.f32.mrb[33].mxu1  ;;  %v9751_v9 = vpop.f32.mrb[36].mxu0  ;;  %v5034_v50 = vsel %vm782_vm3, %v6992_v14, 0.0  ;;  %v5103_v46 = vmul.f32 %v6992_v14, %v6992_v14 }
 0x310   : > { %v4219_v24 = vadd.f32 %v4218_v61, %v4217_v54  ;;  %v5101_v59 = vmul.f32 %v4872_v37, %v4872_v37  ;;  %v6993_v40 = vpop.f32.mrb[34].mxu1  ;;  %v9755_v51 = vpop.f32.mrb[37].mxu0  ;;  %v5031_v10 = vsel %vm782_vm3, %v4872_v37, 0.0  ;;  %v4119_v45 = vadd.f32 %v4118_v57, %v4117_v31 }
 0x311   : > { %v7587_v35 = vpack.i.bf16 %v6993_v40, %v6992_v14  ;;  %v4875_v5 = vpop.f32.mrb[35].mxu1  ;;  %v9759_v21 = vpop.f32.mrb[38].mxu0  ;;  %v5104_v32 = vmul.f32 %v6993_v40, %v6993_v40  ;;  %v4120_v25 = vsel %vm782_vm3, %v9755_v51, 0.0  ;;  %v4187_v63 = vmul.f32 %v9755_v51, %v9755_v51 }
 0x312   : > { %v7592_v28 = vpack.i.bf16 %v4875_v5, %v4872_v37  ;;  %v5032_v42 = vsel %vm782_vm3, %v4875_v5, 0.0  ;;  %v5102_v58 = vmul.f32 %v4875_v5, %v4875_v5  ;;  %v9763_v6 = vpop.f32.mrb[39].mxu0  ;;  %v5133_v2 = vsel %vm782_vm3, %v5101_v59, 0.0 }
 0x313   : > { %v5033_v41 = vadd.f32 %v5032_v42, %v5031_v10  ;;  %7588 = vrot.lane.b32.xlu1 %v7587_v35, %s7875_s20  ;;  %v4221_v17 = vadd.f32 %v4220_v3, %v4219_v24  ;;  %v5136_v55 = vsel %vm782_vm3, %v5103_v46, 0.0  ;;  %v4121_v27 = vadd.f32 %v4120_v25, %v4119_v45 }
 0x314   : > { %v5134_v39 = vsel %vm782_vm3, %v5102_v58, 0.0  ;;  %7593 = vrot.lane.b32.xlu0 %v7592_v28, %s7875_s20  ;;  %v5036_v47 = vsel %vm782_vm3, %v6993_v40, 0.0  ;;  %v4189_v26 = vmul.f32 %v9751_v9, %v9751_v9  ;;  %v4222_v33 = vsel %vm782_vm3, %v4187_v63, 0.0 }
 0x315   : > { %v5035_v43 = vadd.f32 %v5034_v50, %v5033_v41  ;;  %v5135_v60 = vadd.f32 %v5134_v39, %v5133_v2  ;;  %v4122_v30 = vsel %vm782_vm3, %v9763_v6, 0.0  ;;  %v4223_v22 = vadd.f32 %v4222_v33, %v4221_v17 }
 0x316   : > { %v6996_v8 = vpop.f32.mrb[36].mxu1  ;;  %v4123_v12 = vadd.f32 %v4122_v30, %v4121_v27  ;;  %v4188_v19 = vmul.f32 %v9763_v6, %v9763_v6  ;;  %v5138_v0 = vsel %vm782_vm3, %v5104_v32, 0.0  ;;  %v4124_v7 = vsel %vm782_vm3, %v9751_v9, 0.0 }
 0x317   : > { %v5137_v4 = vadd.f32 %v5136_v55, %v5135_v60  ;;  %v4888_v15 = vpop.f32.mrb[37].mxu1  ;;  %v9782_v34 = vpop.f32.mrb[40].mxu0  ;;  %v4190_v11 = vmul.f32 %v9759_v21, %v9759_v21  ;;  %v5037_v1 = vadd.f32 %v5036_v47, %v5035_v43  ;;  %v4226_v20 = vsel %vm782_vm3, %v4189_v26, 0.0 }
 0x318   : > { %v6997_v52 = vpop.f32.mrb[38].mxu1  ;;  %v9789_v23 = vpop.f32.mrb[41].mxu0  ;;  %v4125_v18 = vadd.f32 %v4124_v7, %v4123_v12  ;;  %v4224_v16 = vsel %vm782_vm3, %v4188_v19, 0.0  ;;  %v5038_v38 = vsel %vm782_vm3, %v4888_v15, 0.0  ;;  %v5105_v13 = vmul.f32 %v4888_v15, %v4888_v15 }
 0x319   : > { %v4891_v36 = vpop.f32.mrb[39].mxu1  ;;  %v9793_v62 = vpop.f32.mrb[42].mxu0  ;;  %v4225_v31 = vadd.f32 %v4224_v16, %v4223_v22  ;;  %v5039_v54 = vadd.f32 %v5038_v38, %v5037_v1  ;;  %v5139_v14 = vadd.f32 %v5138_v0, %v5137_v4  ;;  %v4126_v37 = vsel %vm782_vm3, %v9759_v21, 0.0 }
 0x31a   : > { %v9796_v61 = vpop.f32.mrb[43].mxu0  ;;  %v5107_v57 = vmul.f32 %v6996_v8, %v6996_v8  ;;  %v5140_v24 = vsel %vm782_vm3, %v5105_v13, 0.0  ;;  %v7597_v59 = vpack.i.bf16 %v6997_v52, %v6996_v8  ;;  %v7602_v50 = vpack.i.bf16 %v4891_v36, %v4888_v15 }
 0x31b   : > { %v4227_v40 = vadd.f32 %v4226_v20, %v4225_v31  ;;  %v5141_v3 = vadd.f32 %v5140_v24, %v5139_v14  ;;  %v5040_v46 = vsel %vm782_vm3, %v4891_v36, 0.0  ;;  %v4228_v35 = vsel %vm782_vm3, %v4190_v11, 0.0 }
 0x31c   : > { %v5042_v5 = vsel %vm782_vm3, %v6996_v8, 0.0  ;;  %v5041_v10 = vadd.f32 %v5040_v46, %v5039_v54  ;;  %v5106_v28 = vmul.f32 %v4891_v36, %v4891_v36  ;;  %7598 = vrot.lane.b32.xlu1 %v7597_v59, %s7875_s20  ;;  %v5108_v42 = vmul.f32 %v6997_v52, %v6997_v52  ;;  %7603 = vrot.lane.b32.xlu0 %v7602_v50, %s7875_s20 }
 0x31d   : > { %v4127_v58 = vadd.f32 %v4126_v37, %v4125_v18  ;;  %v4128_v2 = vsel %vm782_vm3, %v9789_v23, 0.0  ;;  %v4191_v32 = vmul.f32 %v9789_v23, %v9789_v23  ;;  %v5144_v45 = vsel %vm782_vm3, %v5107_v57, 0.0 }
 0x31e   : > { %v7000_v41 = vpop.f32.mrb[40].mxu1  ;;  %v5043_v39 = vadd.f32 %v5042_v5, %v5041_v10  ;;  %v5142_v25 = vsel %vm782_vm3, %v5106_v28, 0.0  ;;  %v4229_v63 = vadd.f32 %v4228_v35, %v4227_v40  ;;  %v5044_v43 = vsel %vm782_vm3, %v6997_v52, 0.0 }
 0x31f   : > { %v4904_v17 = vpop.f32.mrb[41].mxu1  ;;  %v9812_v55 = vpop.f32.mrb[44].mxu0  ;;  %v5143_v60 = vadd.f32 %v5142_v25, %v5141_v3  ;;  %v4129_v27 = vadd.f32 %v4128_v2, %v4127_v58  ;;  %v4230_v47 = vsel %vm782_vm3, %v4191_v32, 0.0  ;;  %v4193_v30 = vmul.f32 %v9782_v34, %v9782_v34 }
 0x320   : > { %v7001_v26 = vpop.f32.mrb[42].mxu1  ;;  %v9816_v33 = vpop.f32.mrb[45].mxu0  ;;  %v4231_v8 = vadd.f32 %v4230_v47, %v4229_v63  ;;  %v4130_v4 = vsel %vm782_vm3, %v9796_v61, 0.0  ;;  %v4192_v22 = vmul.f32 %v9796_v61, %v9796_v61  ;;  %v5146_v15 = vsel %vm782_vm3, %v5108_v42, 0.0 }
 0x321   : > { %v4907_v12 = vpop.f32.mrb[43].mxu1  ;;  %v9824_v19 = vpop.f32.mrb[46].mxu0  ;;  %v5145_v0 = vadd.f32 %v5144_v45, %v5143_v60  ;;  %v4132_v7 = vsel %vm782_vm3, %v9782_v34, 0.0  ;;  %v4131_v11 = vadd.f32 %v4130_v4, %v4129_v27  ;;  %v4134_v52 = vsel %vm782_vm3, %v9793_v62, 0.0 }
 0x322   : > { %v9829_v1 = vpop.f32.mrb[47].mxu0  ;;  %v4232_v18 = vsel %vm782_vm3, %v4192_v22, 0.0  ;;  %v5045_v16 = vadd.f32 %v5044_v43, %v5043_v39  ;;  %v5046_v38 = vsel %vm782_vm3, %v4904_v17, 0.0  ;;  %v4194_v13 = vmul.f32 %v9793_v62, %v9793_v62 }
 0x323   : > { %v4133_v36 = vadd.f32 %v4132_v7, %v4131_v11  ;;  %v4233_v20 = vadd.f32 %v4232_v18, %v4231_v8  ;;  %v5109_v31 = vmul.f32 %v4904_v17, %v4904_v17  ;;  %v4234_v54 = vsel %vm782_vm3, %v4193_v30, 0.0 }
 0x324   : > { %v5047_v14 = vadd.f32 %v5046_v38, %v5045_v16  ;;  %v5147_v37 = vadd.f32 %v5146_v15, %v5145_v0  ;;  %v7607_v57 = vpack.i.bf16 %v7001_v26, %v7000_v41  ;;  %v5111_v59 = vmul.f32 %v7000_v41, %v7000_v41 }
 0x325   : > { %v4235_v24 = vadd.f32 %v4234_v54, %v4233_v20  ;;  %v5148_v40 = vsel %vm782_vm3, %v5109_v31, 0.0  ;;  %v7612_v3 = vpack.i.bf16 %v4907_v12, %v4904_v17  ;;  %v5050_v46 = vsel %vm782_vm3, %v7000_v41, 0.0 }
 0x326   : > { %v9839_v50 = vpop.f32.mrb[44].mxu1  ;;  %v5149_v35 = vadd.f32 %v5148_v40, %v5147_v37  ;;  %v5048_v5 = vsel %vm782_vm3, %v4907_v12, 0.0  ;;  %v5110_v10 = vmul.f32 %v4907_v12, %v4907_v12  ;;  %7608 = vrot.lane.b32.xlu1 %v7607_v57, %s7875_s20  ;;  %v4236_v58 = vsel %vm782_vm3, %v4194_v13, 0.0 }
 0x327   : > { %v9844_v28 = vpop.f32.mrb[45].mxu1  ;;  %v9846_v42 = vpop.f32.mrb[48].mxu0  ;;  %v5112_v2 = vmul.f32 %v7001_v26, %v7001_v26  ;;  %v5049_v32 = vadd.f32 %v5048_v5, %v5047_v14  ;;  %v4135_v45 = vadd.f32 %v4134_v52, %v4133_v36  ;;  %7613 = vrot.lane.b32.xlu0 %v7612_v3, %s7875_s20  ;;  %v4136_v63 = vsel %vm782_vm3, %v9816_v33, 0.0 }
 0x328   : > { %v9850_v39 = vpop.f32.mrb[46].mxu1  ;;  %v9852_v41 = vpop.f32.mrb[49].mxu0  ;;  %v5150_v25 = vsel %vm782_vm3, %v5110_v10, 0.0  ;;  %v4195_v17 = vmul.f32 %v9816_v33, %v9816_v33  ;;  %v4237_v43 = vadd.f32 %v4236_v58, %v4235_v24  ;;  %v5152_v47 = vsel %vm782_vm3, %v5111_v59, 0.0 }
 0x329   : > { %v4923_v60 = vpop.f32.mrb[47].mxu1  ;;  %v9859_v27 = vpop.f32.mrb[50].mxu0  ;;  %v5051_v30 = vadd.f32 %v5050_v46, %v5049_v32  ;;  %v5151_v8 = vadd.f32 %v5150_v25, %v5149_v35  ;;  %v4137_v4 = vadd.f32 %v4136_v63, %v4135_v45  ;;  %v5052_v12 = vsel %vm782_vm3, %v7001_v26, 0.0 }
 0x32a   : > { %v9862_v22 = vpop.f32.mrb[51].mxu0  ;;  %v4197_v15 = vmul.f32 %v9812_v55, %v9812_v55  ;;  %v4238_v0 = vsel %vm782_vm3, %v4195_v17, 0.0  ;;  %v4138_v7 = vsel %vm782_vm3, %v9829_v1, 0.0  ;;  %v4196_v16 = vmul.f32 %v9829_v1, %v9829_v1 }
 0x32b   : > { %v5153_v11 = vadd.f32 %v5152_v47, %v5151_v8  ;;  %v4239_v52 = vadd.f32 %v4238_v0, %v4237_v43  ;;  %v4139_v18 = vadd.f32 %v4138_v7, %v4137_v4  ;;  %v5154_v38 = vsel %vm782_vm3, %v5112_v2, 0.0 }
 0x32c   : > { %v4140_v13 = vsel %vm782_vm3, %v9812_v55, 0.0  ;;  %v4198_v26 = vmul.f32 %v9824_v19, %v9824_v19  ;;  %v5053_v36 = vadd.f32 %v5052_v12, %v5051_v30  ;;  %v4240_v31 = vsel %vm782_vm3, %v4196_v16, 0.0 }
 0x32d   : > { %v4141_v20 = vadd.f32 %v4140_v13, %v4139_v18  ;;  %v5054_v54 = vsel %vm782_vm3, %v9844_v28, 0.0  ;;  %v5113_v14 = vmul.f32 %v9844_v28, %v9844_v28  ;;  %v4242_v57 = vsel %vm782_vm3, %v4197_v15, 0.0 }
 0x32e   : > { %v9882_v37 = vpop.f32.mrb[48].mxu1  ;;  %v4241_v24 = vadd.f32 %v4240_v31, %v4239_v52  ;;  %v5055_v59 = vadd.f32 %v5054_v54, %v5053_v36  ;;  %v5155_v40 = vadd.f32 %v5154_v38, %v5153_v11  ;;  %v4142_v35 = vsel %vm782_vm3, %v9824_v19, 0.0 }
 0x32f   : > { %v9885_v3 = vpop.f32.mrb[49].mxu1  ;;  %v9887_v46 = vpop.f32.mrb[52].mxu0  ;;  %v5115_v5 = vmul.f32 %v9839_v50, %v9839_v50  ;;  %v5156_v10 = vsel %vm782_vm3, %v5113_v14, 0.0  ;;  %v7617_v58 = vpack.i.bf16 %v9850_v39, %v9839_v50  ;;  %v7622_v63 = vpack.i.bf16 %v4923_v60, %v9844_v28 }
 0x330   : > { %v9896_v2 = vpop.f32.mrb[50].mxu1  ;;  %v9898_v32 = vpop.f32.mrb[53].mxu0  ;;  %v4243_v45 = vadd.f32 %v4242_v57, %v4241_v24  ;;  %v5157_v25 = vadd.f32 %v5156_v10, %v5155_v40  ;;  %v5056_v17 = vsel %vm782_vm3, %v4923_v60, 0.0  ;;  %v4244_v30 = vsel %vm782_vm3, %v4198_v26, 0.0 }
 0x331   : > { %v4939_v43 = vpop.f32.mrb[51].mxu1  ;;  %v9902_v47 = vpop.f32.mrb[54].mxu0  ;;  %v5058_v8 = vsel %vm782_vm3, %v9839_v50, 0.0  ;;  %v5057_v4 = vadd.f32 %v5056_v17, %v5055_v59  ;;  %v5114_v12 = vmul.f32 %v4923_v60, %v4923_v60  ;;  %7618 = vrot.lane.b32.xlu1 %v7617_v58, %s7875_s20  ;;  %v5116_v0 = vmul.f32 %v9850_v39, %v9850_v39  ;;  %7623 = vrot.lane.b32.xlu0 %v7622_v63, %s7875_s20 }
 0x332   : > { %v9908_v15 = vpop.f32.mrb[55].mxu0  ;;  %v4143_v28 = vadd.f32 %v4142_v35, %v4141_v20  ;;  %v4144_v7 = vsel %vm782_vm3, %v9852_v41, 0.0  ;;  %v4199_v11 = vmul.f32 %v9852_v41, %v9852_v41  ;;  %v5160_v50 = vsel %vm782_vm3, %v5115_v5, 0.0 }
 0x333   : > { %v5059_v52 = vadd.f32 %v5058_v8, %v5057_v4  ;;  %v5158_v60 = vsel %vm782_vm3, %v5114_v12, 0.0  ;;  %v4245_v18 = vadd.f32 %v4244_v30, %v4243_v45  ;;  %v5060_v16 = vsel %vm782_vm3, %v9850_v39, 0.0 }
 0x334   : > { %v5159_v38 = vadd.f32 %v5158_v60, %v5157_v25  ;;  %v4145_v13 = vadd.f32 %v4144_v7, %v4143_v28  ;;  %v4246_v26 = vsel %vm782_vm3, %v4199_v11, 0.0  ;;  %v4201_v36 = vmul.f32 %v9846_v42, %v9846_v42 }
 0x335   : > { %v4247_v20 = vadd.f32 %v4246_v26, %v4245_v18  ;;  %v4146_v31 = vsel %vm782_vm3, %v9862_v22, 0.0  ;;  %v4200_v54 = vmul.f32 %v9862_v22, %v9862_v22  ;;  %v5162_v57 = vsel %vm782_vm3, %v5116_v0, 0.0 }
 0x336   : > { %v9928_v14 = vpop.f32.mrb[52].mxu1  ;;  %v5161_v24 = vadd.f32 %v5160_v50, %v5159_v38  ;;  %v4148_v39 = vsel %vm782_vm3, %v9846_v42, 0.0  ;;  %v4147_v59 = vadd.f32 %v4146_v31, %v4145_v13  ;;  %v4150_v5 = vsel %vm782_vm3, %v9859_v27, 0.0 }
 0x337   : > { %v9933_v40 = vpop.f32.mrb[53].mxu1  ;;  %v9935_v35 = vpop.f32.mrb[56].mxu0  ;;  %v4248_v10 = vsel %vm782_vm3, %v4200_v54, 0.0  ;;  %v5061_v58 = vadd.f32 %v5060_v16, %v5059_v52  ;;  %v5062_v45 = vsel %vm782_vm3, %v9885_v3, 0.0  ;;  %v4202_v17 = vmul.f32 %v9859_v27, %v9859_v27 }
 0x338   : > { %v9942_v25 = vpop.f32.mrb[54].mxu1  ;;  %v9944_v63 = vpop.f32.mrb[57].mxu0  ;;  %v4149_v30 = vadd.f32 %v4148_v39, %v4147_v59  ;;  %v4249_v8 = vadd.f32 %v4248_v10, %v4247_v20  ;;  %v5117_v4 = vmul.f32 %v9885_v3, %v9885_v3  ;;  %v4250_v28 = vsel %vm782_vm3, %v4201_v36, 0.0 }
 0x339   : > { %v9950_v12 = vpop.f32.mrb[55].mxu1  ;;  %v9952_v0 = vpop.f32.mrb[58].mxu0  ;;  %v5063_v7 = vadd.f32 %v5062_v45, %v5061_v58  ;;  %v5163_v11 = vadd.f32 %v5162_v57, %v5161_v24  ;;  %v7627_v50 = vpack.i.bf16 %v9896_v2, %v9882_v37  ;;  %v5119_v18 = vmul.f32 %v9882_v37, %v9882_v37 }
 0x33a   : > { %v9957_v52 = vpop.f32.mrb[59].mxu0  ;;  %v4251_v60 = vadd.f32 %v4250_v28, %v4249_v8  ;;  %v5164_v16 = vsel %vm782_vm3, %v5117_v4, 0.0  ;;  %v7632_v38 = vpack.i.bf16 %v4939_v43, %v9885_v3  ;;  %v5066_v13 = vsel %vm782_vm3, %v9882_v37, 0.0 }
 0x33b   : > { %v5165_v26 = vadd.f32 %v5164_v16, %v5163_v11  ;;  %v5064_v36 = vsel %vm782_vm3, %v4939_v43, 0.0  ;;  %v5118_v20 = vmul.f32 %v4939_v43, %v4939_v43  ;;  %7628 = vrot.lane.b32.xlu1 %v7627_v50, %s7875_s20  ;;  %v4252_v31 = vsel %vm782_vm3, %v4202_v17, 0.0 }
 0x33c   : > { %v5120_v54 = vmul.f32 %v9896_v2, %v9896_v2  ;;  %v5065_v57 = vadd.f32 %v5064_v36, %v5063_v7  ;;  %v4151_v24 = vadd.f32 %v4150_v5, %v4149_v30  ;;  %7633 = vrot.lane.b32.xlu0 %v7632_v38, %s7875_s20  ;;  %v4152_v37 = vsel %vm782_vm3, %v9898_v32, 0.0 }
 0x33d   : > { %v5166_v3 = vsel %vm782_vm3, %v5118_v20, 0.0  ;;  %v4203_v39 = vmul.f32 %v9898_v32, %v9898_v32  ;;  %v4253_v43 = vadd.f32 %v4252_v31, %v4251_v60  ;;  %v5168_v10 = vsel %vm782_vm3, %v5119_v18, 0.0 }
 0x33e   : > { %v9976_v59 = vpop.f32.mrb[56].mxu1  ;;  %v5067_v58 = vadd.f32 %v5066_v13, %v5065_v57  ;;  %v5167_v45 = vadd.f32 %v5166_v3, %v5165_v26  ;;  %v4153_v17 = vadd.f32 %v4152_v37, %v4151_v24  ;;  %v5068_v30 = vsel %vm782_vm3, %v9896_v2, 0.0 }
 0x33f   : > { %v9979_v8 = vpop.f32.mrb[57].mxu1  ;;  %v9981_v5 = vpop.f32.mrb[60].mxu0  ;;  %v4205_v4 = vmul.f32 %v9887_v46, %v9887_v46  ;;  %v4254_v28 = vsel %vm782_vm3, %v4203_v39, 0.0  ;;  %v4154_v7 = vsel %vm782_vm3, %v9908_v15, 0.0  ;;  %v4204_v38 = vmul.f32 %v9908_v15, %v9908_v15 }
 0x340   : > { %v9990_v11 = vpop.f32.mrb[58].mxu1  ;;  %v9992_v50 = vpop.f32.mrb[61].mxu0  ;;  %v5169_v60 = vadd.f32 %v5168_v10, %v5167_v45  ;;  %v4255_v18 = vadd.f32 %v4254_v28, %v4253_v43  ;;  %v4155_v16 = vadd.f32 %v4154_v7, %v4153_v17  ;;  %v5170_v26 = vsel %vm782_vm3, %v5120_v54, 0.0 }
 0x341   : > { %v9996_v13 = vpop.f32.mrb[59].mxu1  ;;  %v9998_v2 = vpop.f32.mrb[62].mxu0  ;;  %v4156_v36 = vsel %vm782_vm3, %v9887_v46, 0.0  ;;  %v4206_v20 = vmul.f32 %v9902_v47, %v9902_v47  ;;  %v5069_v31 = vadd.f32 %v5068_v30, %v5067_v58  ;;  %v4256_v3 = vsel %vm782_vm3, %v4204_v38, 0.0 }
 0x342   : > { %v10005_v57 = vpop.f32.mrb[63].mxu0  ;;  %v4157_v24 = vadd.f32 %v4156_v36, %v4155_v16  ;;  %v5070_v37 = vsel %vm782_vm3, %v9933_v40, 0.0  ;;  %v5121_v39 = vmul.f32 %v9933_v40, %v9933_v40  ;;  %v4258_v54 = vsel %vm782_vm3, %v4205_v4, 0.0 }
 0x343   : > { %v4257_v43 = vadd.f32 %v4256_v3, %v4255_v18  ;;  %v5071_v10 = vadd.f32 %v5070_v37, %v5069_v31  ;;  %v5171_v45 = vadd.f32 %v5170_v26, %v5169_v60  ;;  %v4158_v17 = vsel %vm782_vm3, %v9902_v47, 0.0 }
 0x344   : > { %v5123_v58 = vmul.f32 %v9928_v14, %v9928_v14  ;;  %v5172_v30 = vsel %vm782_vm3, %v5121_v39, 0.0  ;;  %v7637_v28 = vpack.i.bf16 %v9942_v25, %v9928_v14  ;;  %v7642_v38 = vpack.i.bf16 %v9950_v12, %v9933_v40 }
 0x345   : > { %v4259_v7 = vadd.f32 %v4258_v54, %v4257_v43  ;;  %v5173_v16 = vadd.f32 %v5172_v30, %v5171_v45  ;;  %v5072_v4 = vsel %vm782_vm3, %v9950_v12, 0.0  ;;  %v4260_v18 = vsel %vm782_vm3, %v4206_v20, 0.0 }
 0x346   : > { %v10024_v60 = vpop.f32.mrb[60].mxu1  ;;  %v5074_v26 = vsel %vm782_vm3, %v9928_v14, 0.0  ;;  %v5073_v36 = vadd.f32 %v5072_v4, %v5071_v10  ;;  %v5122_v31 = vmul.f32 %v9950_v12, %v9950_v12  ;;  %7638 = vrot.lane.b32.xlu1 %v7637_v28, %s7875_s20  ;;  %v5124_v40 = vmul.f32 %v9942_v25, %v9942_v25  ;;  %7643 = vrot.lane.b32.xlu0 %v7642_v38, %s7875_s20 }
 0x347   : > { %v10032_v3 = vpop.f32.mrb[61].mxu1  ;;  %v4159_v37 = vadd.f32 %v4158_v17, %v4157_v24  ;;  %v4160_v39 = vsel %vm782_vm3, %v9944_v63, 0.0  ;;  %v4207_v20 = vmul.f32 %v9944_v63, %v9944_v63  ;;  %v5176_v12 = vsel %vm782_vm3, %v5123_v58, 0.0 }
 0x348   : > { %v10041_v14 = vpop.f32.mrb[62].mxu1  ;;  %v5075_v54 = vadd.f32 %v5074_v26, %v5073_v36  ;;  %v5174_v43 = vsel %vm782_vm3, %v5122_v31, 0.0  ;;  %v4261_v10 = vadd.f32 %v4260_v18, %v4259_v7  ;;  %v5076_v24 = vsel %vm782_vm3, %v9942_v25, 0.0 }
 0x349   : > { %v10045_v45 = vpop.f32.mrb[63].mxu1  ;;  %v5175_v17 = vadd.f32 %v5174_v43, %v5173_v16  ;;  %v4161_v30 = vadd.f32 %v4160_v39, %v4159_v37  ;;  %v4262_v28 = vsel %vm782_vm3, %v4207_v20, 0.0  ;;  %v4209_v38 = vmul.f32 %v9935_v35, %v9935_v35 }
 0x34a   : > { %v4263_v4 = vadd.f32 %v4262_v28, %v4261_v10  ;;  %v4162_v58 = vsel %vm782_vm3, %v9957_v52, 0.0  ;;  %v4208_v26 = vmul.f32 %v9957_v52, %v9957_v52  ;;  %v5178_v7 = vsel %vm782_vm3, %v5124_v40, 0.0 }
 0x34b   : > { %v5177_v18 = vadd.f32 %v5176_v12, %v5175_v17  ;;  %v4164_v25 = vsel %vm782_vm3, %v9935_v35, 0.0  ;;  %v4163_v16 = vadd.f32 %v4162_v58, %v4161_v30  ;;  %v4166_v36 = vsel %vm782_vm3, %v9952_v0, 0.0 }
 0x34c   : > { %v4264_v31 = vsel %vm782_vm3, %v4208_v26, 0.0  ;;  %v5077_v37 = vadd.f32 %v5076_v24, %v5075_v54  ;;  %v5078_v39 = vsel %vm782_vm3, %v9979_v8, 0.0  ;;  %v4210_v20 = vmul.f32 %v9952_v0, %v9952_v0 }
 0x34d   : > { %v4165_v43 = vadd.f32 %v4164_v25, %v4163_v16  ;;  %v4265_v10 = vadd.f32 %v4264_v31, %v4263_v4  ;;  %v5125_v40 = vmul.f32 %v9979_v8, %v9979_v8  ;;  %v4266_v12 = vsel %vm782_vm3, %v4209_v38, 0.0 }
 0x34e   : > { %v5079_v17 = vadd.f32 %v5078_v39, %v5077_v37  ;;  %v5179_v30 = vadd.f32 %v5178_v7, %v5177_v18  ;;  %v7647_v28 = vpack.i.bf16 %v9990_v11, %v9976_v59  ;;  %v5127_v54 = vmul.f32 %v9976_v59, %v9976_v59 }
 0x34f   : > { %v4267_v58 = vadd.f32 %v4266_v12, %v4265_v10  ;;  %v5180_v24 = vsel %vm782_vm3, %v5125_v40, 0.0  ;;  %v7652_v26 = vpack.i.bf16 %v9996_v13, %v9979_v8  ;;  %v5082_v4 = vsel %vm782_vm3, %v9976_v59, 0.0 }
 0x350   : > { %v5181_v25 = vadd.f32 %v5180_v24, %v5179_v30  ;;  %v5080_v38 = vsel %vm782_vm3, %v9996_v13, 0.0  ;;  %v5126_v7 = vmul.f32 %v9996_v13, %v9996_v13  ;;  %7648 = vrot.lane.b32.xlu1 %v7647_v28, %s7875_s20  ;;  %v4268_v18 = vsel %vm782_vm3, %v4210_v20, 0.0 }
 0x351   : > { %v5128_v16 = vmul.f32 %v9990_v11, %v9990_v11  ;;  %v5081_v31 = vadd.f32 %v5080_v38, %v5079_v17  ;;  %v4167_v37 = vadd.f32 %v4166_v36, %v4165_v43  ;;  %7653 = vrot.lane.b32.xlu0 %v7652_v26, %s7875_s20  ;;  %v4168_v8 = vsel %vm782_vm3, %v9992_v50, 0.0 }
 0x352   : > { %v5182_v59 = vsel %vm782_vm3, %v5126_v7, 0.0  ;;  %v4211_v39 = vmul.f32 %v9992_v50, %v9992_v50  ;;  %v4269_v13 = vadd.f32 %v4268_v18, %v4267_v58  ;;  %v5184_v10 = vsel %vm782_vm3, %v5127_v54, 0.0 }
 0x353   : > { %v5083_v40 = vadd.f32 %v5082_v4, %v5081_v31  ;;  %v5183_v20 = vadd.f32 %v5182_v59, %v5181_v25  ;;  %v4169_v12 = vadd.f32 %v4168_v8, %v4167_v37  ;;  %v5084_v17 = vsel %vm782_vm3, %v9990_v11, 0.0 }
 0x354   : > { %v4213_v36 = vmul.f32 %v9981_v5, %v9981_v5  ;;  %v4270_v43 = vsel %vm782_vm3, %v4211_v39, 0.0  ;;  %v4170_v30 = vsel %vm782_vm3, %v10005_v57, 0.0  ;;  %v4212_v58 = vmul.f32 %v10005_v57, %v10005_v57 }
 0x355   : > { %v5185_v28 = vadd.f32 %v5184_v10, %v5183_v20  ;;  %v4271_v24 = vadd.f32 %v4270_v43, %v4269_v13  ;;  %v4171_v26 = vadd.f32 %v4170_v30, %v4169_v12  ;;  %v5186_v54 = vsel %vm782_vm3, %v5128_v16, 0.0 }
 0x356   : > { %v4172_v4 = vsel %vm782_vm3, %v9981_v5, 0.0  ;;  %v4214_v11 = vmul.f32 %v9998_v2, %v9998_v2  ;;  %v5085_v25 = vadd.f32 %v5084_v17, %v5083_v40  ;;  %v4272_v7 = vsel %vm782_vm3, %v4212_v58, 0.0 }
 0x357   : > { %v4173_v38 = vadd.f32 %v4172_v4, %v4171_v26  ;;  %v5086_v18 = vsel %vm782_vm3, %v10032_v3, 0.0  ;;  %v5129_v31 = vmul.f32 %v10032_v3, %v10032_v3  ;;  %v4174_v37 = vsel %vm782_vm3, %v9998_v2, 0.0 }
 0x358   : > { %v4273_v16 = vadd.f32 %v4272_v7, %v4271_v24  ;;  %v5087_v59 = vadd.f32 %v5086_v18, %v5085_v25  ;;  %v5187_v8 = vadd.f32 %v5186_v54, %v5185_v28  ;;  %v4274_v39 = vsel %vm782_vm3, %v4213_v36, 0.0 }
 0x359   : > { %v4175_v13 = vadd.f32 %v4174_v37, %v4173_v38  ;;  %v5188_v10 = vsel %vm782_vm3, %v5129_v31, 0.0  ;;  %v7662_v40 = vpack.i.bf16 %v10041_v14, %v10024_v60  ;;  %v4276_v20 = vsel %vm782_vm3, %v4214_v11, 0.0 }
 0x35a   : > { %v4275_v12 = vadd.f32 %v4274_v39, %v4273_v16  ;;  %v5189_v17 = vadd.f32 %v5188_v10, %v5187_v8  ;;  %v7657_v43 = vpack.i.bf16 %v10045_v45, %v10032_v3  ;;  %v5131_v24 = vmul.f32 %v10024_v60, %v10024_v60 }
 0x35b   : > { %v4176_v30 = vrot.slane %v4175_v13, 4  ;;  %v5088_v36 = vsel %vm782_vm3, %v10045_v45, 0.0  ;;  %v5130_v28 = vmul.f32 %v10045_v45, %v10045_v45  ;;  %7663 = vrot.lane.b32.xlu1 %v7662_v40, %s7875_s20  ;;  %v5090_v3 = vsel %vm782_vm3, %v10024_v60, 0.0 }
 0x35c   : > { %v4277_v26 = vadd.f32 %v4276_v20, %v4275_v12  ;;  %v5089_v58 = vadd.f32 %v5088_v36, %v5087_v59  ;;  %7658 = vrot.lane.b32.xlu0 %v7657_v43, %s7875_s20  ;;  %v5132_v4 = vmul.f32 %v10041_v14, %v10041_v14  ;;  %v5192_v45 = vsel %vm782_vm3, %v5131_v24, 0.0 }
 0x35d   : > { %v4177_v54 = vadd.f32 %v4176_v30, %v4175_v13  ;;  %v5190_v11 = vsel %vm782_vm3, %v5130_v28, 0.0  ;;  %v5092_v31 = vsel %vm782_vm3, %v10041_v14, 0.0 }
 0x35e   : > { %v4278_v25 = vrot.slane %v4277_v26, 4  ;;  %v5091_v38 = vadd.f32 %v5090_v3, %v5089_v58  ;;  %v5191_v7 = vadd.f32 %v5190_v11, %v5189_v17  ;;  %v5194_v60 = vsel %vm782_vm3, %v5132_v4, 0.0 }
 0x35f   : > { %v4178_v18 = vrot.slane %v4177_v54, 2 }
 0x360   : > { %v4279_v37 = vadd.f32 %v4278_v25, %v4277_v26  ;;  %v5093_v16 = vadd.f32 %v5092_v31, %v5091_v38  ;;  %v5193_v59 = vadd.f32 %v5192_v45, %v5191_v7 }
 0x361   : > { %v4179_v8 = vadd.f32 %v4178_v18, %v4177_v54 }
 0x362   : > { %v4280_v39 = vrot.slane %v4279_v37, 2  ;;  %v5094_v13 = vrot.slane %v5093_v16, 4  ;;  %v5195_v10 = vadd.f32 %v5194_v60, %v5193_v59 }
 0x363   : > { %v4180_v40 = vrot.slane %v4179_v8, 1 }
 0x364   : > { %v4281_v20 = vadd.f32 %v4280_v39, %v4279_v37  ;;  %v5095_v12 = vadd.f32 %v5094_v13, %v5093_v16  ;;  %v5196_v17 = vrot.slane %v5195_v10, 4 }
 0x365   : > { %v4181_v43 = vadd.f32 %v4180_v40, %v4179_v8 }
 0x366   : > { %v4282_v30 = vrot.slane %v4281_v20, 1  ;;  %v5096_v24 = vrot.slane %v5095_v12, 2  ;;  %v5197_v36 = vadd.f32 %v5196_v17, %v5195_v10 }
 0x367   : > { %v4182_v14 = vadd.f32 %v4181_v43, %v9589_v29 }
 0x368   : > { %v4283_v28 = vadd.f32 %v4282_v30, %v4281_v20  ;;  %v5097_v26 = vadd.f32 %v5096_v24, %v5095_v12  ;;  %v5198_v58 = vrot.slane %v5197_v36, 2 }
 0x36a   : > { %v4284_v54 = vadd.f32 %v4283_v28, %v9591_v44  ;;  %v5098_v3 = vrot.slane %v5097_v26, 1  ;;  %v5199_v4 = vadd.f32 %v5198_v58, %v5197_v36 }
 0x36c   : > { %v5099_v11 = vadd.f32 %v5098_v3, %v5097_v26  ;;  %v5200_v25 = vrot.slane %v5199_v4, 1 }
 0x36e   : > { %v5100_v38 = vadd.f32 %v5099_v11, %v4182_v14  ;;  %v5201_v7 = vadd.f32 %v5200_v25, %v5199_v4 }
 0x370   : > { %v5202_v18 = vadd.f32 %v5201_v7, %v4284_v54  ;;  %5525 = vst.msk [vmem:[%s230_s7] sm:$0x1] %vm5524_vm9, %v5100_v38 }
 0x372   : > { %5526 = vst.msk [vmem:[%s230_s7 + $0x1] sm:$0x1] %vm5524_vm9, %v5202_v18 }
 0x373   : > { %7764 = shalt.err (!%p7761_p5)
}
 0x374   : > { %s7765_s9 = scalar_lea.hbm %s10145_s30, 32  ;;  %s7769_s11 = scalar_lea.hbm %s10359_s3, 64 }
 0x375   : > { %p7766_p9 = scmp.ne.s32.totalorder %s10145_s30, %s7765_s9  ;;  %p7770_p3 = scmp.lt.u32.totalorder %s10145_s30, %s10359_s3 }
 0x376   : > { %p7771_p7 = scmp.lt.u32.totalorder %s7769_s11, %s7765_s9  ;;  %p7773_p4 = scmp.lt.u32.totalorder %s7765_s9, %s10145_s30 }
 0x377   : > { %p7767_p1 = pnand %p7766_p9, %p7994_p10 }
 0x378   : > { %p7772_p11 = por %p7771_p7, %p7770_p3 }
 0x379   : > { %p7768_p2 = pneg %p7767_p1 }
 0x37a   : > { %p7774_p6 = por %p7773_p4, %p7772_p11 }
 0x37c   : > { %p7775_p8 = pnand %p7774_p6, %p7768_p2 }
 0x37e   : > { %7778 = shalt.err (!%p7775_p8)
}
 0x37f   : > { %7432 = dma.vmem_to_hbm [thread:$0]  (%p7994_p10), %s10147_s8, 32, %s10145_s30, %s5533_s21  }
 0x380   : > { %s6205_s8 = sshll.u32 %s7861_s15, 12  ;;  %s5549_s19 = sshll.u32 %s9600_s24, 4  ;;  %s10298_s19 = int_to_ptr.vmem [resolvable:$true] %s5549_s19 }
 0x381   : > { %s10296_s21 = scalar_lea.hbm %s10358_s2, %s6205_s8  ;;  %s5528_s27 = scalar_lea.sflag [#allocation4], %s8051_s25 }
 0x382   : > { %s7779_s4 = scalar_lea.vmem %s10298_s19, 4096  ;;  %s7877_s26 = smov [#allocation7]  }
 0x383   : > { %p7780_p12 = scmp.ne.s32.totalorder %s10298_s19, %s7779_s4  ;;  %s7783_s6 = sshll.u32 %s7877_s26, 4  ;;  %s7784_s6 = int_to_ptr.vmem [resolvable:$false] %s7783_s6 }
 0x384   : > { %s7785_s9 = scalar_lea.vmem %s7784_s6, 8192  ;;  %p7786_p5 = scmp.lt.s32.totalorder %s10298_s19, %s7784_s6 }
 0x385   : > { %v7589_v29 = vpop.permute.xlu1 %7588  ;;  %p7781_p13 = pnand %p7780_p12, %p7994_p10  ;;  %p7787_p9 = scmp.lt.s32.totalorder %s7785_s9, %s7779_s4 }
 0x386   : > { %v7591_v44 = vunpack.i.h.bf16 %v7589_v29  ;;  %v7590_v45 = vunpack.i.l.bf16 %v7589_v29  ;;  %v7594_v31 = vpop.permute.xlu0 %7593 }
 0x387   : > { %v7596_v37 = vunpack.i.h.bf16 %v7594_v31  ;;  %v7595_v16 = vunpack.i.l.bf16 %v7594_v31  ;;  %p7782_p0 = pneg %p7781_p13  ;;  %p7788_p1 = por %p7787_p9, %p7786_p5 }
 0x388   : > { %v5333_v59 = vsel %vm782_vm3, %v9726_v49, %v7590_v45  ;;  %v5334_v8 = vsel %vm782_vm3, %v9732_v56, %v7591_v44 }
 0x389   : > { %v6175_v60 = vpack.c.bf16 %v5333_v59, %v5333_v59  ;;  %v6176_v39 = vpack.c.bf16 %v5334_v8, %v5334_v8  ;;  %v5331_v13 = vsel %vm782_vm3, %v9728_v48, %v7595_v16  ;;  %v5332_v10 = vsel %vm782_vm3, %v9734_v53, %v7596_v37  ;;  %p7789_p2 = pnand %p7788_p1, %p7782_p0 }
 0x38a   : > { %v6173_v40 = vpack.c.bf16 %v5331_v13, %v5331_v13  ;;  %v6174_v20 = vpack.c.bf16 %v5332_v10, %v5332_v10 }
 0x38b   : > { %6104 = vst.msk [vmem:[%s9600_s24 + $0x18] sm:$0xf] %vm3311_vm8, %v6175_v60  ;;  %6105 = vst.msk [vmem:[%s9600_s24 + $0x1c] sm:$0xf] %vm3311_vm8, %v6176_v39 }
 0x38c   : > { %6102 = vst.msk [vmem:[%s9600_s24 + $0x8] sm:$0xf] %vm3311_vm8, %v6173_v40  ;;  %6103 = vst.msk [vmem:[%s9600_s24 + $0xc] sm:$0xf] %vm3311_vm8, %v6174_v20 }
 0x38e   : > { %v7599_v49 = vpop.permute.xlu1 %7598  ;;  %v7604_v12 = vpop.permute.xlu0 %7603 }
 0x38f   : > { %v7601_v56 = vunpack.i.h.bf16 %v7599_v49  ;;  %v7600_v48 = vunpack.i.l.bf16 %v7599_v49  ;;  %v7606_v17 = vunpack.i.h.bf16 %v7604_v12  ;;  %v7605_v53 = vunpack.i.l.bf16 %v7604_v12 }
 0x391   : > { %v5337_v43 = vsel %vm782_vm3, %v9751_v9, %v7600_v48  ;;  %v5338_v30 = vsel %vm782_vm3, %v9759_v21, %v7601_v56  ;;  %v5335_v14 = vsel %vm782_vm3, %v9755_v51, %v7605_v53  ;;  %v5336_v28 = vsel %vm782_vm3, %v9763_v6, %v7606_v17 }
 0x392   : > { %v6179_v24 = vpack.c.bf16 %v5337_v43, %v5337_v43  ;;  %v6180_v36 = vpack.c.bf16 %v5338_v30, %v5338_v30  ;;  %v6177_v26 = vpack.c.bf16 %v5335_v14, %v5335_v14  ;;  %v6178_v58 = vpack.c.bf16 %v5336_v28, %v5336_v28 }
 0x394   : > { %6108 = vst.msk [vmem:[%s9600_s24 + $0x38] sm:$0xf] %vm3311_vm8, %v6179_v24  ;;  %6109 = vst.msk [vmem:[%s9600_s24 + $0x3c] sm:$0xf] %vm3311_vm8, %v6180_v36 }
 0x395   : > { %6106 = vst.msk [vmem:[%s9600_s24 + $0x28] sm:$0xf] %vm3311_vm8, %v6177_v26  ;;  %6107 = vst.msk [vmem:[%s9600_s24 + $0x2c] sm:$0xf] %vm3311_vm8, %v6178_v58 }
 0x398   : > { %v7609_v9 = vpop.permute.xlu1 %7608 }
 0x399   : > { %v7611_v21 = vunpack.i.h.bf16 %v7609_v9  ;;  %v7610_v51 = vunpack.i.l.bf16 %v7609_v9  ;;  %v7614_v54 = vpop.permute.xlu0 %7613 }
 0x39a   : > { %v7616_v3 = vunpack.i.h.bf16 %v7614_v54  ;;  %v7615_v6 = vunpack.i.l.bf16 %v7614_v54 }
 0x39b   : > { %v5341_v4 = vsel %vm782_vm3, %v9782_v34, %v7610_v51  ;;  %v5342_v11 = vsel %vm782_vm3, %v9793_v62, %v7611_v21 }
 0x39c   : > { %v6183_v25 = vpack.c.bf16 %v5341_v4, %v5341_v4  ;;  %v6184_v38 = vpack.c.bf16 %v5342_v11, %v5342_v11  ;;  %v5339_v7 = vsel %vm782_vm3, %v9789_v23, %v7615_v6  ;;  %v5340_v18 = vsel %vm782_vm3, %v9796_v61, %v7616_v3 }
 0x39d   : > { %v6181_v29 = vpack.c.bf16 %v5339_v7, %v5339_v7  ;;  %v6182_v44 = vpack.c.bf16 %v5340_v18, %v5340_v18 }
 0x39e   : > { %6112 = vst.msk [vmem:[%s9600_s24 + $0x58] sm:$0xf] %vm3311_vm8, %v6183_v25  ;;  %6113 = vst.msk [vmem:[%s9600_s24 + $0x5c] sm:$0xf] %vm3311_vm8, %v6184_v38 }
 0x39f   : > { %6110 = vst.msk [vmem:[%s9600_s24 + $0x48] sm:$0xf] %vm3311_vm8, %v6181_v29  ;;  %6111 = vst.msk [vmem:[%s9600_s24 + $0x4c] sm:$0xf] %vm3311_vm8, %v6182_v44 }
 0x3a3   : > { %v7619_v34 = vpop.permute.xlu1 %7618  ;;  %v7624_v45 = vpop.permute.xlu0 %7623 }
 0x3a4   : > { %v7621_v62 = vunpack.i.h.bf16 %v7619_v34  ;;  %v7620_v23 = vunpack.i.l.bf16 %v7619_v34  ;;  %v7626_v31 = vunpack.i.h.bf16 %v7624_v45  ;;  %v7625_v61 = vunpack.i.l.bf16 %v7624_v45 }
 0x3a6   : > { %v5345_v37 = vsel %vm782_vm3, %v9812_v55, %v7620_v23  ;;  %v5346_v16 = vsel %vm782_vm3, %v9824_v19, %v7621_v62  ;;  %v5343_v60 = vsel %vm782_vm3, %v9816_v33, %v7625_v61  ;;  %v5344_v39 = vsel %vm782_vm3, %v9829_v1, %v7626_v31 }
 0x3a7   : > { %v6187_v59 = vpack.c.bf16 %v5345_v37, %v5345_v37  ;;  %v6188_v8 = vpack.c.bf16 %v5346_v16, %v5346_v16  ;;  %v6185_v13 = vpack.c.bf16 %v5343_v60, %v5343_v60  ;;  %v6186_v10 = vpack.c.bf16 %v5344_v39, %v5344_v39 }
 0x3a9   : > { %6116 = vst.msk [vmem:[%s9600_s24 + $0x78] sm:$0xf] %vm3311_vm8, %v6187_v59  ;;  %6117 = vst.msk [vmem:[%s9600_s24 + $0x7c] sm:$0xf] %vm3311_vm8, %v6188_v8 }
 0x3aa   : > { %6114 = vst.msk [vmem:[%s9600_s24 + $0x68] sm:$0xf] %vm3311_vm8, %v6185_v13  ;;  %6115 = vst.msk [vmem:[%s9600_s24 + $0x6c] sm:$0xf] %vm3311_vm8, %v6186_v10 }
 0x3ad   : > { %v7629_v55 = vpop.permute.xlu1 %7628 }
 0x3ae   : > { %v7631_v19 = vunpack.i.h.bf16 %v7629_v55  ;;  %v7630_v33 = vunpack.i.l.bf16 %v7629_v55  ;;  %v7634_v40 = vpop.permute.xlu0 %7633 }
 0x3af   : > { %v7636_v20 = vunpack.i.h.bf16 %v7634_v40  ;;  %v7635_v1 = vunpack.i.l.bf16 %v7634_v40 }
 0x3b0   : > { %v5349_v49 = vsel %vm782_vm3, %v9846_v42, %v7630_v33  ;;  %v5350_v56 = vsel %vm782_vm3, %v9859_v27, %v7631_v19 }
 0x3b1   : > { %v6191_v48 = vpack.c.bf16 %v5349_v49, %v5349_v49  ;;  %v6192_v12 = vpack.c.bf16 %v5350_v56, %v5350_v56  ;;  %v5347_v17 = vsel %vm782_vm3, %v9852_v41, %v7635_v1  ;;  %v5348_v53 = vsel %vm782_vm3, %v9862_v22, %v7636_v20 }
 0x3b2   : > { %v6189_v43 = vpack.c.bf16 %v5347_v17, %v5347_v17  ;;  %v6190_v30 = vpack.c.bf16 %v5348_v53, %v5348_v53 }
 0x3b3   : > { %6120 = vst.msk [vmem:[%s9600_s24 + $0x98] sm:$0xf] %vm3311_vm8, %v6191_v48  ;;  %6121 = vst.msk [vmem:[%s9600_s24 + $0x9c] sm:$0xf] %vm3311_vm8, %v6192_v12 }
 0x3b4   : > { %6118 = vst.msk [vmem:[%s9600_s24 + $0x88] sm:$0xf] %vm3311_vm8, %v6189_v43  ;;  %6119 = vst.msk [vmem:[%s9600_s24 + $0x8c] sm:$0xf] %vm3311_vm8, %v6190_v30 }
 0x3b8   : > { %v7639_v42 = vpop.permute.xlu1 %7638  ;;  %v7644_v24 = vpop.permute.xlu0 %7643 }
 0x3b9   : > { %v7641_v27 = vunpack.i.h.bf16 %v7639_v42  ;;  %v7640_v41 = vunpack.i.l.bf16 %v7639_v42  ;;  %v7646_v36 = vunpack.i.h.bf16 %v7644_v24  ;;  %v7645_v22 = vunpack.i.l.bf16 %v7644_v24 }
 0x3bb   : > { %v5353_v14 = vsel %vm782_vm3, %v9887_v46, %v7640_v41  ;;  %v5354_v28 = vsel %vm782_vm3, %v9902_v47, %v7641_v27  ;;  %v5351_v9 = vsel %vm782_vm3, %v9898_v32, %v7645_v22  ;;  %v5352_v21 = vsel %vm782_vm3, %v9908_v15, %v7646_v36 }
 0x3bc   : > { %v6195_v26 = vpack.c.bf16 %v5353_v14, %v5353_v14  ;;  %v6196_v58 = vpack.c.bf16 %v5354_v28, %v5354_v28  ;;  %v6193_v51 = vpack.c.bf16 %v5351_v9, %v5351_v9  ;;  %v6194_v54 = vpack.c.bf16 %v5352_v21, %v5352_v21 }
 0x3be   : > { %6124 = vst.msk [vmem:[%s9600_s24 + $0xb8] sm:$0xf] %vm3311_vm8, %v6195_v26  ;;  %6125 = vst.msk [vmem:[%s9600_s24 + $0xbc] sm:$0xf] %vm3311_vm8, %v6196_v58 }
 0x3bf   : > { %6122 = vst.msk [vmem:[%s9600_s24 + $0xa8] sm:$0xf] %vm3311_vm8, %v6193_v51  ;;  %6123 = vst.msk [vmem:[%s9600_s24 + $0xac] sm:$0xf] %vm3311_vm8, %v6194_v54 }
 0x3c2   : > { %v7649_v46 = vpop.permute.xlu1 %7648 }
 0x3c3   : > { %v7651_v47 = vunpack.i.h.bf16 %v7649_v46  ;;  %v7650_v32 = vunpack.i.l.bf16 %v7649_v46  ;;  %v7654_v3 = vpop.permute.xlu0 %7653 }
 0x3c4   : > { %v7656_v6 = vunpack.i.h.bf16 %v7654_v3  ;;  %v7655_v15 = vunpack.i.l.bf16 %v7654_v3 }
 0x3c5   : > { %v5357_v4 = vsel %vm782_vm3, %v9935_v35, %v7650_v32  ;;  %v5358_v11 = vsel %vm782_vm3, %v9952_v0, %v7651_v47 }
 0x3c6   : > { %v6199_v25 = vpack.c.bf16 %v5357_v4, %v5357_v4  ;;  %v6200_v38 = vpack.c.bf16 %v5358_v11, %v5358_v11  ;;  %v5355_v7 = vsel %vm782_vm3, %v9944_v63, %v7655_v15  ;;  %v5356_v18 = vsel %vm782_vm3, %v9957_v52, %v7656_v6 }
 0x3c7   : > { %v6197_v29 = vpack.c.bf16 %v5355_v7, %v5355_v7  ;;  %v6198_v44 = vpack.c.bf16 %v5356_v18, %v5356_v18 }
 0x3c8   : > { %6128 = vst.msk [vmem:[%s9600_s24 + $0xd8] sm:$0xf] %vm3311_vm8, %v6199_v25  ;;  %6129 = vst.msk [vmem:[%s9600_s24 + $0xdc] sm:$0xf] %vm3311_vm8, %v6200_v38 }
 0x3c9   : > { %6126 = vst.msk [vmem:[%s9600_s24 + $0xc8] sm:$0xf] %vm3311_vm8, %v6197_v29  ;;  %6127 = vst.msk [vmem:[%s9600_s24 + $0xcc] sm:$0xf] %vm3311_vm8, %v6198_v44 }
 0x3cd   : > { %v7664_v35 = vpop.permute.xlu1 %7663 }
 0x3ce   : > { %v7666_v0 = vunpack.i.h.bf16 %v7664_v35  ;;  %v7665_v34 = vunpack.i.l.bf16 %v7664_v35  ;;  %v7659_v62 = vpop.permute.xlu0 %7658 }
 0x3cf   : > { %v7661_v63 = vunpack.i.h.bf16 %v7659_v62  ;;  %v7660_v52 = vunpack.i.l.bf16 %v7659_v62 }
 0x3d0   : > { %v5361_v23 = vsel %vm782_vm3, %v9981_v5, %v7665_v34  ;;  %v5362_v45 = vsel %vm782_vm3, %v9998_v2, %v7666_v0 }
 0x3d1   : > { %v6203_v31 = vpack.c.bf16 %v5361_v23, %v5361_v23  ;;  %v6204_v61 = vpack.c.bf16 %v5362_v45, %v5362_v45  ;;  %v5359_v37 = vsel %vm782_vm3, %v9992_v50, %v7660_v52  ;;  %v5360_v16 = vsel %vm782_vm3, %v10005_v57, %v7661_v63 }
 0x3d2   : > { %v6201_v59 = vpack.c.bf16 %v5359_v37, %v5359_v37  ;;  %v6202_v8 = vpack.c.bf16 %v5360_v16, %v5360_v16 }
 0x3d3   : > { %6132 = vst.msk [vmem:[%s9600_s24 + $0xf8] sm:$0xf] %vm3311_vm8, %v6203_v31  ;;  %6133 = vst.msk [vmem:[%s9600_s24 + $0xfc] sm:$0xf] %vm3311_vm8, %v6204_v61 }
 0x3d4   : > { %6130 = vst.msk [vmem:[%s9600_s24 + $0xe8] sm:$0xf] %vm3311_vm8, %v6201_v59  ;;  %6131 = vst.msk [vmem:[%s9600_s24 + $0xec] sm:$0xf] %vm3311_vm8, %v6202_v8 }
 0x3d5   : > { %7792 = shalt.err (!%p7789_p2)
}
 0x3d6   : > { %s7793_s24 = scalar_lea.hbm %s10296_s21, 4096  ;;  %s7797_s11 = scalar_lea.hbm %s10358_s2, 8192 }
 0x3d7   : > { %p7794_p3 = scmp.ne.s32.totalorder %s10296_s21, %s7793_s24  ;;  %p7798_p4 = scmp.lt.u32.totalorder %s10296_s21, %s10358_s2 }
 0x3d8   : > { %p7799_p6 = scmp.lt.u32.totalorder %s7797_s11, %s7793_s24  ;;  %p7801_p12 = scmp.lt.u32.totalorder %s7793_s24, %s10296_s21 }
 0x3d9   : > { %p7795_p7 = pnand %p7794_p3, %p7994_p10 }
 0x3da   : > { %p7800_p8 = por %p7799_p6, %p7798_p4 }
 0x3db   : > { %p7796_p11 = pneg %p7795_p7 }
 0x3dc   : > { %p7802_p13 = por %p7801_p12, %p7800_p8 }
 0x3de   : > { %p7803_p0 = pnand %p7802_p13, %p7796_p11 }
 0x3e0   : > { %7806 = shalt.err (!%p7803_p0)
}
 0x3e1   : > { %s7878_s8 = smov 64  }
 0x3e2   : > { %7431 = dma.vmem_to_hbm [thread:$0]  (%p7994_p10), %s10298_s19, 4096, %s10296_s21, %s5528_s27, %s7878_s8, %s7878_s8, %s7875_s20  }
 0x3e3 PF: > { %s5578_s15 = sand.u32 1, %s7849_s12   ;;  %p10536_p5 = scmp.ne.s32.totalorder %s10434_s23, 0 }
 0x3e4   : > { %p10537_p9 = scmp.ge.s32.totalorder %s7869_s17, 2  ;;  %s5579_s30 = scalar_lea.sflag [#allocation4], %s5578_s15 }
 0x3e6   : > { %p7444_p1 = pnand %p10537_p9, %p10536_p5 }
 0x3e8   : > { %7840 = dma.done.wait (!%p7444_p1), %s5579_s30, 4096  }
 0x3e9   : > { %7842 = vsyncadd (!%p7444_p1), %s5579_s30, 4294963200  ;;  %s5588_s4 = scalar_lea.sflag [#allocation9], %s5578_s15 }
 0x3ea   : > { %7844 = dma.done.wait (!%p7444_p1), %s5588_s4, 32  }
 0x3eb   : > { %7846 = vsyncadd (!%p7444_p1), %s5588_s4, 4294967264  ;;  %s24_s17 = sadd.s32 1, %s7869_s17   ;;  %s10538_s12 = smov %s7853_s13 }
 0x3ec   : > { %p21_p2 = scmp.ge.s32.totalorder %s24_s17, 4   ;;  %s10539_s13 = smov %s7857_s14 }
 0x3ed   : > { %s10540_s14 = smov %s8003_s5  ;;  %s10541_s15 = smov %s7865_s16 }
 0x3ee   : > { %s10542_s16 = smov %s10544_s28  ;;  %23 = sbr.rel (!%p21_p2) target bundleno = 9 (0x9), region = 99 }
 0x3f5   :  { %5593 = vsyncpa [#allocation3], 1 }
 0x3f6   :  { %5595 = vsyncpa [#allocation3 + $0x1], 1 }
 0x3f7   :  { %5596 = vsyncpa [#allocation6], 1 }
 0x3f8   :  { %5597 = vsyncpa [#allocation4], 1 }
 0x3f9   :  { %5599 = vsyncpa [#allocation4 + $0x1], 1 }
 0x3fa   :  { %5600 = vsyncpa [#allocation9], 1 }
 0x3fb   :  { %5602 = vsyncpa [#allocation9 + $0x1], 1 }

</bundles_post_ra>
